<compile_context>
chip_gen: v7x
topology: tpu7x:2x2x1
jax: 0.10.0
libtpu: 0.0.40
codegen_flags: <defaults>
</compile_context>

<pallas_src>
import functools

import jax
import jax.numpy as jnp
import numpy as np
from jax import lax
from jax.experimental import pallas as pl
from jax.experimental.pallas import tpu as pltpu

_EPS = 1e-5
_VMEM_LIMIT = 32 * 1024 * 1024


# ---------------------------------------------------------------------------
# In-kernel helpers
# ---------------------------------------------------------------------------
def _conv3x3_flat(src_ref, w_ref, *, Wp, L, mm_dtype):
    """3x3 'same' conv on a flattened, guard-padded activation.

    `src_ref` holds the spatially zero-padded activation (Hp, Wp, K) flattened
    row-major to (Hp*Wp, K) with Wp+1 zero guard rows prepended and appended,
    so tap (kh, kw) is the contiguous row slice [kh*Wp+kw : kh*Wp+kw+L).
    The 9 taps are concatenated into an im2col matrix and contracted in one
    deep MXU matmul (f32 accumulation).  Returns (L, C) in the same flat padded
    layout; border positions contain garbage and must be masked by the caller.
    """
    taps = [src_ref[kh * Wp + kw: kh * Wp + kw + L, :]
            for kh in range(3) for kw in range(3)]
    patches = jnp.concatenate(taps, axis=-1).astype(mm_dtype)      # (L, 9*K)
    return jnp.dot(patches, w_ref[...], preferred_element_type=jnp.float32)


def _masked_stats(q, m):
    """Single-pass per-channel masked [sum; sum-of-squares] -> (2, C)."""
    qm = q * m
    return jnp.concatenate([jnp.sum(qm, axis=0, keepdims=True),
                            jnp.sum(qm * q, axis=0, keepdims=True)], axis=0)


# ---------------------------------------------------------------------------
# Kernels
# ---------------------------------------------------------------------------
def _conv1_kernel(xp_ref, w_ref, mask_ref, z_ref, st_ref, *, Wp, L, mm_dtype):
    # conv1 (no bias: cancelled by train-mode BN) + masked BN1 partial stats.
    q = _conv3x3_flat(xp_ref, w_ref, Wp=Wp, L=L, mm_dtype=mm_dtype)
    st_ref[...] = _masked_stats(q, mask_ref[...])
    z_ref[...] = q


def _bn_relu_conv2_kernel(z1_ref, a_ref, c_ref, w_ref, mask_ref,
                          z2_ref, st_ref, ypad_ref, *, Wp, L, C, mm_dtype):
    guard = Wp + 1
    m = mask_ref[...]
    # BN1 folded affine + ReLU; the mask re-zeroes the spatial padding border
    # so the scratch holds a correctly zero-padded conv2 input.
    y = jnp.maximum(z1_ref[...] * a_ref[...] + c_ref[...], 0.0) * m
    # Persistent VMEM scratch: zero the guard rows, write the interior with a
    # ref-slice store (no concatenate-based padding copies).
    zeros = jnp.zeros((guard, C), jnp.float32)
    ypad_ref[0:guard, :] = zeros
    ypad_ref[guard + L:guard + L + guard, :] = zeros
    ypad_ref[guard:guard + L, :] = y
    q = _conv3x3_flat(ypad_ref, w_ref, Wp=Wp, L=L, mm_dtype=mm_dtype)
    st_ref[...] = _masked_stats(q, m)
    z2_ref[...] = q


def _bn_add_relu_kernel(z2_ref, a_ref, c_ref, x_ref, *rest,
                        use_1x1conv, mm_dtype):
    # BN2 folded affine + shortcut (1x1 projection or identity) + ReLU.
    if use_1x1conv:
        w3_ref, b3_ref, out_ref = rest
        sc = jnp.dot(x_ref[...].astype(mm_dtype), w3_ref[...],
                     preferred_element_type=jnp.float32) + b3_ref[...]
    else:
        (out_ref,) = rest
        sc = x_ref[...]
    y = z2_ref[...] * a_ref[...] + c_ref[...]
    out_ref[...] = jnp.maximum(y + sc, 0.0)
    # NOTE: with tiny C (demo C=8) the (.., C)-minor stores are lane-masked;
    # real ResNet channel counts (>=64..512) make these stores lane-dense.


# ---------------------------------------------------------------------------
# Wrapper
# ---------------------------------------------------------------------------
def _bn_affine(stats, gamma, beta, count):
    """Fold train-mode BN into per-channel (scale, shift) from summed stats."""
    s = jnp.sum(stats[:, 0, :], axis=0)
    ss = jnp.sum(stats[:, 1, :], axis=0)
    mean = s / count
    var = ss / count - mean * mean          # biased variance (PyTorch train)
    scale = gamma.astype(jnp.float32) * lax.rsqrt(var + _EPS)
    shift = beta.astype(jnp.float32) - mean * scale
    return scale.reshape(1, -1), shift.reshape(1, -1)


def resblock_forward(x_nchw, params, *, stride=1, use_1x1conv=False,
                     matmul_dtype=jnp.bfloat16):
    """Pallas implementation of ResBlock.forward.  x_nchw: (N, Cin, H, W)."""
    N, Cin, H, W = x_nchw.shape
    C = params["w1"].shape[0]
    # TODO(synk): stride > 1 should be handled by decimation at the wrapper /
    # index_map level; the untested in-kernel strided-slice path was removed.
    assert stride == 1, "only stride=1 is implemented"
    if not use_1x1conv:
        assert Cin == C, "identity shortcut requires matching channels"

    Hp, Wp = H + 2, W + 2
    L = Hp * Wp                       # flattened padded spatial extent
    guard = Wp + 1                    # guard rows so all 9 taps stay in range
    Lx = L + 2 * guard
    HW = H * W
    f32 = jnp.float32

    # ---- layout plumbing (plain JAX / XLA, outside the kernels) ----
    x_nhwc = jnp.transpose(x_nchw, (0, 2, 3, 1)).astype(f32)        # (N,H,W,Cin)
    xp = jnp.pad(x_nhwc, ((0, 0), (1, 1), (1, 1), (0, 0)))          # (N,Hp,Wp,Cin)
    xp = jnp.pad(xp.reshape(N, L, Cin), ((0, 0), (guard, guard), (0, 0)))

    # PyTorch conv weights (Cout, Cin, kh, kw) -> (kh*kw*Cin, Cout)
    w1r = jnp.transpose(params["w1"], (2, 3, 1, 0)).reshape(9 * Cin, C)
    w2r = jnp.transpose(params["w2"], (2, 3, 1, 0)).reshape(9 * C, C)
    w1r = w1r.astype(matmul_dtype)
    w2r = w2r.astype(matmul_dtype)

    # interior mask of the flattened padded (Hp, Wp) grid
    row_ok = (jnp.arange(Hp) >= 1) & (jnp.arange(Hp) <= H)
    col_ok = (jnp.arange(Wp) >= 1) & (jnp.arange(Wp) <= W)
    mask = (row_ok[:, None] & col_ok[None, :]).reshape(L, 1).astype(f32)

    count = float(N * H * W)
    cparams = pltpu.CompilerParams(dimension_semantics=("parallel",),
                                   vmem_limit_bytes=_VMEM_LIMIT)

    # ---- kernel 1: conv1 + masked BN1 partial statistics ----
    z1, st1 = pl.pallas_call(
        functools.partial(_conv1_kernel, Wp=Wp, L=L, mm_dtype=matmul_dtype),
        grid=(N,),
        in_specs=[pl.BlockSpec((None, Lx, Cin), lambda i: (i, 0, 0)),
                  pl.BlockSpec((9 * Cin, C), lambda i: (0, 0)),
                  pl.BlockSpec((L, 1), lambda i: (0, 0))],
        out_specs=(pl.BlockSpec((None, L, C), lambda i: (i, 0, 0)),
                   pl.BlockSpec((None, 2, C), lambda i: (i, 0, 0))),
        out_shape=(jax.ShapeDtypeStruct((N, L, C), f32),
                   jax.ShapeDtypeStruct((N, 2, C), f32)),
        compiler_params=cparams,
        cost_estimate=pl.CostEstimate(
            flops=2 * N * L * 9 * Cin * C, transcendentals=0,
            bytes_accessed=(N * Lx * Cin * 4 + 9 * Cin * C * 2 + L * 4
                            + N * L * C * 4 + N * 2 * C * 4)),
    )(xp, w1r, mask)

    a1, c1 = _bn_affine(st1, params["g1"], params["be1"], count)

    # ---- kernel 2: BN1 affine + ReLU + conv2 + masked BN2 partial stats ----
    z2, st2 = pl.pallas_call(
        functools.partial(_bn_relu_conv2_kernel, Wp=Wp, L=L, C=C,
                          mm_dtype=matmul_dtype),
        grid=(N,),
        in_specs=[pl.BlockSpec((None, L, C), lambda i: (i, 0, 0)),
                  pl.BlockSpec((1, C), lambda i: (0, 0)),
                  pl.BlockSpec((1, C), lambda i: (0, 0)),
                  pl.BlockSpec((9 * C, C), lambda i: (0, 0)),
                  pl.BlockSpec((L, 1), lambda i: (0, 0))],
        out_specs=(pl.BlockSpec((None, L, C), lambda i: (i, 0, 0)),
                   pl.BlockSpec((None, 2, C), lambda i: (i, 0, 0))),
        out_shape=(jax.ShapeDtypeStruct((N, L, C), f32),
                   jax.ShapeDtypeStruct((N, 2, C), f32)),
        scratch_shapes=[pltpu.VMEM((L + 2 * guard, C), f32)],
        compiler_params=cparams,
        cost_estimate=pl.CostEstimate(
            flops=2 * N * L * 9 * C * C, transcendentals=0,
            bytes_accessed=(2 * N * L * C * 4 + 9 * C * C * 2 + L * 4
                            + N * 2 * C * 4)),
    )(z1, a1, c1, w2r, mask)

    a2, c2 = _bn_affine(st2, params["g2"], params["be2"], count)

    # ---- kernel 3: BN2 affine + shortcut + ReLU ----
    z2i = z2.reshape(N, Hp, Wp, C)[:, 1:H + 1, 1:W + 1, :].reshape(N, HW, C)
    xi = x_nhwc.reshape(N, HW, Cin)
    ins = [z2i, a2, c2, xi]
    in_specs = [pl.BlockSpec((None, HW, C), lambda i: (i, 0, 0)),
                pl.BlockSpec((1, C), lambda i: (0, 0)),
                pl.BlockSpec((1, C), lambda i: (0, 0)),
                pl.BlockSpec((None, HW, Cin), lambda i: (i, 0, 0))]
    if use_1x1conv:
        w3 = jnp.transpose(params["w3"][:, :, 0, 0], (1, 0)).astype(matmul_dtype)
        b3 = params["b3"].reshape(1, C).astype(f32)
        ins += [w3, b3]
        in_specs += [pl.BlockSpec((Cin, C), lambda i: (0, 0)),
                     pl.BlockSpec((1, C), lambda i: (0, 0))]

    out = pl.pallas_call(
        functools.partial(_bn_add_relu_kernel, use_1x1conv=use_1x1conv,
                          mm_dtype=matmul_dtype),
        grid=(N,),
        in_specs=in_specs,
        out_specs=pl.BlockSpec((None, HW, C), lambda i: (i, 0, 0)),
        out_shape=jax.ShapeDtypeStruct((N, HW, C), f32),
        compiler_params=cparams,
    )(*ins)

    return jnp.transpose(out.reshape(N, H, W, C), (0, 3, 1, 2))   # NCHW


# ---------------------------------------------------------------------------
# Pure-JAX reference (XLA), matching PyTorch train-mode semantics.
# ---------------------------------------------------------------------------
def _ref_forward(x, params, *, stride=1, use_1x1conv=False,
                 matmul_dtype=jnp.float32):
    """matmul_dtype mirrors the kernel's bf16 MXU inputs (f32 accumulation)
    for a tight logic check; float32 gives the exact f32 spec."""
    def conv(x, w, b, s, pad):
        y = lax.conv_general_dilated(
            x.astype(matmul_dtype), w.astype(matmul_dtype),
            window_strides=(s, s), padding=[(pad, pad), (pad, pad)],
            dimension_numbers=("NCHW", "OIHW", "NCHW"),
            preferred_element_type=jnp.float32)
        return y + b.reshape(1, -1, 1, 1).astype(jnp.float32)

    def bn(y, g, be):
        mean = jnp.mean(y, axis=(0, 2, 3), keepdims=True)
        var = jnp.mean((y - mean) ** 2, axis=(0, 2, 3), keepdims=True)
        return ((y - mean) * lax.rsqrt(var + _EPS)) * g.reshape(1, -1, 1, 1) \
               + be.reshape(1, -1, 1, 1)

    y = jax.nn.relu(bn(conv(x, params["w1"], params["b1"], stride, 1),
                       params["g1"], params["be1"]))
    y = bn(conv(y, params["w2"], params["b2"], 1, 1),
           params["g2"], params["be2"])
    sc = conv(x, params["w3"], params["b3"], stride, 0) if use_1x1conv else x
    return jax.nn.relu(y + sc)


def _make_params(key, Cin, C, use_1x1conv):
    ks = jax.random.split(key, 10)
    p = {
        "w1": 0.1 * jax.random.normal(ks[0], (C, Cin, 3, 3), jnp.float32),
        "b1": 0.1 * jax.random.normal(ks[1], (C,), jnp.float32),
        "w2": 0.1 * jax.random.normal(ks[2], (C, C, 3, 3), jnp.float32),
        "b2": 0.1 * jax.random.normal(ks[3], (C,), jnp.float32),
        "g1": 1.0 + 0.1 * jax.random.normal(ks[4], (C,), jnp.float32),
        "be1": 0.1 * jax.random.normal(ks[5], (C,), jnp.float32),
        "g2": 1.0 + 0.1 * jax.random.normal(ks[6], (C,), jnp.float32),
        "be2": 0.1 * jax.random.normal(ks[7], (C,), jnp.float32),
    }
    if use_1x1conv:
        p["w3"] = 0.1 * jax.random.normal(ks[8], (C, Cin, 1, 1), jnp.float32)
        p["b3"] = 0.1 * jax.random.normal(ks[9], (C,), jnp.float32)
    return p


def _check(key, *, N, Cin, C, H, W, use_1x1conv, matmul_dtype, tol):
    kp, kx = jax.random.split(key)
    params = _make_params(kp, Cin, C, use_1x1conv)
    x = jax.random.normal(kx, (N, Cin, H, W), jnp.float32)
    out = jax.block_until_ready(
        resblock_forward(x, params, stride=1, use_1x1conv=use_1x1conv,
                         matmul_dtype=matmul_dtype))
    ref = _ref_forward(x, params, stride=1, use_1x1conv=use_1x1conv,
                       matmul_dtype=matmul_dtype)
    assert out.shape == ref.shape == (N, C, H, W)
    np.testing.assert_allclose(np.asarray(out), np.asarray(ref),
                               rtol=tol, atol=tol)


if __name__ == "__main__":
    root = jax.random.PRNGKey(0)
    k1, k2, k3 = jax.random.split(root, 3)
    # 1x1-conv projection shortcut, bf16 MXU inputs (reference mirrors the
    # bf16 casts, everything else f32).
    _check(k1, N=2, Cin=4, C=8, H=16, W=16, use_1x1conv=True,
           matmul_dtype=jnp.bfloat16, tol=1e-2)
    # Same block with full f32 matmuls -> tight check against the exact spec.
    _check(k2, N=2, Cin=4, C=8, H=16, W=16, use_1x1conv=True,
           matmul_dtype=jnp.float32, tol=1e-3)
    # Identity shortcut variant (Cin == C).
    _check(k3, N=2, Cin=8, C=8, H=16, W=16, use_1x1conv=False,
           matmul_dtype=jnp.bfloat16, tol=1e-2)
    print("KERNEL_OK")
</pallas_src>

<mosaic_0001>
module attributes {stable_mosaic.version = 11 : i64} {
  func.func @_conv1_kernel(%arg0: i32, %arg1: memref<1x362x4xf32, #tpu.memory_space<vmem>>, %arg2: memref<36x8xbf16, #tpu.memory_space<vmem>>, %arg3: memref<324x1xf32, #tpu.memory_space<vmem>>, %arg4: memref<1x324x8xf32, #tpu.memory_space<vmem>>, %arg5: memref<1x2x8xf32, #tpu.memory_space<vmem>>) attributes {dimension_semantics = [#tpu.dimension_semantics<parallel>], iteration_bounds = array<i64: 2>, scalar_prefetch = 0 : i64, scratch_operands = 0 : i64, tpu.core_type = #tpu.core_type<tc>, window_params = [{transform_indices = @transform_0, window_bounds = array<i64: 1, 362, 4>}, {pipeline_mode = #tpu.pipeline_mode<synchronous>, transform_indices = @transform_1, window_bounds = array<i64: 36, 8>}, {pipeline_mode = #tpu.pipeline_mode<synchronous>, transform_indices = @transform_2, window_bounds = array<i64: 324, 1>}, {transform_indices = @transform_3, window_bounds = array<i64: 1, 324, 8>}, {transform_indices = @transform_4, window_bounds = array<i64: 1, 2, 8>}]} {
    %c0 = arith.constant 0 : index
    %c0_0 = arith.constant 0 : index
    %c0_1 = arith.constant 0 : index
    %0 = vector.load %arg1[%c0, %c0_0, %c0_1] : memref<1x362x4xf32, #tpu.memory_space<vmem>>, vector<1x324x4xf32>
    %1 = vector.shape_cast %0 : vector<1x324x4xf32> to vector<324x4xf32>
    %c0_2 = arith.constant 0 : index
    %c1 = arith.constant 1 : index
    %c0_3 = arith.constant 0 : index
    %2 = vector.load %arg1[%c0_2, %c1, %c0_3] : memref<1x362x4xf32, #tpu.memory_space<vmem>>, vector<1x324x4xf32>
    %3 = vector.shape_cast %2 : vector<1x324x4xf32> to vector<324x4xf32>
    %c0_4 = arith.constant 0 : index
    %c2 = arith.constant 2 : index
    %c0_5 = arith.constant 0 : index
    %4 = vector.load %arg1[%c0_4, %c2, %c0_5] : memref<1x362x4xf32, #tpu.memory_space<vmem>>, vector<1x324x4xf32>
    %5 = vector.shape_cast %4 : vector<1x324x4xf32> to vector<324x4xf32>
    %c0_6 = arith.constant 0 : index
    %c18 = arith.constant 18 : index
    %c0_7 = arith.constant 0 : index
    %6 = vector.load %arg1[%c0_6, %c18, %c0_7] : memref<1x362x4xf32, #tpu.memory_space<vmem>>, vector<1x324x4xf32>
    %7 = vector.shape_cast %6 : vector<1x324x4xf32> to vector<324x4xf32>
    %c0_8 = arith.constant 0 : index
    %c19 = arith.constant 19 : index
    %c0_9 = arith.constant 0 : index
    %8 = vector.load %arg1[%c0_8, %c19, %c0_9] : memref<1x362x4xf32, #tpu.memory_space<vmem>>, vector<1x324x4xf32>
    %9 = vector.shape_cast %8 : vector<1x324x4xf32> to vector<324x4xf32>
    %c0_10 = arith.constant 0 : index
    %c20 = arith.constant 20 : index
    %c0_11 = arith.constant 0 : index
    %10 = vector.load %arg1[%c0_10, %c20, %c0_11] : memref<1x362x4xf32, #tpu.memory_space<vmem>>, vector<1x324x4xf32>
    %11 = vector.shape_cast %10 : vector<1x324x4xf32> to vector<324x4xf32>
    %c0_12 = arith.constant 0 : index
    %c36 = arith.constant 36 : index
    %c0_13 = arith.constant 0 : index
    %12 = vector.load %arg1[%c0_12, %c36, %c0_13] : memref<1x362x4xf32, #tpu.memory_space<vmem>>, vector<1x324x4xf32>
    %13 = vector.shape_cast %12 : vector<1x324x4xf32> to vector<324x4xf32>
    %c0_14 = arith.constant 0 : index
    %c37 = arith.constant 37 : index
    %c0_15 = arith.constant 0 : index
    %14 = vector.load %arg1[%c0_14, %c37, %c0_15] : memref<1x362x4xf32, #tpu.memory_space<vmem>>, vector<1x324x4xf32>
    %15 = vector.shape_cast %14 : vector<1x324x4xf32> to vector<324x4xf32>
    %c0_16 = arith.constant 0 : index
    %c38 = arith.constant 38 : index
    %c0_17 = arith.constant 0 : index
    %16 = vector.load %arg1[%c0_16, %c38, %c0_17] : memref<1x362x4xf32, #tpu.memory_space<vmem>>, vector<1x324x4xf32>
    %17 = vector.shape_cast %16 : vector<1x324x4xf32> to vector<324x4xf32>
    %18 = tpu.concatenate %1, %3, %5, %7, %9, %11, %13, %15, %17 in 1 : vector<324x4xf32>, vector<324x4xf32>, vector<324x4xf32>, vector<324x4xf32>, vector<324x4xf32>, vector<324x4xf32>, vector<324x4xf32>, vector<324x4xf32>, vector<324x4xf32> -> vector<324x36xf32>
    %19 = arith.truncf %18 : vector<324x36xf32> to vector<324x36xbf16>
    %c0_18 = arith.constant 0 : index
    %c0_19 = arith.constant 0 : index
    %20 = vector.load %arg2[%c0_18, %c0_19] : memref<36x8xbf16, #tpu.memory_space<vmem>>, vector<36x8xbf16>
    %cst = arith.constant dense<0.000000e+00> : vector<324x8xf32>
    %21 = tpu.matmul %19, %20, %cst {dimension_numbers = #tpu.dot_dimension_numbers<[1], [0], [0], [1], [0, 0, 1, 1], [], []>} : vector<324x36xbf16>, vector<36x8xbf16>, vector<324x8xf32> -> vector<324x8xf32>
    %c0_20 = arith.constant 0 : index
    %c0_21 = arith.constant 0 : index
    %22 = vector.load %arg3[%c0_20, %c0_21] : memref<324x1xf32, #tpu.memory_space<vmem>>, vector<324x1xf32>
    %23 = vector.broadcast %22 : vector<324x1xf32> to vector<324x8xf32>
    %24 = arith.mulf %21, %23 : vector<324x8xf32>
    %cst_22 = arith.constant dense<0.000000e+00> : vector<8xf32>
    %25 = vector.multi_reduction <add>, %24, %cst_22 [0] : vector<324x8xf32> to vector<8xf32>
    %26 = vector.shape_cast %25 : vector<8xf32> to vector<1x8xf32>
    %27 = arith.mulf %24, %21 : vector<324x8xf32>
    %cst_23 = arith.constant dense<0.000000e+00> : vector<8xf32>
    %28 = vector.multi_reduction <add>, %27, %cst_23 [0] : vector<324x8xf32> to vector<8xf32>
    %29 = vector.shape_cast %28 : vector<8xf32> to vector<1x8xf32>
    %30 = tpu.concatenate %26, %29 in 0 : vector<1x8xf32>, vector<1x8xf32> -> vector<2x8xf32>
    %c0_24 = arith.constant 0 : index
    %c0_25 = arith.constant 0 : index
    %c0_26 = arith.constant 0 : index
    %31 = vector.load %arg5[%c0_24, %c0_25, %c0_26] : memref<1x2x8xf32, #tpu.memory_space<vmem>>, vector<1x2x8xf32>
    %32 = vector.shape_cast %31 : vector<1x2x8xf32> to vector<2x8xf32>
    %33 = vector.shape_cast %30 : vector<2x8xf32> to vector<1x2x8xf32>
    tpu.vector_store %arg5[%c0_24, %c0_25, %c0_26], %33 {strides = array<i32>} : memref<1x2x8xf32, #tpu.memory_space<vmem>>, vector<1x2x8xf32>,
    %c0_27 = arith.constant 0 : index
    %c0_28 = arith.constant 0 : index
    %c0_29 = arith.constant 0 : index
    %34 = vector.load %arg4[%c0_27, %c0_28, %c0_29] : memref<1x324x8xf32, #tpu.memory_space<vmem>>, vector<1x324x8xf32>
    %35 = vector.shape_cast %34 : vector<1x324x8xf32> to vector<324x8xf32>
    %36 = vector.shape_cast %21 : vector<324x8xf32> to vector<1x324x8xf32>
    tpu.vector_store %arg4[%c0_27, %c0_28, %c0_29], %36 {strides = array<i32>} : memref<1x324x8xf32, #tpu.memory_space<vmem>>, vector<1x324x8xf32>,
    return
  }
  func.func @transform_0(%arg0: i32) -> (i32, i32, i32) {
    %c0_i32 = arith.constant 0 : i32
    %c0_i32_0 = arith.constant 0 : i32
    %c0_i32_1 = arith.constant 0 : i32
    return %arg0, %c0_i32, %c0_i32_0 : i32, i32, i32
  }
  func.func @transform_1(%arg0: i32) -> (i32, i32) {
    %c0_i32 = arith.constant 0 : i32
    %c0_i32_0 = arith.constant 0 : i32
    %c0_i32_1 = arith.constant 0 : i32
    return %c0_i32, %c0_i32_0 : i32, i32
  }
  func.func @transform_2(%arg0: i32) -> (i32, i32) {
    %c0_i32 = arith.constant 0 : i32
    %c0_i32_0 = arith.constant 0 : i32
    %c0_i32_1 = arith.constant 0 : i32
    return %c0_i32, %c0_i32_0 : i32, i32
  }
  func.func @transform_3(%arg0: i32) -> (i32, i32, i32) {
    %c0_i32 = arith.constant 0 : i32
    %c0_i32_0 = arith.constant 0 : i32
    %c0_i32_1 = arith.constant 0 : i32
    return %arg0, %c0_i32, %c0_i32_0 : i32, i32, i32
  }
  func.func @transform_4(%arg0: i32) -> (i32, i32, i32) {
    %c0_i32 = arith.constant 0 : i32
    %c0_i32_0 = arith.constant 0 : i32
    %c0_i32_1 = arith.constant 0 : i32
    return %arg0, %c0_i32, %c0_i32_0 : i32, i32, i32
  }
}

</mosaic_0001>

<bundles_post_ra>
// kernel: tpu_custom_call.1
= control target key start
LH: loop header
LB: loop body
LE: loop exit
PB: predicated region body
PF: predicated region fallthrough
CT: control target
= control target key end

     0   :  { %10 = vsyncpa [#allocation3], 0  ;;  %s6265_s0 = inlined_call_operand.vmem [shape: f32[2,362,4], index: 0, kind: input, shape index: {}]   ;;  %s6266_s1 = inlined_call_operand.vmem [shape: bf16[36,8], index: 1, kind: input, shape index: {}]   ;;  %s6267_s2 = inlined_call_operand.vmem [shape: f32[324,1], index: 2, kind: input, shape index: {}]   ;;  %s6268_s3 = inlined_call_operand.vmem [shape: f32[2,324,8], index: 3, kind: output, shape index: {0}]   ;;  %s6269_s4 = inlined_call_operand.hbm [shape: f32[2,2,8], index: 4, kind: output, shape index: {1}]  }
   0x1   :  { %12 = vsyncpa [#allocation3 + $0x1], 0  ;;  %s4151_s15 = smov 0   ;;  %s4153_s16 = smov 0  }
   0x2   :  { %s4155_s17 = smov 0   ;;  %s4157_s18 = smov 0  }
   0x3 LB: > { %s4172_s19 = sadd.s32 4294967295, %s4112_s18   ;;  %s3038_s20 = sadd.s32 4294967294, %s4112_s18   ;;  %s4112_s18 = sphi %s4157_s18, %s6490_s18   ;;  %s4108_s17 = sphi %s4155_s17, %s6489_s17   ;;  %s4104_s16 = sphi %s4153_s16, %s6488_s16   ;;  %s4100_s15 = sphi %s4151_s15, %s6487_s15  }
   0x4   : > { %s4176_s21 = sadd.s32 1, %s4112_s18   ;;  %s119_s22 = sadd.s32 1, %s4108_s17 }
   0x5   : > { %s116_s23 = ssub.s32 %s4112_s18, %s4176_s21  ;;  %p129_p0 = scmp.ne.s32.totalorder %s4108_s17, %s4104_s16 }
   0x6   : > { %p117_p1 = scmp.eq.s32.totalorder %s116_s23, 0  ;;  %p130_p2 = scmp.eq.s32.totalorder %s4172_s19, 1 }
   0x7   : > { %p135_p3 = scmp.ne.s32.totalorder %s4104_s16, %s4100_s15  ;;  %p136_p4 = scmp.eq.s32.totalorder %s3038_s20, 1 }
   0x8   : > { %s4187_s24 = scalar_select %p117_p1, %s4108_s17, %s119_s22  }
   0x9   : > { %p4189_p5 = por %p130_p2, %p129_p0  ;;  %p4193_p6 = por %p136_p4, %p135_p3 }
   0xa   : > { %p3041_p7 = scmp.ge.s32.totalorder %s4112_s18, 1  ;;  %p168_p8 = scmp.lt.s32.totalorder %s4112_s18, 3 }
   0xc   : > { %p169_p9 = pnand %p3041_p7, %p168_p8 }
   0xe   : > { %172 = sbr.rel (%p169_p9) target bundleno = 738 (0x2e2), region = 32 }
  0x15   : > { %p199_p10 = scmp.lt.s32.totalorder %s4172_s19, 1  ;;  %s4114_s6 = smov 4   ;;  %vm2180_vm0 = vcmask 1041408   ;;  %vm4120_vm1 = vmmov 0   ;;  %vm1739_vm2 = vcmask 31744   ;;  %vm1781_vm3 = vcmask 64512  }
  0x16   : > { %s4115_s7 = smov 8   ;;  %s4116_s8 = smov 12   ;;  %vm1823_vm4 = vcmask 97280   ;;  %vm1865_vm5 = vcmask 130048   ;;  %vm1907_vm6 = vcmask 162816   ;;  %vm1949_vm7 = vcmask 195584  }
  0x17   : > { %s4201_s27 = scalar_select %p199_p10, %s4172_s19, 1  ;;  %vm1991_vm8 = vcmask 228352   ;;  %vm2033_vm9 = vcmask 261120   ;;  %vm2116_vm10 = vcmask 293888   ;;  %vm2750_vm11 = vcmask 60416  }
  0x18   : > { %s4117_s9 = smov 16   ;;  %s4118_s10 = smov 20   ;;  %vm2887_vm12 = vcmask 1040384   ;;  %vm2889_vm13 = vcmask 58368  }
  0x19   : > { %s3193_s28 = smul.u32 368, %s4201_s27  ;;  %s4121_s23 = smov 24  }
  0x1a   : > { %s4123_s29 = smov 28   ;;  %s3070_s11 = sshll.u32 %s4172_s19, 5 }
  0x1b   : > { %s4207_s5 = scalar_lea.vmem %s6265_s0, %s3193_s28  ;;  %s4122_s28 = smov 32  }
  0x1c   : > { %v255_v0 = vld [vmem:[%s4207_s5 + $0x21] sm:$0xff]  ;;  %v256_v1 = vld [vmem:[%s4207_s5 + $0x29] sm:$0xff]  ;;  %v257_v5 = vld [vmem:[%s4207_s5 + $0x31] sm:$0xff]  ;;  %s6223_s22 = scalar_lea.hbm %s6269_s4, %s3070_s11 }
  0x1d   : > { %v251_v2 = vld [vmem:[%s4207_s5 + $0x1] sm:$0xff]  ;;  %v3255_v3 = vpack.i.bf16 %v256_v1, %v255_v0  ;;  %v252_v4 = vld [vmem:[%s4207_s5 + $0x9] sm:$0xff]  ;;  %v258_v6 = vld [vmem:[%s4207_s5 + $0x39] sm:$0xff] }
  0x1e   : > { %v3245_v7 = vpack.i.bf16 %v252_v4, %v251_v2  ;;  %v253_v8 = vld [vmem:[%s4207_s5 + $0x11] sm:$0xff]  ;;  %v254_v9 = vld [vmem:[%s4207_s5 + $0x19] sm:$0xff]  ;;  %v3260_v10 = vpack.i.bf16 %v258_v6, %v257_v5  ;;  %v259_v14 = vld [vmem:[%s4207_s5 + $0x41] sm:$0xff] }
  0x1f   : > { %3256 = vrot.lane.b32.xlu1 %v3255_v3, %s4114_s6  ;;  %v3250_v11 = vpack.i.bf16 %v254_v9, %v253_v8  ;;  %v261_v12 = vld [vmem:[%s4207_s5 + $0x51] sm:$0xff]  ;;  %v262_v13 = vld [vmem:[%s4207_s5 + $0x59] sm:$0xff]  ;;  %v260_v15 = vld [vmem:[%s4207_s5 + $0x49] sm:$0xff] }
  0x20   : > { %3246 = vrot.lane.b32.xlu0 %v3245_v7, %s4114_s6  ;;  %v3270_v16 = vpack.i.bf16 %v262_v13, %v261_v12  ;;  %v3265_v17 = vpack.i.bf16 %v260_v15, %v259_v14  ;;  %v265_v18 = vld [vmem:[%s4207_s5 + $0x71] sm:$0xff]  ;;  %v266_v19 = vld [vmem:[%s4207_s5 + $0x79] sm:$0xff]  ;;  %v263_v20 = vld [vmem:[%s4207_s5 + $0x61] sm:$0xff] }
  0x21   : > { %v264_v21 = vld [vmem:[%s4207_s5 + $0x69] sm:$0xff]  ;;  %v3280_v22 = vpack.i.bf16 %v266_v19, %v265_v18  ;;  %v269_v24 = vld [vmem:[%s4207_s5 + $0x91] sm:$0xff]  ;;  %v270_v25 = vld [vmem:[%s4207_s5 + $0x99] sm:$0xff] }
  0x22   : > { %v3275_v23 = vpack.i.bf16 %v264_v21, %v263_v20  ;;  %v267_v26 = vld [vmem:[%s4207_s5 + $0x81] sm:$0xff]  ;;  %v268_v27 = vld [vmem:[%s4207_s5 + $0x89] sm:$0xff]  ;;  %v3290_v28 = vpack.i.bf16 %v270_v25, %v269_v24  ;;  %v273_v30 = vld [vmem:[%s4207_s5 + $0xb1] sm:$0xff] }
  0x23   : > { %3261 = vrot.lane.b32.xlu1 %v3260_v10, %s4114_s6  ;;  %v3285_v29 = vpack.i.bf16 %v268_v27, %v267_v26  ;;  %v274_v31 = vld [vmem:[%s4207_s5 + $0xb9] sm:$0xff]  ;;  %v271_v32 = vld [vmem:[%s4207_s5 + $0xa1] sm:$0xff]  ;;  %v272_v33 = vld [vmem:[%s4207_s5 + $0xa9] sm:$0xff] }
  0x24   : > { %3251 = vrot.lane.b32.xlu0 %v3250_v11, %s4114_s6  ;;  %v3300_v34 = vpack.i.bf16 %v274_v31, %v273_v30  ;;  %v3295_v35 = vpack.i.bf16 %v272_v33, %v271_v32  ;;  %v277_v36 = vld [vmem:[%s4207_s5 + $0xd1] sm:$0xff]  ;;  %v278_v37 = vld [vmem:[%s4207_s5 + $0xd9] sm:$0xff]  ;;  %v275_v38 = vld [vmem:[%s4207_s5 + $0xc1] sm:$0xff] }
  0x25   : > { %v276_v39 = vld [vmem:[%s4207_s5 + $0xc9] sm:$0xff]  ;;  %v3310_v40 = vpack.i.bf16 %v278_v37, %v277_v36  ;;  %v281_v42 = vld [vmem:[%s4207_s5 + $0xf1] sm:$0xff]  ;;  %v282_v43 = vld [vmem:[%s4207_s5 + $0xf9] sm:$0xff] }
  0x26   : > { %v3305_v41 = vpack.i.bf16 %v276_v39, %v275_v38  ;;  %v279_v44 = vld [vmem:[%s4207_s5 + $0xe1] sm:$0xff]  ;;  %v280_v45 = vld [vmem:[%s4207_s5 + $0xe9] sm:$0xff]  ;;  %v3320_v46 = vpack.i.bf16 %v282_v43, %v281_v42  ;;  %v285_v48 = vld [vmem:[%s4207_s5 + $0x111] sm:$0xff] }
  0x27   : > { %3271 = vrot.lane.b32.xlu1 %v3270_v16, %s4114_s6  ;;  %v3315_v47 = vpack.i.bf16 %v280_v45, %v279_v44  ;;  %v286_v49 = vld [vmem:[%s4207_s5 + $0x119] sm:$0xff]  ;;  %v283_v50 = vld [vmem:[%s4207_s5 + $0x101] sm:$0xff]  ;;  %v284_v51 = vld [vmem:[%s4207_s5 + $0x109] sm:$0xff] }
  0x28   : > { %3266 = vrot.lane.b32.xlu0 %v3265_v17, %s4114_s6  ;;  %v3330_v52 = vpack.i.bf16 %v286_v49, %v285_v48  ;;  %v3325_v53 = vpack.i.bf16 %v284_v51, %v283_v50  ;;  %v289_v54 = vld [vmem:[%s4207_s5 + $0x131] sm:$0xff]  ;;  %v290_v55 = vld [vmem:[%s4207_s5 + $0x139] sm:$0xff]  ;;  %v287_v56 = vld [vmem:[%s4207_s5 + $0x121] sm:$0xff] }
  0x29   : > { %v288_v57 = vld [vmem:[%s4207_s5 + $0x129] sm:$0xff]  ;;  %v3340_v58 = vpack.i.bf16 %v290_v55, %v289_v54  ;;  %v291_v1 = vld [vmem:[%s4207_s5 + $0x141] sm:$0xf]  ;;  %v294_v2 = vld [vmem:[%s4207_s5 + $0x12] sm:$0xff] }
  0x2a   : > { %v3335_v59 = vpack.i.bf16 %v288_v57, %v287_v56  ;;  %v292_v60 = vld [vmem:[%s4207_s5 + $0x2] sm:$0xff]  ;;  %v293_v61 = vld [vmem:[%s4207_s5 + $0xa] sm:$0xff]  ;;  %v295_v3 = vld [vmem:[%s4207_s5 + $0x1a] sm:$0xff] }
  0x2b   : > { %3281 = vrot.lane.b32.xlu1 %v3280_v22, %s4114_s6  ;;  %v3345_v62 = vpack.i.bf16 %v293_v61, %v292_v60  ;;  %v296_v63 = vld [vmem:[%s4207_s5 + $0x22] sm:$0xff]  ;;  %v297_v0 = vld [vmem:[%s4207_s5 + $0x2a] sm:$0xff]  ;;  %v4280_v5 = vpack.i.bf16 %v295_v3, %v294_v2  ;;  %v298_v8 = vld [vmem:[%s4207_s5 + $0x32] sm:$0xff] }
  0x2c   : > { %3276 = vrot.lane.b32.xlu0 %v3275_v23, %s4114_s6  ;;  %v4277_v4 = vpack.i.bf16 %v297_v0, %v296_v63  ;;  %v300_v6 = vld [vmem:[%s4207_s5 + $0x42] sm:$0xff]  ;;  %v301_v7 = vld [vmem:[%s4207_s5 + $0x4a] sm:$0xff]  ;;  %v299_v9 = vld [vmem:[%s4207_s5 + $0x3a] sm:$0xff] }
  0x2d   : > { %v4288_v10 = vpack.i.bf16 %v301_v7, %v300_v6  ;;  %v4292_v11 = vpack.i.bf16 %v299_v9, %v298_v8  ;;  %v304_v12 = vld [vmem:[%s4207_s5 + $0x62] sm:$0xff]  ;;  %v305_v13 = vld [vmem:[%s4207_s5 + $0x6a] sm:$0xff]  ;;  %v302_v14 = vld [vmem:[%s4207_s5 + $0x52] sm:$0xff] }
  0x2e   : > { %v303_v15 = vld [vmem:[%s4207_s5 + $0x5a] sm:$0xff]  ;;  %v4300_v16 = vpack.i.bf16 %v305_v13, %v304_v12  ;;  %v308_v18 = vld [vmem:[%s4207_s5 + $0x82] sm:$0xff]  ;;  %v309_v19 = vld [vmem:[%s4207_s5 + $0x8a] sm:$0xff] }
  0x2f   : > { %3291 = vrot.lane.b32.xlu1 %v3290_v28, %s4114_s6  ;;  %v4304_v17 = vpack.i.bf16 %v303_v15, %v302_v14  ;;  %v306_v20 = vld [vmem:[%s4207_s5 + $0x72] sm:$0xff]  ;;  %v307_v21 = vld [vmem:[%s4207_s5 + $0x7a] sm:$0xff]  ;;  %v4312_v22 = vpack.i.bf16 %v309_v19, %v308_v18  ;;  %v312_v24 = vld [vmem:[%s4207_s5 + $0xa2] sm:$0xff] }
  0x30   : > { %3286 = vrot.lane.b32.xlu0 %v3285_v29, %s4114_s6  ;;  %v4316_v23 = vpack.i.bf16 %v307_v21, %v306_v20  ;;  %v313_v25 = vld [vmem:[%s4207_s5 + $0xaa] sm:$0xff]  ;;  %v310_v26 = vld [vmem:[%s4207_s5 + $0x92] sm:$0xff]  ;;  %v311_v27 = vld [vmem:[%s4207_s5 + $0x9a] sm:$0xff] }
  0x31   : > { %v4324_v28 = vpack.i.bf16 %v313_v25, %v312_v24  ;;  %v4328_v29 = vpack.i.bf16 %v311_v27, %v310_v26  ;;  %v316_v30 = vld [vmem:[%s4207_s5 + $0xc2] sm:$0xff]  ;;  %v317_v31 = vld [vmem:[%s4207_s5 + $0xca] sm:$0xff]  ;;  %v314_v32 = vld [vmem:[%s4207_s5 + $0xb2] sm:$0xff] }
  0x32   : > { %v315_v33 = vld [vmem:[%s4207_s5 + $0xba] sm:$0xff]  ;;  %v3405_v39 = vpack.i.bf16 %v317_v31, %v316_v30  ;;  %v399_v43 = vld [vmem:[%s4207_s5 + $0xc4] sm:$0xff]  ;;  %v400_v45 = vld [vmem:[%s4207_s5 + $0xcc] sm:$0xff] }
  0x33   : > { %3301 = vrot.lane.b32.xlu1 %v3300_v34, %s4114_s6  ;;  %v395_v34 = vld [vmem:[%s4207_s5 + $0xa4] sm:$0xff]  ;;  %v393_v37 = vld [vmem:[%s4207_s5 + $0x94] sm:$0xff]  ;;  %v394_v38 = vld [vmem:[%s4207_s5 + $0x9c] sm:$0xff]  ;;  %v3400_v44 = vpack.i.bf16 %v315_v33, %v314_v32  ;;  %v4354_v50 = vpack.i.bf16 %v400_v45, %v399_v43 }
  0x34   : > { %3296 = vrot.lane.b32.xlu0 %v3295_v35, %s4114_s6  ;;  %v396_v35 = vld [vmem:[%s4207_s5 + $0xac] sm:$0xff]  ;;  %v4344_v42 = vpack.i.bf16 %v394_v38, %v393_v37  ;;  %v319_v49 = vld [vmem:[%s4207_s5 + $0xda] sm:$0xff]  ;;  %v403_v56 = vld [vmem:[%s4207_s5 + $0xe4] sm:$0xff] }
  0x35   : > { %v4336_v36 = vpack.i.bf16 %v396_v35, %v395_v34  ;;  %v318_v48 = vld [vmem:[%s4207_s5 + $0xd2] sm:$0xff]  ;;  %6328 = vst [vmem:[#allocation7_spill] sm:$0xff] %v4354_v50  ;;  %v325_v55 = vld [vmem:[%s4207_s5 + $0x10a] sm:$0xff]  ;;  %v328_v63 = vld [vmem:[%s4207_s5 + $0x122] sm:$0xff] }
  0x36   : > { %6327 = vst [vmem:[#allocation6_spill] sm:$0xff] %v4344_v42  ;;  %v3410_v54 = vpack.i.bf16 %v319_v49, %v318_v48  ;;  %v404_v57 = vld [vmem:[%s4207_s5 + $0xec] sm:$0xff]  ;;  %v327_v2 = vld [vmem:[%s4207_s5 + $0x11a] sm:$0xff]  ;;  %v332_v9 = vld [vmem:[%s4207_s5 + $0x142] sm:$0xf] }
  0x37   : > { %3311 = vrot.lane.b32.xlu1 %v3310_v40, %s4114_s6  ;;  %6326 = vst [vmem:[#allocation5_spill] sm:$0xff] %v4336_v36  ;;  %v320_v40 = vld [vmem:[%s4207_s5 + $0xe2] sm:$0xff]  ;;  %v4366_v60 = vpack.i.bf16 %v404_v57, %v403_v56  ;;  %v329_v0 = vld [vmem:[%s4207_s5 + $0x12a] sm:$0xff]  ;;  %v330_v7 = vld [vmem:[%s4207_s5 + $0x132] sm:$0xff] }
  0x38   : > { %3306 = vrot.lane.b32.xlu0 %v3305_v41, %s4114_s6  ;;  %v321_v41 = vld [vmem:[%s4207_s5 + $0xea] sm:$0xff]  ;;  %v3435_v3 = vpack.i.bf16 %v329_v0, %v328_v63  ;;  %v331_v8 = vld [vmem:[%s4207_s5 + $0x13a] sm:$0xff] }
  0x39   : > { %6330 = vst [vmem:[#allocation9_spill] sm:$0xff] %v4366_v60  ;;  %v3440_v12 = vpack.i.bf16 %v331_v8, %v330_v7  ;;  %v336_v14 = vld [vmem:[%s4207_s5 + $0x13] sm:$0xff]  ;;  %v337_v15 = vld [vmem:[%s4207_s5 + $0x1b] sm:$0xff]  ;;  %v339_v24 = vld [vmem:[%s4207_s5 + $0x2b] sm:$0xff] }
  0x3a   : > { %v3545_v18 = vpack.i.bf16 %v337_v15, %v336_v14  ;;  %v340_v19 = vld [vmem:[%s4207_s5 + $0x33] sm:$0xff]  ;;  %v341_v20 = vld [vmem:[%s4207_s5 + $0x3b] sm:$0xff]  ;;  %v342_v31 = vld [vmem:[%s4207_s5 + $0x43] sm:$0xff] }
  0x3b   : > { %3321 = vrot.lane.b32.xlu1 %v3320_v46, %s4114_s6  ;;  %v397_v46 = vld [vmem:[%s4207_s5 + $0xb4] sm:$0xff]  ;;  %v3555_v26 = vpack.i.bf16 %v341_v20, %v340_v19  ;;  %v343_v32 = vld [vmem:[%s4207_s5 + $0x4b] sm:$0xff]  ;;  %v350_v49 = vld [vmem:[%s4207_s5 + $0x83] sm:$0xff] }
  0x3c   : > { %3316 = vrot.lane.b32.xlu0 %v3315_v47, %s4114_s6  ;;  %v398_v47 = vld [vmem:[%s4207_s5 + $0xbc] sm:$0xff]  ;;  %v3560_v35 = vpack.i.bf16 %v343_v32, %v342_v31  ;;  %v348_v37 = vld [vmem:[%s4207_s5 + $0x73] sm:$0xff]  ;;  %v359_v7 = vld [vmem:[%s4207_s5 + $0xcb] sm:$0xff] }
  0x3d   : > { %v4356_v51 = vpack.i.bf16 %v398_v47, %v397_v46  ;;  %v349_v38 = vld [vmem:[%s4207_s5 + $0x7b] sm:$0xff]  ;;  %v352_v46 = vld [vmem:[%s4207_s5 + $0x93] sm:$0xff]  ;;  %v362_v14 = vld [vmem:[%s4207_s5 + $0xe3] sm:$0xff] }
  0x3e   : > { %v353_v47 = vld [vmem:[%s4207_s5 + $0x9b] sm:$0xff]  ;;  %v356_v56 = vld [vmem:[%s4207_s5 + $0xb3] sm:$0xff]  ;;  %v363_v15 = vld [vmem:[%s4207_s5 + $0xeb] sm:$0xff] }
  0x3f   : > { %3331 = vrot.lane.b32.xlu1 %v3330_v52, %s4114_s6  ;;  %6329 = vst [vmem:[#allocation8_spill] sm:$0xff] %v4356_v51  ;;  %v3415_v52 = vpack.i.bf16 %v321_v41, %v320_v40  ;;  %v346_v40 = vld [vmem:[%s4207_s5 + $0x63] sm:$0xff]  ;;  %v347_v41 = vld [vmem:[%s4207_s5 + $0x6b] sm:$0xff]  ;;  %v357_v57 = vld [vmem:[%s4207_s5 + $0xbb] sm:$0xff]  ;;  %v3610_v20 = vpack.i.bf16 %v363_v15, %v362_v14 }
  0x40   : > { %3326 = vrot.lane.b32.xlu0 %v3325_v53, %s4114_s6  ;;  %v324_v53 = vld [vmem:[%s4207_s5 + $0x102] sm:$0xff]  ;;  %v3570_v45 = vpack.i.bf16 %v347_v41, %v346_v40  ;;  %v3595_v63 = vpack.i.bf16 %v357_v57, %v356_v56  ;;  %v372_v32 = vld [vmem:[%s4207_s5 + $0x133] sm:$0xff] }
  0x41   : > { %v3425_v61 = vpack.i.bf16 %v325_v55, %v324_v53  ;;  %v380_v56 = vld [vmem:[%s4207_s5 + $0x2c] sm:$0xff]  ;;  %v387_v15 = vld [vmem:[%s4207_s5 + $0x64] sm:$0xff] }
  0x43   : > { %3341 = vrot.lane.b32.xlu1 %v3340_v58, %s4114_s6  ;;  %v322_v58 = vld [vmem:[%s4207_s5 + $0xf2] sm:$0xff] }
  0x44   : > { %3336 = vrot.lane.b32.xlu0 %v3335_v59, %s4114_s6  ;;  %v323_v59 = vld [vmem:[%s4207_s5 + $0xfa] sm:$0xff] }
  0x47   : > { %3346 = vrot.lane.b32.xlu1 %v3345_v62, %s4115_s7  ;;  %v3420_v62 = vpack.i.bf16 %v323_v59, %v322_v58  ;;  %v354_v59 = vld [vmem:[%s4207_s5 + $0xa3] sm:$0xff] }
  0x48   : > { %624 = vrot.lane.b32.xlu0 %v291_v1, %s4114_s6  ;;  %v326_v1 = vld [vmem:[%s4207_s5 + $0x112] sm:$0xff]  ;;  %s3194_s6 = smul.u32 328, %s4201_s27  ;;  %s196_s27 = sand.u32 1, %s4104_s16  }
  0x49   : > { %v3430_v6 = vpack.i.bf16 %v327_v2, %v326_v1  ;;  %v360_v1 = vld [vmem:[%s4207_s5 + $0xd3] sm:$0xff]  ;;  %v361_v2 = vld [vmem:[%s4207_s5 + $0xdb] sm:$0xff] }
  0x4b   : > { %3356 = vrot.lane.b32.xlu1 %v4277_v4, %s4115_s7 }
  0x4c   : > { %3351 = vrot.lane.b32.xlu0 %v4280_v5, %s4115_s7 }
  0x4f   : > { %3366 = vrot.lane.b32.xlu1 %v4288_v10, %s4115_s7 }
  0x50   : > { %3361 = vrot.lane.b32.xlu0 %v4292_v11, %s4115_s7 }
  0x53   : > { %3376 = vrot.lane.b32.xlu1 %v4300_v16, %s4115_s7 }
  0x54   : > { %3371 = vrot.lane.b32.xlu0 %v4304_v17, %s4115_s7 }
  0x57   : > { %3386 = vrot.lane.b32.xlu1 %v4312_v22, %s4115_s7 }
  0x58   : > { %3381 = vrot.lane.b32.xlu0 %v4316_v23, %s4115_s7 }
  0x5b   : > { %3396 = vrot.lane.b32.xlu1 %v4324_v28, %s4115_s7 }
  0x5c   : > { %3391 = vrot.lane.b32.xlu0 %v4328_v29, %s4115_s7 }
  0x5f   : > { %3406 = vrot.lane.b32.xlu1 %v3405_v39, %s4115_s7 }
  0x60   : > { %3401 = vrot.lane.b32.xlu0 %v3400_v44, %s4115_s7 }
  0x63   : > { %3416 = vrot.lane.b32.xlu1 %v3415_v52, %s4115_s7 }
  0x64   : > { %3411 = vrot.lane.b32.xlu0 %v3410_v54, %s4115_s7 }
  0x67   : > { %3426 = vrot.lane.b32.xlu1 %v3425_v61, %s4115_s7 }
  0x68   : > { %3421 = vrot.lane.b32.xlu0 %v3420_v62, %s4115_s7 }
  0x6b   : > { %3436 = vrot.lane.b32.xlu1 %v3435_v3, %s4115_s7 }
  0x6c   : > { %3431 = vrot.lane.b32.xlu0 %v3430_v6, %s4115_s7 }
  0x6f   : > { %788 = vrot.lane.b32.xlu1 %v332_v9, %s4115_s7  ;;  %v3605_v9 = vpack.i.bf16 %v361_v2, %v360_v1  ;;  %v383_v2 = vld [vmem:[%s4207_s5 + $0x44] sm:$0xff] }
  0x70   : > { %3441 = vrot.lane.b32.xlu0 %v3440_v12, %s4115_s7 }
  0x73   : > { %3451 = vrot.lane.b32.xlu1 %v4277_v4, %s4116_s8  ;;  %v333_v4 = vld [vmem:[%s4207_s5 + $0x142] sm:$0xff] }
  0x74   : > { %3446 = vrot.lane.b32.xlu0 %v4280_v5, %s4116_s8  ;;  %v334_v5 = vld [vmem:[%s4207_s5 + $0x14a] sm:$0xff] }
  0x75   : > { %v3540_v13 = vpack.i.bf16 %v334_v5, %v333_v4  ;;  %v364_v4 = vld [vmem:[%s4207_s5 + $0xf3] sm:$0xff]  ;;  %v365_v5 = vld [vmem:[%s4207_s5 + $0xfb] sm:$0xff] }
  0x76   : > { %v3615_v19 = vpack.i.bf16 %v365_v5, %v364_v4 }
  0x77   : > { %3461 = vrot.lane.b32.xlu1 %v4288_v10, %s4116_s8 }
  0x78   : > { %3456 = vrot.lane.b32.xlu0 %v4292_v11, %s4116_s8 }
  0x7b   : > { %3471 = vrot.lane.b32.xlu1 %v4300_v16, %s4116_s8 }
  0x7c   : > { %3466 = vrot.lane.b32.xlu0 %v4304_v17, %s4116_s8 }
  0x7f   : > { %3481 = vrot.lane.b32.xlu1 %v4312_v22, %s4116_s8  ;;  %v335_v22 = vld [vmem:[%s4207_s5 + $0x152] sm:$0xf] }
  0x80   : > { %3476 = vrot.lane.b32.xlu0 %v4316_v23, %s4116_s8  ;;  %v338_v23 = vld [vmem:[%s4207_s5 + $0x23] sm:$0xff] }
  0x81   : > { %v3550_v27 = vpack.i.bf16 %v339_v24, %v338_v23  ;;  %v369_v23 = vld [vmem:[%s4207_s5 + $0x11b] sm:$0xff] }
  0x83   : > { %3491 = vrot.lane.b32.xlu1 %v4324_v28, %s4116_s8  ;;  %v344_v28 = vld [vmem:[%s4207_s5 + $0x53] sm:$0xff] }
  0x84   : > { %3486 = vrot.lane.b32.xlu0 %v4328_v29, %s4116_s8  ;;  %v345_v29 = vld [vmem:[%s4207_s5 + $0x5b] sm:$0xff] }
  0x85   : > { %v3565_v34 = vpack.i.bf16 %v345_v29, %v344_v28 }
  0x87   : > { %3501 = vrot.lane.b32.xlu1 %v3405_v39, %s4116_s8 }
  0x88   : > { %3496 = vrot.lane.b32.xlu0 %v3400_v44, %s4116_s8  ;;  %v3575_v44 = vpack.i.bf16 %v349_v38, %v348_v37  ;;  %v370_v37 = vld [vmem:[%s4207_s5 + $0x123] sm:$0xff]  ;;  %v371_v38 = vld [vmem:[%s4207_s5 + $0x12b] sm:$0xff] }
  0x8b   : > { %3511 = vrot.lane.b32.xlu1 %v3415_v52, %s4116_s8  ;;  %v351_v52 = vld [vmem:[%s4207_s5 + $0x8b] sm:$0xff] }
  0x8c   : > { %3506 = vrot.lane.b32.xlu0 %v3410_v54, %s4116_s8  ;;  %v3585_v54 = vpack.i.bf16 %v353_v47, %v352_v46  ;;  %v3580_v55 = vpack.i.bf16 %v351_v52, %v350_v49  ;;  %v374_v46 = vld [vmem:[%s4207_s5 + $0x143] sm:$0xff]  ;;  %v375_v47 = vld [vmem:[%s4207_s5 + $0x14b] sm:$0xff]  ;;  %v376_v52 = vld [vmem:[%s4207_s5 + $0x153] sm:$0xf] }
  0x8f   : > { %3521 = vrot.lane.b32.xlu1 %v3425_v61, %s4116_s8  ;;  %v355_v61 = vld [vmem:[%s4207_s5 + $0xab] sm:$0xff] }
  0x90   : > { %3516 = vrot.lane.b32.xlu0 %v3420_v62, %s4116_s8  ;;  %v3590_v0 = vpack.i.bf16 %v355_v61, %v354_v59  ;;  %v377_v59 = vld [vmem:[%s4207_s5 + $0x14] sm:$0xff]  ;;  %v378_v61 = vld [vmem:[%s4207_s5 + $0x1c] sm:$0xff] }
  0x91   : > { %v4411_v10 = vpop.permute.xlu1 %3256  ;;  %v3645_v1 = vpack.i.bf16 %v378_v61, %v377_v59  ;;  %v401_v59 = vld [vmem:[%s4207_s5 + $0xd4] sm:$0xff]  ;;  %v402_v61 = vld [vmem:[%s4207_s5 + $0xdc] sm:$0xff] }
  0x92   : > { %6331 = vst [vmem:[#allocation10_spill] sm:$0xff] %v4411_v10  ;;  %v4413_v11 = vpop.permute.xlu0 %3246 }
  0x93   : > { %6332 = vst [vmem:[#allocation11_spill] sm:$0xff] %v4413_v11  ;;  %3531 = vrot.lane.b32.xlu1 %v3435_v3, %s4116_s8  ;;  %v4746_v11 = vld [vmem:[%s4207_s5 + $0x75] sm:$0xff] }
  0x94   : > { %3526 = vrot.lane.b32.xlu0 %v3430_v6, %s4116_s8  ;;  %v358_v6 = vld [vmem:[%s4207_s5 + $0xc3] sm:$0xff] }
  0x95   : > { %v4419_v16 = vpop.permute.xlu1 %3261 }
  0x96   : > { %6333 = vst [vmem:[#allocation12_spill] sm:$0xff] %v4419_v16  ;;  %v4421_v17 = vpop.permute.xlu0 %3251  ;;  %v4743_v16 = vld [vmem:[%s4207_s5 + $0x6d] sm:$0xff] }
  0x97   : > { %6334 = vst [vmem:[#allocation13_spill] sm:$0xff] %v4421_v17  ;;  %3541 = vrot.lane.b32.xlu1 %v3540_v13, %s4116_s8 }
  0x98   : > { %3536 = vrot.lane.b32.xlu0 %v3440_v12, %s4116_s8  ;;  %v3600_v12 = vpack.i.bf16 %v359_v7, %v358_v6  ;;  %v384_v6 = vld [vmem:[%s4207_s5 + $0x4c] sm:$0xff] }
  0x99   : > { %v4427_v21 = vpop.permute.xlu1 %3271  ;;  %v4547_v5 = vpack.i.bf16 %v384_v6, %v383_v2  ;;  %v4610_v2 = vpack.i.bf16 %v402_v61, %v401_v59  ;;  %v407_v6 = vld [vmem:[%s4207_s5 + $0x104] sm:$0xff]  ;;  %v412_v59 = vld [vmem:[%s4207_s5 + $0x12c] sm:$0xff] }
  0x9a   : > { %6335 = vst [vmem:[#allocation14_spill] sm:$0xff] %v4427_v21  ;;  %v4432_v25 = vpop.permute.xlu0 %3266  ;;  %v4048_v61 = vld [vmem:[%s6266_s1 + $0x8] sm:$0xff]  }
  0x9b   : > { %6336 = vst [vmem:[#allocation15_spill] sm:$0xff] %v4432_v25  ;;  %3546 = vrot.lane.b32.xlu1 %v3545_v18, %s4117_s9  ;;  %6353 = vst [vmem:[#allocation32_spill] sm:$0xff] %v4610_v2  ;;  %v4726_v21 = vld [vmem:[%s4207_s5 + $0x66] sm:$0xff] }
  0x9c   : > { %914 = vrot.lane.b32.xlu0 %v335_v22, %s4116_s8  ;;  %v368_v22 = vld [vmem:[%s4207_s5 + $0x113] sm:$0xff] }
  0x9d   : > { %v4438_v30 = vpop.permute.xlu1 %3281  ;;  %v3625_v29 = vpack.i.bf16 %v369_v23, %v368_v22  ;;  %v385_v22 = vld [vmem:[%s4207_s5 + $0x54] sm:$0xff]  ;;  %v386_v23 = vld [vmem:[%s4207_s5 + $0x5c] sm:$0xff] }
  0x9e   : > { %6337 = vst [vmem:[#allocation16_spill] sm:$0xff] %v4438_v30  ;;  %v4442_v33 = vpop.permute.xlu0 %3276  ;;  %v229_v30 = vld [vmem:[%s4207_s5 + $0x98] sm:$0xff] }
  0x9f   : > { %6338 = vst [vmem:[#allocation17_spill] sm:$0xff] %v4442_v33  ;;  %3556 = vrot.lane.b32.xlu1 %v3555_v26, %s4117_s9  ;;  %v366_v26 = vld [vmem:[%s4207_s5 + $0x103] sm:$0xff]  ;;  %v4716_v33 = vld [vmem:[%s4207_s5 + $0x56] sm:$0xff] }
  0xa0   : > { %3551 = vrot.lane.b32.xlu0 %v3550_v27, %s4117_s9  ;;  %v367_v27 = vld [vmem:[%s4207_s5 + $0x10b] sm:$0xff] }
  0xa1   : > { %v4448_v39 = vpop.permute.xlu1 %3291  ;;  %v3620_v31 = vpack.i.bf16 %v367_v27, %v366_v26 }
  0xa2   : > { %v4452_v43 = vpop.permute.xlu0 %3286 }
  0xa3   : > { %3566 = vrot.lane.b32.xlu1 %v3565_v34, %s4117_s9  ;;  %v373_v34 = vld [vmem:[%s4207_s5 + $0x13b] sm:$0xff]  ;;  %v3289_v10 = vunpack.i.h.bf16 %v4452_v43 }
  0xa4   : > { %3561 = vrot.lane.b32.xlu0 %v3560_v35, %s4117_s9  ;;  %v3635_v41 = vpack.i.bf16 %v373_v34, %v372_v32  ;;  %v392_v32 = vld [vmem:[%s4207_s5 + $0x8c] sm:$0xff] }
  0xa5   : > { %v4458_v48 = vpop.permute.xlu1 %3301 }
  0xa6   : > { %6339 = vst [vmem:[#allocation18_spill] sm:$0xff] %v4458_v48  ;;  %v4462_v53 = vpop.permute.xlu0 %3296  ;;  %v4710_v48 = vld [vmem:[%s4207_s5 + $0x55] sm:$0xff] }
  0xa7   : > { %3576 = vrot.lane.b32.xlu1 %v3575_v44, %s4117_s9  ;;  %v3630_v44 = vpack.i.bf16 %v371_v38, %v370_v37  ;;  %v389_v37 = vld [vmem:[%s4207_s5 + $0x74] sm:$0xff]  ;;  %v390_v38 = vld [vmem:[%s4207_s5 + $0x7c] sm:$0xff] }
  0xa8   : > { %3571 = vrot.lane.b32.xlu0 %v3570_v45, %s4117_s9 }
  0xa9   : > { %v4468_v58 = vpop.permute.xlu1 %3311 }
  0xaa   : > { %v4472_v62 = vpop.permute.xlu0 %3306 }
  0xab   : > { %6340 = vst [vmem:[#allocation19_spill] sm:$0xff] %v4472_v62  ;;  %3586 = vrot.lane.b32.xlu1 %v3585_v54, %s4117_s9  ;;  %v3640_v54 = vpack.i.bf16 %v375_v47, %v374_v46  ;;  %v4582_v46 = vpack.i.bf16 %v390_v38, %v389_v37  ;;  %v411_v38 = vld [vmem:[%s4207_s5 + $0x124] sm:$0xff] }
  0xac   : > { %3581 = vrot.lane.b32.xlu0 %v3580_v55, %s4117_s9  ;;  %v379_v55 = vld [vmem:[%s4207_s5 + $0x24] sm:$0xff] }
  0xad   : > { %v4478_v3 = vpop.permute.xlu1 %3321 }
  0xae   : > { %v4482_v8 = vpop.permute.xlu0 %3316 }
  0xaf   : > { %3596 = vrot.lane.b32.xlu1 %v3595_v63, %s4117_s9 }
  0xb0   : > { %3591 = vrot.lane.b32.xlu0 %v3590_v0, %s4117_s9  ;;  %v4534_v0 = vpack.i.bf16 %v380_v56, %v379_v55 }
  0xb1   : > { %v4488_v13 = vpop.permute.xlu1 %3331 }
  0xb2   : > { %v4492_v18 = vpop.permute.xlu0 %3326 }
  0xb3   : > { %3606 = vrot.lane.b32.xlu1 %v3605_v9, %s4117_s9  ;;  %v381_v9 = vld [vmem:[%s4207_s5 + $0x34] sm:$0xff] }
  0xb4   : > { %3601 = vrot.lane.b32.xlu0 %v3600_v12, %s4117_s9  ;;  %v382_v12 = vld [vmem:[%s4207_s5 + $0x3c] sm:$0xff] }
  0xb5   : > { %v4498_v24 = vpop.permute.xlu1 %3341  ;;  %v4550_v14 = vpack.i.bf16 %v382_v12, %v381_v9  ;;  %v408_v9 = vld [vmem:[%s4207_s5 + $0x10c] sm:$0xff]  ;;  %v4047_v12 = vld [vmem:[%s6266_s1] sm:$0xff]  }
  0xb6   : > { %v4502_v28 = vpop.permute.xlu0 %3336 }
  0xb7   : > { %3616 = vrot.lane.b32.xlu1 %v3615_v19, %s4117_s9  ;;  %v388_v19 = vld [vmem:[%s4207_s5 + $0x6c] sm:$0xff] }
  0xb8   : > { %3611 = vrot.lane.b32.xlu0 %v3610_v20, %s4117_s9  ;;  %v4562_v27 = vpack.i.bf16 %v388_v19, %v387_v15  ;;  %v405_v19 = vld [vmem:[%s4207_s5 + $0xf4] sm:$0xff] }
  0xb9   : > { %v4508_v35 = vpop.permute.xlu1 %3346 }
  0xba   : > { %6341 = vst [vmem:[#allocation20_spill] sm:$0xff] %v4508_v35  ;;  %v4512_v40 = vpop.permute.xlu0 %624  ;;  %v4705_v35 = vld [vmem:[%s4207_s5 + $0x4d] sm:$0xff] }
  0xbb   : > { %6342 = vst [vmem:[#allocation21_spill] sm:$0xff] %v4512_v40  ;;  %3626 = vrot.lane.b32.xlu1 %v3625_v29, %s4117_s9  ;;  %v4566_v29 = vpack.i.bf16 %v386_v23, %v385_v22  ;;  %v406_v22 = vld [vmem:[%s4207_s5 + $0xfc] sm:$0xff]  ;;  %v6274_v23 = vmov 0.0  }
  0xbc   : > { %3621 = vrot.lane.b32.xlu0 %v3620_v31, %s4117_s9  ;;  %v391_v31 = vld [vmem:[%s4207_s5 + $0x84] sm:$0xff]  ;;  %3097 = vmatprep.subr.bf16.mxu0 %v6274_v23  ;;  %v4632_v37 = vpack.i.bf16 %v406_v22, %v405_v19  ;;  %v4648_v19 = vpack.i.bf16 %v412_v59, %v411_v38  ;;  %v4049_v22 = vld [vmem:[%s6266_s1 + $0x10] ss:$0 sps:$4 sm:$0x33]   ;;  %v413_v59 = vld [vmem:[%s4207_s5 + $0x134] sm:$0xff] }
  0xbd   : > { %v4516_v45 = vpop.permute.xlu1 %3356  ;;  %3187 = vmatprep.subr.bf16.mxu1 %v6274_v23  ;;  %3098 = vmatpush3.bf16.msra.mxu0 %v4047_v12 }
  0xbe   : > { %6343 = vst [vmem:[#allocation22_spill] sm:$0xff] %v4516_v45  ;;  %v4520_v49 = vpop.permute.xlu0 %3351  ;;  %3190 = vmatpush3.bf16.msra.mxu1 %v4047_v12  ;;  %3099 = vmatprep.subr.bf16.mxu0 %v6274_v23  ;;  %6355 = vst [vmem:[#allocation34_spill] sm:$0xff] %v4632_v37  ;;  %v4699_v45 = vld [vmem:[%s4207_s5 + $0x4e] sm:$0xff] }
  0xbf   : > { %6344 = vst [vmem:[#allocation23_spill] sm:$0xff] %v4520_v49  ;;  %3636 = vrot.lane.b32.xlu1 %v3635_v41, %s4117_s9  ;;  %3188 = vmatprep.subr.bf16.mxu1 %v6274_v23  ;;  %6357 = vst [vmem:[#allocation36_spill] sm:$0xff] %v4648_v19 }
  0xc0   : > { %3631 = vrot.lane.b32.xlu0 %v3630_v44, %s4117_s9  ;;  %v4578_v44 = vpack.i.bf16 %v392_v32, %v391_v31  ;;  %v4627_v32 = vpack.i.bf16 %v408_v9, %v407_v6  ;;  %v409_v6 = vld [vmem:[%s4207_s5 + $0x114] sm:$0xff]  ;;  %v410_v9 = vld [vmem:[%s4207_s5 + $0x11c] sm:$0xff] }
  0xc1   : > { %v4527_v57 = vpop.permute.xlu1 %3366  ;;  %3100 = vmatpush3.bf16.msra.mxu0 %v4048_v61 }
  0xc2   : > { %6345 = vst [vmem:[#allocation24_spill] sm:$0xff] %v4527_v57  ;;  %v4531_v63 = vpop.permute.xlu0 %3361  ;;  %6350 = vst [vmem:[#allocation29_spill] sm:$0xff] %v4578_v44  ;;  %3191 = vmatpush3.bf16.msra.mxu1 %v4048_v61  ;;  %3101 = vmatprep.subr.bf16.mxu0 %v6274_v23  ;;  %v414_v61 = vld [vmem:[%s4207_s5 + $0x13c] sm:$0xff] }
  0xc3   : > { %6346 = vst [vmem:[#allocation25_spill] sm:$0xff] %v4531_v63  ;;  %1078 = vrot.lane.b32.xlu1 %v376_v52, %s4117_s9  ;;  %6354 = vst [vmem:[#allocation33_spill] sm:$0xff] %v4627_v32  ;;  %3189 = vmatprep.subr.bf16.mxu1 %v6274_v23  ;;  %v421_v23 = vld [vmem:[%s4207_s5 + $0x25] sm:$0xff]  ;;  %v4686_v57 = vld [vmem:[%s4207_s5 + $0x36] sm:$0xff] }
  0xc4   : > { %3641 = vrot.lane.b32.xlu0 %v3640_v54, %s4117_s9  ;;  %s6005_s9 = scalar_lea.vmem %s6268_s3, %s3194_s6 }
  0xc5   : > { %v4539_v7 = vpop.permute.xlu1 %3376 }
  0xc6   : > { %6347 = vst [vmem:[#allocation26_spill] sm:$0xff] %v4539_v7  ;;  %v4543_v4 = vpop.permute.xlu0 %3371  ;;  %v4679_v7 = vld [vmem:[%s4207_s5 + $0x3d] sm:$0xff] }
  0xc7   : > { %6348 = vst [vmem:[#allocation27_spill] sm:$0xff] %v4543_v4  ;;  %3651 = vrot.lane.b32.xlu1 %v4534_v0, %s4118_s10 }
  0xc8   : > { %3646 = vrot.lane.b32.xlu0 %v3645_v1, %s4118_s10 }
  0xc9   : > { %v4554_v20 = vpop.permute.xlu1 %3386 }
  0xca   : > { %v4558_v26 = vpop.permute.xlu0 %3381 }
  0xcb   : > { %6349 = vst [vmem:[#allocation28_spill] sm:$0xff] %v4558_v26  ;;  %3661 = vrot.lane.b32.xlu1 %v4547_v5, %s4118_s10  ;;  %v2182_v26 = vsel %vm2180_vm0, %v4049_v22, 0  ;;  %v4672_v22 = vpack.i.bf16 %v414_v61, %v413_v59  ;;  %v4689_v59 = vld [vmem:[%s4207_s5 + $0x3e] sm:$0xff]  ;;  %v4692_v61 = vld [vmem:[%s4207_s5 + $0x46] sm:$0xff] }
  0xcc   : > { %3656 = vrot.lane.b32.xlu0 %v4550_v14, %s4118_s10  ;;  %3102 = vmatpush3.bf16.msra.mxu0 %v2182_v26 }
  0xcd   : > { %v4570_v34 = vpop.permute.xlu1 %3396  ;;  %3192 = vmatpush3.bf16.msra.mxu1 %v2182_v26  ;;  %6361 = vst [vmem:[#allocation40_spill] sm:$0xff] %v4672_v22  ;;  %v6362_v26 = vmov 0.0  }
  0xce   : > { %v4574_v41 = vpop.permute.xlu0 %3391  ;;  %3103 = vmatprep.mubr.msk.bf16.mxu0 %vm4120_vm1, %v6362_v26  ;;  %3147 = vmatprep.mubr.msk.bf16.mxu1 %vm4120_vm1, %v6362_v26  ;;  %v4713_v26 = vld [vmem:[%s4207_s5 + $0x5d] sm:$0xff] }
  0xcf   : > { %3671 = vrot.lane.b32.xlu1 %v4562_v27, %s4118_s10 }
  0xd0   : > { %3666 = vrot.lane.b32.xlu0 %v4566_v29, %s4118_s10 }
  0xd1   : > { %v4584_v47 = vpop.permute.xlu1 %3406 }
  0xd2   : > { %6351 = vst [vmem:[#allocation30_spill] sm:$0xff] %v4584_v47  ;;  %v4586_v52 = vpop.permute.xlu0 %3401  ;;  %v4656_v47 = vpack.i.bf16 %v410_v9, %v409_v6  ;;  %v462_v6 = vld [vmem:[%s4207_s5 + $0x26] sm:$0xff]  ;;  %v463_v9 = vld [vmem:[%s4207_s5 + $0x2e] sm:$0xff] }
  0xd3   : > { %6352 = vst [vmem:[#allocation31_spill] sm:$0xff] %v4586_v52  ;;  %3681 = vrot.lane.b32.xlu1 %v4578_v44, %s4118_s10  ;;  %v3750_v62 = vpack.i.bf16 %v463_v9, %v462_v6  ;;  %v3294_v6 = vunpack.i.h.bf16 %v4448_v39  ;;  %v3293_v9 = vunpack.i.l.bf16 %v4448_v39  ;;  %v3288_v39 = vunpack.i.l.bf16 %v4452_v43  ;;  %v237_v44 = vld [vmem:[%s4207_s5 + $0xd8] sm:$0xff] }
  0xd4   : > { %3676 = vrot.lane.b32.xlu0 %v4582_v46, %s4118_s10  ;;  %6358 = vst [vmem:[#allocation37_spill] sm:$0xff] %v4656_v47  ;;  %v3299_v43 = vunpack.i.h.bf16 %v4462_v53 }
  0xd5   : > { %v4592_v54 = vpop.permute.xlu1 %3416 }
  0xd6   : > { %v4594_v55 = vpop.permute.xlu0 %3411 }
  0xd7   : > { %3691 = vrot.lane.b32.xlu1 %v4336_v36, %s4118_s10  ;;  %v231_v36 = vld [vmem:[%s4207_s5 + $0xa8] sm:$0xff] }
  0xd8   : > { %3686 = vrot.lane.b32.xlu0 %v4344_v42, %s4118_s10  ;;  %v3313_v42 = vunpack.i.l.bf16 %v4468_v58 }
  0xd9   : > { %v4600_v56 = vpop.permute.xlu1 %3426 }
  0xda   : > { %v4604_v1 = vpop.permute.xlu0 %3421 }
  0xdb   : > { %3701 = vrot.lane.b32.xlu1 %v4354_v50, %s4118_s10  ;;  %v4763_v50 = vld [vmem:[%s4207_s5 + $0x7e] sm:$0xff] }
  0xdc   : > { %3696 = vrot.lane.b32.xlu0 %v4356_v51, %s4118_s10  ;;  %v227_v51 = vld [vmem:[%s4207_s5 + $0x88] sm:$0xff] }
  0xdd   : > { %v4617_v15 = vpop.permute.xlu1 %3436 }
  0xde   : > { %v4623_v31 = vpop.permute.xlu0 %3431 }
  0xdf   : > { %3711 = vrot.lane.b32.xlu1 %v4366_v60, %s4118_s10  ;;  %v3314_v60 = vunpack.i.h.bf16 %v4468_v58  ;;  %v3394_v58 = vunpack.i.h.bf16 %v4574_v41 }
  0xe0   : > { %3706 = vrot.lane.b32.xlu0 %v4610_v2, %s4118_s10  ;;  %v1759_v2 = vsel %vm1739_vm2, %v229_v30, %v3294_v6  ;;  %v1761_v6 = vsel %vm1739_vm2, %v231_v36, %v3299_v43  ;;  %v3319_v36 = vunpack.i.h.bf16 %v4482_v8  ;;  %v238_v43 = vld [vmem:[%s4207_s5 + $0xe0] sm:$0xff] }
  0xe1   : > { %v4640_v12 = vpop.permute.xlu1 %788 }
  0xe2   : > { %6356 = vst [vmem:[#allocation35_spill] sm:$0xff] %v4640_v12  ;;  %v4644_v52 = vpop.permute.xlu0 %3441 }
  0xe3   : > { %3721 = vrot.lane.b32.xlu1 %v4627_v32, %s4118_s10  ;;  %v226_v32 = vld [vmem:[%s4207_s5 + $0x80] sm:$0xff] }
  0xe4   : > { %3716 = vrot.lane.b32.xlu0 %v4632_v37, %s4118_s10  ;;  %v3298_v37 = vunpack.i.l.bf16 %v4462_v53  ;;  %v1756_v40 = vsel %vm1739_vm2, %v226_v32, %v3288_v39  ;;  %v1757_v53 = vsel %vm1739_vm2, %v227_v51, %v3289_v10  ;;  %v4808_v51 = vsel %vm1739_vm2, %v237_v44, %v3314_v60  ;;  %v240_v60 = vld [vmem:[%s4207_s5 + $0xf0] sm:$0xff] }
  0xe5   : > { %v4659_v38 = vpop.permute.xlu1 %3451  ;;  %v3324_v10 = vunpack.i.h.bf16 %v4478_v3 }
  0xe6   : > { %6359 = vst [vmem:[#allocation38_spill] sm:$0xff] %v4659_v38  ;;  %v4663_v4 = vpop.permute.xlu0 %3446  ;;  %v422_v38 = vld [vmem:[%s4207_s5 + $0x2d] sm:$0xff] }
  0xe7   : > { %6360 = vst [vmem:[#allocation39_spill] sm:$0xff] %v4663_v4  ;;  %3731 = vrot.lane.b32.xlu1 %v4648_v19, %s4118_s10  ;;  %v4676_v4 = vld [vmem:[%s4207_s5 + $0x35] sm:$0xff]  ;;  %v3745_v25 = vpack.i.bf16 %v422_v38, %v421_v23  ;;  %v4723_v19 = vld [vmem:[%s4207_s5 + $0x5e] sm:$0xff] }
  0xe8   : > { %3726 = vrot.lane.b32.xlu0 %v4656_v47, %s4118_s10  ;;  %v3760_v23 = vpack.i.bf16 %v4679_v7, %v4676_v4  ;;  %v4757_v38 = vld [vmem:[%s4207_s5 + $0x7d] sm:$0xff]  ;;  %v236_v7 = vld [vmem:[%s4207_s5 + $0xd0] sm:$0xff] }
  0xe9   : > { %v4683_v63 = vpop.permute.xlu1 %3461  ;;  %v4805_v32 = vsel %vm1739_vm2, %v236_v7, %v3313_v42  ;;  %v3334_v42 = vunpack.i.h.bf16 %v4488_v13 }
  0xea   : > { %6363 = vst [vmem:[#allocation41_spill] sm:$0xff] %v4683_v63  ;;  %v4696_v49 = vpop.permute.xlu0 %3456  ;;  %v4702_v63 = vld [vmem:[%s4207_s5 + $0x45] sm:$0xff] }
  0xeb   : > { %6364 = vst [vmem:[#allocation42_spill] sm:$0xff] %v4696_v49  ;;  %3741 = vrot.lane.b32.xlu1 %v4534_v0, %s4121_s23  ;;  %v228_v49 = vld [vmem:[%s4207_s5 + $0x90] sm:$0xff] }
  0xec   : > { %3736 = vrot.lane.b32.xlu0 %v4672_v22, %s4118_s10  ;;  %v4729_v0 = vld [vmem:[%s4207_s5 + $0x6e] sm:$0xff]  ;;  %v4740_v22 = vld [vmem:[%s4207_s5 + $0x65] sm:$0xff]  ;;  %v1758_v4 = vsel %vm1739_vm2, %v228_v49, %v3293_v9  ;;  %v3388_v49 = vunpack.i.l.bf16 %v4554_v20 }
  0xed   : > { %v4733_v17 = vpop.permute.xlu1 %3471 }
  0xee   : > { %6365 = vst [vmem:[#allocation43_spill] sm:$0xff] %v4733_v17  ;;  %v4750_v47 = vpop.permute.xlu0 %3466  ;;  %v4760_v17 = vld [vmem:[%s4207_s5 + $0x76] sm:$0xff]  ;;  %v1798_v44 = vsel %vm1781_vm3, %v1756_v40, %v3388_v49  ;;  %v3399_v40 = vunpack.i.h.bf16 %v4570_v34 }
  0xef   : > { %6366 = vst [vmem:[#allocation44_spill] sm:$0xff] %v4750_v47  ;;  %6367 = vst [vmem:[#allocation45_spill] sm:$0xff] %v4760_v17  ;;  %3751 = vrot.lane.b32.xlu1 %v3750_v62, %s4122_s28  ;;  %v230_v47 = vld [vmem:[%s4207_s5 + $0xa0] sm:$0xff]  ;;  %v3389_v62 = vunpack.i.h.bf16 %v4554_v20  ;;  %v3323_v20 = vunpack.i.l.bf16 %v4478_v3 }
  0xf0   : > { %3746 = vrot.lane.b32.xlu0 %v3745_v25, %s4123_s29  ;;  %v1760_v30 = vsel %vm1739_vm2, %v230_v47, %v3298_v37  ;;  %v3333_v47 = vunpack.i.l.bf16 %v4488_v13  ;;  %v239_v25 = vld [vmem:[%s4207_s5 + $0xe8] sm:$0xff] }
  0xf1   : > { %v4787_v12 = vpop.permute.xlu1 %3481 }
  0xf2   : > { %6368 = vst [vmem:[#allocation46_spill] sm:$0xff] %v4787_v12  ;;  %v4797_v9 = vpop.permute.xlu0 %3476  ;;  %v3393_v12 = vunpack.i.l.bf16 %v4574_v41  ;;  %v3318_v41 = vunpack.i.l.bf16 %v4482_v8 }
  0xf3   : > { %6369 = vst [vmem:[#allocation47_spill] sm:$0xff] %v4797_v9  ;;  %3761 = vrot.lane.b32.xlu1 %v3760_v23, %s4123_s29  ;;  %v1799_v23 = vsel %vm1781_vm3, %v1757_v53, %v3389_v62  ;;  %v1801_v9 = vsel %vm1781_vm3, %v1759_v2, %v3394_v58  ;;  %v3398_v53 = vunpack.i.l.bf16 %v4570_v34  ;;  %v6370_v2 = vpack.i.bf16 %v4689_v59, %v4686_v57 }
  0xf4   : > { %3756 = vrot.lane.b32.xlu0 %v4550_v14, %s4121_s23  ;;  %v241_v14 = vld [vmem:[%s4207_s5 + $0xf8] sm:$0xff]  ;;  %v1800_v8 = vsel %vm1781_vm3, %v1758_v4, %v3393_v12  ;;  %v244_v12 = vld [vmem:[%s4207_s5 + $0x110] sm:$0xff]  ;;  %v3328_v58 = vunpack.i.l.bf16 %v4492_v18  ;;  %v1768_v57 = vsel %vm1739_vm2, %v238_v43, %v3318_v41  ;;  %v1769_v59 = vsel %vm1739_vm2, %v239_v25, %v3319_v36 }
  0xf5   : > { %v3492_v37 = vpop.permute.xlu1 %3491  ;;  %v245_v4 = vld [vmem:[%s4207_s5 + $0x118] sm:$0xff]  ;;  %v1802_v25 = vsel %vm1781_vm3, %v1760_v30, %v3398_v53  ;;  %v1803_v36 = vsel %vm1781_vm3, %v1761_v6, %v3399_v40  ;;  %v6372_v41 = vpack.i.bf16 %v4705_v35, %v4702_v63  ;;  %v3344_v30 = vunpack.i.h.bf16 %v4498_v24 }
  0xf6   : > { %v3494_v39 = vunpack.i.h.bf16 %v3492_v37  ;;  %v3493_v3 = vunpack.i.l.bf16 %v3492_v37  ;;  %v3487_v7 = vpop.permute.xlu0 %3486  ;;  %v3343_v6 = vunpack.i.l.bf16 %v4498_v24  ;;  %v3424_v40 = vunpack.i.h.bf16 %v4604_v1 }
  0xf7   : > { %v3489_v17 = vunpack.i.h.bf16 %v3487_v7  ;;  %v3488_v13 = vunpack.i.l.bf16 %v3487_v7  ;;  %3771 = vrot.lane.b32.xlu1 %v4547_v5, %s4121_s23  ;;  %v3329_v5 = vunpack.i.h.bf16 %v4492_v18  ;;  %v242_v7 = vld [vmem:[%s4207_s5 + $0x100] sm:$0xff]  ;;  %v3414_v18 = vunpack.i.h.bf16 %v4594_v55 }
  0xf8   : > { %v4831_v62 = vsel %vm1823_vm4, %v1800_v8, %v3493_v3  ;;  %v4834_v49 = vsel %vm1823_vm4, %v1801_v9, %v3494_v39  ;;  %3766 = vrot.lane.b32.xlu0 %v6370_v2, %s4122_s28  ;;  %v1770_v9 = vsel %vm1739_vm2, %v240_v60, %v3323_v20  ;;  %v1771_v39 = vsel %vm1739_vm2, %v241_v14, %v3324_v10  ;;  %v243_v8 = vld [vmem:[%s4207_s5 + $0x108] sm:$0xff] }
  0xf9   : > { %v4845_v34 = vsel %vm1823_vm4, %v1798_v44, %v3488_v13  ;;  %v4848_v37 = vsel %vm1823_vm4, %v1799_v23, %v3489_v17  ;;  %v4850_v3 = vpop.permute.xlu1 %3501  ;;  %v3413_v44 = vunpack.i.l.bf16 %v4594_v55  ;;  %v6371_v23 = vpack.i.bf16 %v4699_v45, %v4692_v61 }
  0xfa   : > { %v3497_v2 = vpop.permute.xlu0 %3496  ;;  %v1774_v10 = vsel %vm1739_vm2, %v244_v12, %v3333_v47  ;;  %v1775_v20 = vsel %vm1739_vm2, %v245_v4, %v3334_v42  ;;  %v1772_v55 = vsel %vm1739_vm2, %v242_v7, %v3328_v58  ;;  %v1773_v60 = vsel %vm1739_vm2, %v243_v8, %v3329_v5 }
  0xfb   : > { %v3499_v13 = vunpack.i.h.bf16 %v3497_v2  ;;  %v3498_v17 = vunpack.i.l.bf16 %v3497_v2  ;;  %3781 = vrot.lane.b32.xlu1 %v6371_v23, %s4122_s28  ;;  %v1808_v35 = vsel %vm1781_vm3, %v4805_v32, %v3413_v44  ;;  %v1809_v63 = vsel %vm1781_vm3, %v4808_v51, %v3414_v18 }
  0xfc   : > { %3776 = vrot.lane.b32.xlu0 %v6372_v41, %s4123_s29  ;;  %v3423_v53 = vunpack.i.l.bf16 %v4604_v1  ;;  %v6373_v12 = vpack.i.bf16 %v4713_v26, %v4710_v48  ;;  %v3419_v24 = vunpack.i.h.bf16 %v4592_v54  ;;  %v3418_v4 = vunpack.i.l.bf16 %v4592_v54  ;;  %v249_v41 = vld [vmem:[%s4207_s5 + $0x138] sm:$0xff] }
  0xfd   : > { %v4875_v45 = vsel %vm1823_vm4, %v1802_v25, %v3498_v17  ;;  %v4878_v61 = vsel %vm1823_vm4, %v1803_v36, %v3499_v13  ;;  %v3512_v42 = vpop.permute.xlu1 %3511  ;;  %v3339_v1 = vunpack.i.h.bf16 %v4502_v28  ;;  %v3338_v51 = vunpack.i.l.bf16 %v4502_v28  ;;  %v248_v36 = vld [vmem:[%s4207_s5 + $0x130] sm:$0xff] }
  0xfe   : > { %v3514_v47 = vunpack.i.h.bf16 %v3512_v42  ;;  %v3513_v14 = vunpack.i.l.bf16 %v3512_v42  ;;  %v4882_v43 = vpop.permute.xlu0 %3506  ;;  %v3429_v48 = vunpack.i.h.bf16 %v4600_v56  ;;  %v3428_v26 = vunpack.i.l.bf16 %v4600_v56 }
  0xff   : > { %3791 = vrot.lane.b32.xlu1 %v6373_v12, %s4123_s29  ;;  %v3434_v54 = vunpack.i.h.bf16 %v4623_v31  ;;  %v3433_v7 = vunpack.i.l.bf16 %v4623_v31  ;;  %v1812_v44 = vsel %vm1781_vm3, %v1770_v9, %v3423_v53  ;;  %v1810_v56 = vsel %vm1781_vm3, %v1768_v57, %v3418_v4 }
 0x100   : > { %v4897_v5 = vsel %vm1823_vm4, %v1808_v35, %v3513_v14  ;;  %v4900_v32 = vsel %vm1823_vm4, %v1809_v63, %v3514_v47  ;;  %3786 = vrot.lane.b32.xlu0 %v4566_v29, %s4121_s23  ;;  %v1813_v29 = vsel %vm1781_vm3, %v1771_v39, %v3424_v40  ;;  %v1811_v17 = vsel %vm1781_vm3, %v1769_v59, %v3419_v24  ;;  %v246_v35 = vld [vmem:[%s4207_s5 + $0x120] sm:$0xff] }
 0x101   : > { %v3522_v58 = vpop.permute.xlu1 %3521  ;;  %v6374_v9 = vpack.i.bf16 %v4723_v19, %v4716_v33  ;;  %v1814_v39 = vsel %vm1781_vm3, %v1772_v55, %v3428_v26  ;;  %v1816_v42 = vsel %vm1781_vm3, %v1774_v10, %v3433_v7  ;;  %v1817_v47 = vsel %vm1781_vm3, %v1775_v20, %v3434_v54  ;;  %v247_v55 = vld [vmem:[%s4207_s5 + $0x128] sm:$0xff]  ;;  %v250_v7 = vld [vmem:[%s4207_s5 + $0x140] sm:$0xf] }
 0x102   : > { %v3524_v8 = vunpack.i.h.bf16 %v3522_v58  ;;  %v3523_v2 = vunpack.i.l.bf16 %v3522_v58  ;;  %v3517_v18 = vpop.permute.xlu0 %3516  ;;  %v3443_v63 = vunpack.i.l.bf16 %v4644_v52  ;;  %v6375_v12 = vpack.i.bf16 %v4729_v0, %v4726_v21 }
 0x103   : > { %v3519_v13 = vunpack.i.h.bf16 %v3517_v18  ;;  %v3518_v28 = vunpack.i.l.bf16 %v3517_v18  ;;  %3801 = vrot.lane.b32.xlu1 %v4562_v27, %s4121_s23  ;;  %v1815_v27 = vsel %vm1781_vm3, %v1773_v60, %v3429_v48  ;;  %v3444_v60 = vunpack.i.h.bf16 %v4644_v52 }
 0x104   : > { %v4917_v31 = vsel %vm1823_vm4, %v1812_v44, %v3523_v2  ;;  %v4920_v23 = vsel %vm1823_vm4, %v1813_v29, %v3524_v8  ;;  %3796 = vrot.lane.b32.xlu0 %v6374_v9, %s4122_s28  ;;  %v3439_v10 = vunpack.i.h.bf16 %v4617_v15  ;;  %v3438_v20 = vunpack.i.l.bf16 %v4617_v15 }
 0x105   : > { %v4929_v57 = vsel %vm1823_vm4, %v1810_v56, %v3518_v28  ;;  %v4932_v59 = vsel %vm1823_vm4, %v1811_v17, %v3519_v13  ;;  %v3532_v25 = vpop.permute.xlu1 %3531  ;;  %v6376_v52 = vpack.i.bf16 %v4743_v16, %v4740_v22  ;;  %v1778_v48 = vsel %vm1739_vm2, %v248_v36, %v3343_v6  ;;  %v433_v28 = vld [vmem:[%s4207_s5 + $0x85] sm:$0xff] }
 0x106   : > { %v3534_v14 = vunpack.i.h.bf16 %v3532_v25  ;;  %v3533_v33 = vunpack.i.l.bf16 %v3532_v25  ;;  %v3527_v19 = vpop.permute.xlu0 %3526  ;;  %v1779_v21 = vsel %vm1739_vm2, %v249_v41, %v3344_v30  ;;  %v1776_v58 = vsel %vm1739_vm2, %v246_v35, %v3338_v51  ;;  %v6380_v41 = vld [vmem:[#allocation29_spill] sm:$0xff] }
 0x107   : > { %v3529_v40 = vunpack.i.h.bf16 %v3527_v19  ;;  %v3528_v53 = vunpack.i.l.bf16 %v3527_v19  ;;  %3811 = vrot.lane.b32.xlu1 %v6375_v12, %s4122_s28  ;;  %v1777_v54 = vsel %vm1739_vm2, %v247_v55, %v3339_v1  ;;  %v1820_v6 = vsel %vm1781_vm3, %v1778_v48, %v3443_v63  ;;  %v475_v19 = vld [vmem:[%s4207_s5 + $0x8e] sm:$0xff] }
 0x108   : > { %v4949_v24 = vsel %vm1823_vm4, %v1816_v42, %v3533_v33  ;;  %v4952_v4 = vsel %vm1823_vm4, %v1817_v47, %v3534_v14  ;;  %3806 = vrot.lane.b32.xlu0 %v6376_v52, %s4123_s29  ;;  %v1821_v30 = vsel %vm1781_vm3, %v1779_v21, %v3444_v60  ;;  %v6377_v44 = vpack.i.bf16 %v4757_v38, %v4746_v11  ;;  %v434_v11 = vld [vmem:[%s4207_s5 + $0x8d] sm:$0xff]  ;;  %v6378_v38 = vld [vmem:[#allocation21_spill] sm:$0xff]  ;;  %v443_v55 = vld [vmem:[%s4207_s5 + $0xd5] sm:$0xff] }
 0x109   : > { %v4961_v0 = vsel %vm1823_vm4, %v1814_v39, %v3528_v53  ;;  %v4964_v15 = vsel %vm1823_vm4, %v1815_v27, %v3529_v40  ;;  %v3542_v26 = vpop.permute.xlu1 %3541  ;;  %v1818_v51 = vsel %vm1781_vm3, %v1776_v58, %v3438_v20  ;;  %v1819_v1 = vsel %vm1781_vm3, %v1777_v54, %v3439_v10  ;;  %v6379_v27 = vld [vmem:[#allocation35_spill] sm:$0xff]  ;;  %v6381_v47 = vld [vmem:[#allocation45_spill] sm:$0xff]  ;;  %v6383_v53 = vld [vmem:[#allocation32_spill] sm:$0xff] }
 0x10a   : > { %v3544_v16 = vunpack.i.h.bf16 %v3542_v26  ;;  %v3543_v22 = vunpack.i.l.bf16 %v3542_v26  ;;  %v3537_v8 = vpop.permute.xlu0 %3536  ;;  %v1780_v56 = vsel %vm1739_vm2, %v250_v7, %v6378_v38  ;;  %v3840_v42 = vpack.i.bf16 %v434_v11, %v433_v28  ;;  %v474_v33 = vld [vmem:[%s4207_s5 + $0x86] sm:$0xff]  ;;  %v444_v60 = vld [vmem:[%s4207_s5 + $0xdd] sm:$0xff]  ;;  %v435_v21 = vld [vmem:[%s4207_s5 + $0x95] sm:$0xff] }
 0x10b   : > { %v3539_v2 = vunpack.i.h.bf16 %v3537_v8  ;;  %v3538_v18 = vunpack.i.l.bf16 %v3537_v8  ;;  %3821 = vrot.lane.b32.xlu1 %v6377_v44, %s4123_s29  ;;  %v1822_v25 = vsel %vm1781_vm3, %v1780_v56, %v6379_v27  ;;  %v6382_v14 = vpack.i.bf16 %v4763_v50, %v6381_v47  ;;  %v484_v10 = vld [vmem:[%s4207_s5 + $0xd6] sm:$0xff]  ;;  %v485_v20 = vld [vmem:[%s4207_s5 + $0xde] sm:$0xff]  ;;  %v6384_v7 = vld [vmem:[#allocation6_spill] sm:$0xff] }
 0x10c   : > { %v4978_v29 = vsel %vm1823_vm4, %v1820_v6, %v3543_v22  ;;  %v4981_v13 = vsel %vm1823_vm4, %v1821_v30, %v3544_v16  ;;  %3816 = vrot.lane.b32.xlu0 %v4582_v46, %s4121_s23  ;;  %v3850_v40 = vpack.i.bf16 %v475_v19, %v474_v33  ;;  %v3845_v12 = vpack.i.bf16 %v444_v60, %v443_v55  ;;  %v436_v26 = vld [vmem:[%s4207_s5 + $0x9d] sm:$0xff]  ;;  %v445_v30 = vld [vmem:[%s4207_s5 + $0xe5] sm:$0xff] }
 0x10d   : > { %v4990_v17 = vsel %vm1823_vm4, %v1818_v51, %v3538_v18  ;;  %v4993_v9 = vsel %vm1823_vm4, %v1819_v1, %v3539_v2  ;;  %v4995_v39 = vpop.permute.xlu1 %3546  ;;  %v3855_v48 = vpack.i.bf16 %v485_v20, %v484_v10  ;;  %v3870_v16 = vpack.i.bf16 %v436_v26, %v435_v21  ;;  %v476_v22 = vld [vmem:[%s4207_s5 + $0x96] sm:$0xff]  ;;  %v477_v8 = vld [vmem:[%s4207_s5 + $0x9e] sm:$0xff]  ;;  %v446_v2 = vld [vmem:[%s4207_s5 + $0xed] sm:$0xff] }
 0x10e   : > { %v915_v36 = vpop.permute.xlu0 %914  ;;  %v3880_v1 = vpack.i.bf16 %v477_v8, %v476_v22  ;;  %v4124_v28 = vmov 0   ;;  %v6387_v56 = vld [vmem:[#allocation9_spill] sm:$0xff]  ;;  %v3875_v27 = vpack.i.bf16 %v446_v2, %v445_v30  ;;  %v479_v21 = vld [vmem:[%s4207_s5 + $0xae] sm:$0xff] }
 0x10f   : > { %v5000_v46 = vsel %vm1823_vm4, %v1822_v25, %v915_v36  ;;  %3831 = vrot.lane.b32.xlu1 %v6380_v41, %s4121_s23  ;;  %4045 = vset.pattern.permute.xlu0 %v4124_v28  ;;  %v486_v36 = vld [vmem:[%s4207_s5 + $0xe6] sm:$0xff]  ;;  %v487_v41 = vld [vmem:[%s4207_s5 + $0xee] sm:$0xff] }
 0x110   : > { %3826 = vrot.lane.b32.xlu0 %v6382_v14, %s4122_s28  ;;  %4046 = vset.pattern.permute.xlu1 %v4124_v28  ;;  %v3885_v55 = vpack.i.bf16 %v487_v41, %v486_v36  ;;  %v437_v60 = vld [vmem:[%s4207_s5 + $0xa5] sm:$0xff] }
 0x111   : > { %v5010_v35 = vpop.permute.xlu1 %3556 }
 0x112   : > { %v5014_v63 = vpop.permute.xlu0 %3551 }
 0x113   : > { %3841 = vrot.lane.b32.xlu1 %v3840_v42, %s4123_s29 }
 0x114   : > { %3836 = vrot.lane.b32.xlu0 %v6383_v53, %s4121_s23 }
 0x115   : > { %v5019_v50 = vpop.permute.xlu1 %3566 }
 0x116   : > { %v5023_v52 = vpop.permute.xlu0 %3561 }
 0x117   : > { %3851 = vrot.lane.b32.xlu1 %v3850_v40, %s4122_s28  ;;  %v438_v40 = vld [vmem:[%s4207_s5 + $0xad] sm:$0xff] }
 0x118   : > { %3846 = vrot.lane.b32.xlu0 %v3845_v12, %s4123_s29  ;;  %v3900_v20 = vpack.i.bf16 %v438_v40, %v437_v60 }
 0x119   : > { %v5029_v58 = vpop.permute.xlu1 %3576 }
 0x11a   : > { %v5031_v54 = vpop.permute.xlu0 %3571 }
 0x11b   : > { %3861 = vrot.lane.b32.xlu1 %v6384_v7, %s4121_s23  ;;  %v447_v7 = vld [vmem:[%s4207_s5 + $0xf5] sm:$0xff] }
 0x11c   : > { %3856 = vrot.lane.b32.xlu0 %v3855_v48, %s4122_s28  ;;  %v478_v48 = vld [vmem:[%s4207_s5 + $0xa6] sm:$0xff] }
 0x11d   : > { %v3587_v6 = vpop.permute.xlu1 %3586  ;;  %v3910_v30 = vpack.i.bf16 %v479_v21, %v478_v48  ;;  %v6403_v21 = vld [vmem:[#allocation8_spill] sm:$0xff] }
 0x11e   : > { %v3589_v18 = vunpack.i.h.bf16 %v3587_v6  ;;  %v3588_v44 = vunpack.i.l.bf16 %v3587_v6  ;;  %v5040_v51 = vpop.permute.xlu0 %3581 }
 0x11f   : > { %3871 = vrot.lane.b32.xlu1 %v3870_v16, %s4123_s29 }
 0x120   : > { %v5045_v11 = vsel %vm1865_vm5, %v4845_v34, %v3588_v44  ;;  %v5049_v38 = vsel %vm1865_vm5, %v4848_v37, %v3589_v18  ;;  %3866 = vrot.lane.b32.xlu0 %v6387_v56, %s4121_s23  ;;  %v6396_v44 = vld [vmem:[#allocation34_spill] sm:$0xff] }
 0x121   : > { %6385 = vst [vmem:[#allocation21_spill] sm:$0xff] %v5045_v11  ;;  %6386 = vst [vmem:[#allocation35_spill] sm:$0xff] %v5049_v38  ;;  %v3597_v25 = vpop.permute.xlu1 %3596 }
 0x122   : > { %v3599_v42 = vunpack.i.h.bf16 %v3597_v25  ;;  %v3598_v47 = vunpack.i.l.bf16 %v3597_v25  ;;  %v3592_v14 = vpop.permute.xlu0 %3591  ;;  %v489_v25 = vld [vmem:[%s4207_s5 + $0xfe] sm:$0xff] }
 0x123   : > { %v3594_v33 = vunpack.i.h.bf16 %v3592_v14  ;;  %v3593_v34 = vunpack.i.l.bf16 %v3592_v14  ;;  %3881 = vrot.lane.b32.xlu1 %v3880_v1, %s4122_s28 }
 0x124   : > { %v5058_v37 = vsel %vm1865_vm5, %v4875_v45, %v3598_v47  ;;  %v5062_v19 = vsel %vm1865_vm5, %v4878_v61, %v3599_v42  ;;  %3876 = vrot.lane.b32.xlu0 %v3875_v27, %s4123_s29  ;;  %v6393_v61 = vld [vmem:[#allocation5_spill] sm:$0xff]  ;;  %v488_v27 = vld [vmem:[%s4207_s5 + $0xf6] sm:$0xff] }
 0x125   : > { %6388 = vst [vmem:[#allocation29_spill] sm:$0xff] %v5058_v37  ;;  %6389 = vst [vmem:[#allocation45_spill] sm:$0xff] %v5062_v19  ;;  %v5069_v53 = vsel %vm1865_vm5, %v4831_v62, %v3593_v34  ;;  %v5073_v12 = vsel %vm1865_vm5, %v4834_v49, %v3594_v33  ;;  %v5075_v45 = vpop.permute.xlu1 %3606  ;;  %v448_v62 = vld [vmem:[%s4207_s5 + $0xfd] sm:$0xff]  ;;  %v439_v33 = vld [vmem:[%s4207_s5 + $0xb5] sm:$0xff] }
 0x126   : > { %6390 = vst [vmem:[#allocation32_spill] sm:$0xff] %v5069_v53  ;;  %6391 = vst [vmem:[#allocation6_spill] sm:$0xff] %v5073_v12  ;;  %v5077_v10 = vpop.permute.xlu0 %3601  ;;  %v3905_v1 = vpack.i.bf16 %v448_v62, %v447_v7  ;;  %v440_v34 = vld [vmem:[%s4207_s5 + $0xbd] sm:$0xff]  ;;  %v6427_v19 = vld [vmem:[#allocation18_spill] sm:$0xff] }
 0x127   : > { %6392 = vst [vmem:[#allocation9_spill] sm:$0xff] %v5075_v45  ;;  %3891 = vrot.lane.b32.xlu1 %v6393_v61, %s4121_s23  ;;  %v480_v7 = vld [vmem:[%s4207_s5 + $0xb6] sm:$0xff]  ;;  %v481_v62 = vld [vmem:[%s4207_s5 + $0xbe] sm:$0xff]  ;;  %v3304_v37 = vunpack.i.h.bf16 %v6427_v19  ;;  %v416_v45 = vld [vmem:[%s4207_s5 + $0x14c] sm:$0xff] }
 0x128   : > { %3886 = vrot.lane.b32.xlu0 %v3885_v55, %s4122_s28  ;;  %v233_v53 = vld [vmem:[%s4207_s5 + $0xb8] sm:$0xff] }
 0x129   : > { %v3617_v26 = vpop.permute.xlu1 %3616 }
 0x12a   : > { %v3619_v16 = vunpack.i.h.bf16 %v3617_v26  ;;  %v3618_v49 = vunpack.i.l.bf16 %v3617_v26  ;;  %v3612_v22 = vpop.permute.xlu0 %3611  ;;  %v3930_v26 = vpack.i.bf16 %v440_v34, %v439_v33  ;;  %v482_v34 = vld [vmem:[%s4207_s5 + $0xc6] sm:$0xff] }
 0x12b   : > { %v3614_v8 = vunpack.i.h.bf16 %v3612_v22  ;;  %v3613_v6 = vunpack.i.l.bf16 %v3612_v22  ;;  %3901 = vrot.lane.b32.xlu1 %v3900_v20, %s4123_s29  ;;  %v449_v22 = vld [vmem:[%s4207_s5 + $0x105] sm:$0xff] }
 0x12c   : > { %v5089_v2 = vsel %vm1865_vm5, %v4929_v57, %v3618_v49  ;;  %v5093_v18 = vsel %vm1865_vm5, %v4932_v59, %v3619_v16  ;;  %3896 = vrot.lane.b32.xlu0 %v6396_v44, %s4121_s23 }
 0x12d   : > { %6394 = vst [vmem:[#allocation5_spill] sm:$0xff] %v5089_v2  ;;  %6395 = vst [vmem:[#allocation48_spill] sm:$0xff] %v5093_v18  ;;  %v5099_v28 = vsel %vm1865_vm5, %v4897_v5, %v3613_v6  ;;  %v5103_v56 = vsel %vm1865_vm5, %v4900_v32, %v3614_v8  ;;  %v3627_v57 = vpop.permute.xlu1 %3626  ;;  %v3915_v32 = vpack.i.bf16 %v489_v25, %v488_v27  ;;  %v450_v8 = vld [vmem:[%s4207_s5 + $0x10d] sm:$0xff]  ;;  %v3303_v18 = vunpack.i.l.bf16 %v6427_v19 }
 0x12e   : > { %6397 = vst [vmem:[#allocation34_spill] sm:$0xff] %v5099_v28  ;;  %6398 = vst [vmem:[#allocation49_spill] sm:$0xff] %v5103_v56  ;;  %v3629_v36 = vunpack.i.h.bf16 %v3627_v57  ;;  %v3628_v59 = vunpack.i.l.bf16 %v3627_v57  ;;  %v3622_v41 = vpop.permute.xlu0 %3621  ;;  %v490_v25 = vld [vmem:[%s4207_s5 + $0x106] sm:$0xff] }
 0x12f   : > { %v3624_v42 = vunpack.i.h.bf16 %v3622_v41  ;;  %v3623_v47 = vunpack.i.l.bf16 %v3622_v41  ;;  %3911 = vrot.lane.b32.xlu1 %v3910_v30, %s4122_s28  ;;  %v441_v41 = vld [vmem:[%s4207_s5 + $0xc5] sm:$0xff] }
 0x130   : > { %v5110_v14 = vsel %vm1865_vm5, %v4961_v0, %v3628_v59  ;;  %v5114_v5 = vsel %vm1865_vm5, %v4964_v15, %v3629_v36  ;;  %3906 = vrot.lane.b32.xlu0 %v3905_v1, %s4123_s29  ;;  %v6409_v1 = vld [vmem:[#allocation33_spill] sm:$0xff]  ;;  %v491_v36 = vld [vmem:[%s4207_s5 + $0x10e] sm:$0xff] }
 0x131   : > { %6399 = vst [vmem:[#allocation50_spill] sm:$0xff] %v5110_v14  ;;  %6400 = vst [vmem:[#allocation51_spill] sm:$0xff] %v5114_v5  ;;  %v5121_v55 = vsel %vm1865_vm5, %v4917_v31, %v3623_v47  ;;  %v5125_v60 = vsel %vm1865_vm5, %v4920_v23, %v3624_v42  ;;  %v3637_v0 = vpop.permute.xlu1 %3636  ;;  %v442_v42 = vld [vmem:[%s4207_s5 + $0xcd] sm:$0xff]  ;;  %v6426_v5 = vld [vmem:[#allocation17_spill] sm:$0xff] }
 0x132   : > { %6401 = vst [vmem:[#allocation52_spill] sm:$0xff] %v5121_v55  ;;  %6402 = vst [vmem:[#allocation53_spill] sm:$0xff] %v5125_v60  ;;  %v3639_v40 = vunpack.i.h.bf16 %v3637_v0  ;;  %v3638_v15 = vunpack.i.l.bf16 %v3637_v0  ;;  %v3632_v61 = vpop.permute.xlu0 %3631  ;;  %v3960_v33 = vpack.i.bf16 %v442_v42, %v441_v41  ;;  %v483_v0 = vld [vmem:[%s4207_s5 + $0xce] sm:$0xff]  ;;  %v3279_v14 = vunpack.i.h.bf16 %v6426_v5 }
 0x133   : > { %v3634_v20 = vunpack.i.h.bf16 %v3632_v61  ;;  %v3633_v48 = vunpack.i.l.bf16 %v3632_v61  ;;  %3921 = vrot.lane.b32.xlu1 %v6403_v21, %s4121_s23  ;;  %v452_v61 = vld [vmem:[%s4207_s5 + $0x11d] sm:$0xff]  ;;  %v223_v55 = vld [vmem:[%s4207_s5 + $0x68] sm:$0xff] }
 0x134   : > { %v5131_v31 = vsel %vm1865_vm5, %v4990_v17, %v3638_v15  ;;  %v5135_v23 = vsel %vm1865_vm5, %v4993_v9, %v3639_v40  ;;  %3916 = vrot.lane.b32.xlu0 %v3915_v32, %s4122_s28  ;;  %v6412_v32 = vld [vmem:[#allocation7_spill] sm:$0xff]  ;;  %v6413_v21 = vld [vmem:[#allocation37_spill] sm:$0xff] }
 0x135   : > { %6404 = vst [vmem:[#allocation8_spill] sm:$0xff] %v5131_v31  ;;  %6405 = vst [vmem:[#allocation54_spill] sm:$0xff] %v5135_v23  ;;  %v5142_v16 = vsel %vm1865_vm5, %v4949_v24, %v3633_v48  ;;  %v5146_v49 = vsel %vm1865_vm5, %v4952_v4, %v3634_v20  ;;  %v1079_v17 = vpop.permute.xlu1 %1078  ;;  %v3940_v24 = vpack.i.bf16 %v481_v62, %v480_v7  ;;  %v451_v15 = vld [vmem:[%s4207_s5 + $0x115] sm:$0xff]  ;;  %v6414_v7 = vld [vmem:[#allocation10_spill] sm:$0xff] }
 0x136   : > { %6406 = vst [vmem:[#allocation55_spill] sm:$0xff] %v5142_v16  ;;  %6407 = vst [vmem:[#allocation56_spill] sm:$0xff] %v5146_v49  ;;  %v5152_v9 = vsel %vm1865_vm5, %v5000_v46, %v1079_v17  ;;  %v3642_v6 = vpop.permute.xlu0 %3641  ;;  %v3935_v4 = vpack.i.bf16 %v450_v8, %v449_v22  ;;  %v3970_v48 = vpack.i.bf16 %v483_v0, %v482_v34  ;;  %v3259_v62 = vunpack.i.h.bf16 %v6414_v7  ;;  %v214_v22 = vld [vmem:[%s4207_s5 + $0x20] sm:$0xff]  ;;  %v217_v34 = vld [vmem:[%s4207_s5 + $0x38] sm:$0xff] }
 0x137   : > { %6408 = vst [vmem:[#allocation57_spill] sm:$0xff] %v5152_v9  ;;  %v3644_v30 = vunpack.i.h.bf16 %v3642_v6  ;;  %v3643_v44 = vunpack.i.l.bf16 %v3642_v6  ;;  %3931 = vrot.lane.b32.xlu1 %v3930_v26, %s4123_s29  ;;  %v3965_v26 = vpack.i.bf16 %v452_v61, %v451_v15  ;;  %v3258_v17 = vunpack.i.l.bf16 %v6414_v7  ;;  %v492_v6 = vld [vmem:[%s4207_s5 + $0x116] sm:$0xff]  ;;  %v6419_v0 = vld [vmem:[#allocation13_spill] sm:$0xff]  ;;  %v454_v31 = vld [vmem:[%s4207_s5 + $0x12d] sm:$0xff] }
 0x138   : > { %3926 = vrot.lane.b32.xlu0 %v6409_v1, %s4121_s23  ;;  %v3254_v15 = vunpack.i.h.bf16 %v6419_v0  ;;  %v3253_v61 = vunpack.i.l.bf16 %v6419_v0  ;;  %v213_v7 = vld [vmem:[%s4207_s5 + $0x18] sm:$0xff]  ;;  %v494_v9 = vld [vmem:[%s4207_s5 + $0x126] sm:$0xff] }
 0x139   : > { %v5159_v57 = vsel %vm1865_vm5, %v4978_v29, %v3643_v44  ;;  %v5163_v46 = vsel %vm1865_vm5, %v4981_v13, %v3644_v30  ;;  %v5165_v27 = vpop.permute.xlu1 %3651  ;;  %v3945_v29 = vpack.i.bf16 %v491_v36, %v490_v25  ;;  %v493_v30 = vld [vmem:[%s4207_s5 + $0x11e] sm:$0xff]  ;;  %v215_v44 = vld [vmem:[%s4207_s5 + $0x28] sm:$0xff]  ;;  %v6424_v49 = vld [vmem:[#allocation15_spill] sm:$0xff] }
 0x13a   : > { %6410 = vst [vmem:[#allocation33_spill] sm:$0xff] %v5159_v57  ;;  %6411 = vst [vmem:[#allocation58_spill] sm:$0xff] %v5163_v46  ;;  %v5169_v59 = vpop.permute.xlu0 %3646  ;;  %v210_v25 = vld [vmem:[%s4207_s5] sm:$0xff]  ;;  %v211_v36 = vld [vmem:[%s4207_s5 + $0x8] sm:$0xff]  ;;  %v5220_v57 = vsel %vm1739_vm2, %v214_v22, %v3258_v17  ;;  %v3269_v16 = vunpack.i.h.bf16 %v6424_v49 }
 0x13b   : > { %3941 = vrot.lane.b32.xlu1 %v3940_v24, %s4122_s28  ;;  %v6416_v24 = vld [vmem:[#allocation11_spill] sm:$0xff]  ;;  %v453_v0 = vld [vmem:[%s4207_s5 + $0x125] sm:$0xff] }
 0x13c   : > { %3936 = vrot.lane.b32.xlu0 %v3935_v4, %s4123_s29  ;;  %v3249_v1 = vunpack.i.h.bf16 %v6416_v24  ;;  %v3248_v4 = vunpack.i.l.bf16 %v6416_v24  ;;  %v3975_v24 = vpack.i.bf16 %v493_v30, %v492_v6  ;;  %v495_v46 = vld [vmem:[%s4207_s5 + $0x12e] sm:$0xff] }
 0x13d   : > { %v5175_v47 = vpop.permute.xlu1 %3661  ;;  %v6421_v17 = vld [vmem:[#allocation14_spill] sm:$0xff] }
 0x13e   : > { %v5177_v13 = vpop.permute.xlu0 %3656  ;;  %v3273_v22 = vunpack.i.l.bf16 %v6421_v17 }
 0x13f   : > { %3951 = vrot.lane.b32.xlu1 %v6412_v32, %s4121_s23 }
 0x140   : > { %3946 = vrot.lane.b32.xlu0 %v3945_v29, %s4122_s28  ;;  %v6417_v29 = vld [vmem:[#allocation12_spill] sm:$0xff] }
 0x141   : > { %v5184_v40 = vpop.permute.xlu1 %3671  ;;  %v3263_v41 = vunpack.i.l.bf16 %v6417_v29  ;;  %v3264_v32 = vunpack.i.h.bf16 %v6417_v29  ;;  %v5223_v29 = vsel %vm1739_vm2, %v215_v44, %v3259_v62 }
 0x142   : > { %v5188_v20 = vpop.permute.xlu0 %3666 }
 0x143   : > { %3961 = vrot.lane.b32.xlu1 %v3960_v33, %s4123_s29  ;;  %v216_v33 = vld [vmem:[%s4207_s5 + $0x30] sm:$0xff]  ;;  %v5242_v30 = vsel %vm1739_vm2, %v217_v34, %v3264_v32  ;;  %v3268_v32 = vunpack.i.l.bf16 %v6424_v49  ;;  %v3985_v34 = vpack.i.bf16 %v454_v31, %v453_v0  ;;  %v3278_v49 = vunpack.i.l.bf16 %v6426_v5  ;;  %v222_v0 = vld [vmem:[%s4207_s5 + $0x60] sm:$0xff] }
 0x144   : > { %3956 = vrot.lane.b32.xlu0 %v6413_v21, %s4121_s23  ;;  %v212_v21 = vld [vmem:[%s4207_s5 + $0x10] sm:$0xff]  ;;  %v5236_v6 = vsel %vm1739_vm2, %v216_v33, %v3263_v41  ;;  %v3274_v41 = vunpack.i.h.bf16 %v6421_v17  ;;  %v221_v33 = vld [vmem:[%s4207_s5 + $0x58] sm:$0xff] }
 0x145   : > { %v5196_v8 = vpop.permute.xlu1 %3681  ;;  %v5245_v44 = vsel %vm1739_vm2, %v212_v21, %v3253_v61  ;;  %v456_v61 = vld [vmem:[%s4207_s5 + $0x13d] sm:$0xff]  ;;  %v224_v17 = vld [vmem:[%s4207_s5 + $0x70] sm:$0xff] }
 0x146   : > { %6415 = vst [vmem:[#allocation7_spill] sm:$0xff] %v5196_v8  ;;  %v5206_v42 = vpop.permute.xlu0 %3676  ;;  %v218_v21 = vld [vmem:[%s4207_s5 + $0x40] sm:$0xff]  ;;  %v232_v5 = vld [vmem:[%s4207_s5 + $0xb0] sm:$0xff]  ;;  %v5288_v38 = vsel %vm1739_vm2, %v221_v33, %v3274_v41  ;;  %v1752_v8 = vsel %vm1739_vm2, %v222_v0, %v3278_v49 }
 0x147   : > { %6418 = vst [vmem:[#allocation37_spill] sm:$0xff] %v5206_v42  ;;  %3971 = vrot.lane.b32.xlu1 %v3970_v48, %s4122_s28  ;;  %v5230_v48 = vsel %vm1739_vm2, %v210_v25, %v3248_v4  ;;  %v220_v4 = vld [vmem:[%s4207_s5 + $0x50] sm:$0xff]  ;;  %v6423_v25 = vld [vmem:[#allocation36_spill] sm:$0xff]  ;;  %v1748_v11 = vsel %vm1739_vm2, %v218_v21, %v3268_v32  ;;  %v5308_v32 = vsel %vm1739_vm2, %v233_v53, %v3304_v37  ;;  %v6437_v49 = vld [vmem:[#allocation25_spill] sm:$0xff] }
 0x148   : > { %3966 = vrot.lane.b32.xlu0 %v3965_v26, %s4123_s29  ;;  %v5233_v26 = vsel %vm1739_vm2, %v211_v36, %v3249_v1  ;;  %v5248_v1 = vsel %vm1739_vm2, %v213_v7, %v3254_v15  ;;  %v3990_v36 = vpack.i.bf16 %v495_v46, %v494_v9  ;;  %v455_v15 = vld [vmem:[%s4207_s5 + $0x135] sm:$0xff]  ;;  %v219_v7 = vld [vmem:[%s4207_s5 + $0x48] sm:$0xff]  ;;  %v5270_v31 = vsel %vm1739_vm2, %v220_v4, %v3273_v22  ;;  %v234_v22 = vld [vmem:[%s4207_s5 + $0xc0] sm:$0xff] }
 0x149   : > { %v5225_v23 = vpop.permute.xlu1 %3691  ;;  %v6430_v4 = vld [vmem:[#allocation20_spill] sm:$0xff]  ;;  %v4000_v19 = vpack.i.bf16 %v456_v61, %v455_v15  ;;  %v6432_v61 = vld [vmem:[#allocation22_spill] sm:$0xff] }
 0x14a   : > { %6420 = vst [vmem:[#allocation10_spill] sm:$0xff] %v5225_v23  ;;  %v5239_v62 = vpop.permute.xlu0 %3686  ;;  %v3349_v56 = vunpack.i.h.bf16 %v6430_v4  ;;  %v3348_v28 = vunpack.i.l.bf16 %v6430_v4  ;;  %v496_v41 = vld [vmem:[%s4207_s5 + $0x136] sm:$0xff]  ;;  %v497_v33 = vld [vmem:[%s4207_s5 + $0x13e] sm:$0xff]  ;;  %v3358_v21 = vunpack.i.l.bf16 %v6432_v61  ;;  %v3359_v53 = vunpack.i.h.bf16 %v6432_v61 }
 0x14b   : > { %6422 = vst [vmem:[#allocation11_spill] sm:$0xff] %v5239_v62  ;;  %3981 = vrot.lane.b32.xlu1 %v6423_v25, %s4121_s23  ;;  %v6425_v25 = vld [vmem:[#allocation16_spill] sm:$0xff]  ;;  %v235_v62 = vld [vmem:[%s4207_s5 + $0xc8] sm:$0xff]  ;;  %v6440_v61 = vld [vmem:[#allocation27_spill] sm:$0xff] }
 0x14c   : > { %3976 = vrot.lane.b32.xlu0 %v3975_v24, %s4122_s28  ;;  %v3284_v9 = vunpack.i.h.bf16 %v6425_v25  ;;  %v3283_v46 = vunpack.i.l.bf16 %v6425_v25  ;;  %v225_v24 = vld [vmem:[%s4207_s5 + $0x78] sm:$0xff] }
 0x14d   : > { %v5267_v60 = vpop.permute.xlu1 %3701  ;;  %v6428_v25 = vld [vmem:[#allocation19_spill] sm:$0xff] }
 0x14e   : > { %v3308_v2 = vunpack.i.l.bf16 %v6428_v25  ;;  %v5278_v12 = vpop.permute.xlu0 %3696  ;;  %v3309_v23 = vunpack.i.h.bf16 %v6428_v25  ;;  %v415_v25 = vld [vmem:[%s4207_s5 + $0x144] sm:$0xff]  ;;  %v1754_v42 = vsel %vm1739_vm2, %v224_v17, %v3283_v46  ;;  %v1755_v4 = vsel %vm1739_vm2, %v225_v24, %v3284_v9  ;;  %v499_v46 = vld [vmem:[%s4207_s5 + $0x14e] sm:$0xff]  ;;  %v6436_v17 = vld [vmem:[#allocation24_spill] sm:$0xff] }
 0x14f   : > { %6429 = vst [vmem:[#allocation12_spill] sm:$0xff] %v5278_v12  ;;  %3991 = vrot.lane.b32.xlu1 %v3990_v36, %s4122_s28  ;;  %v1749_v12 = vsel %vm1739_vm2, %v219_v7, %v3269_v16  ;;  %v1753_v36 = vsel %vm1739_vm2, %v223_v55, %v3279_v14  ;;  %v5305_v16 = vsel %vm1739_vm2, %v232_v5, %v3303_v18  ;;  %v3364_v24 = vunpack.i.h.bf16 %v6437_v49  ;;  %v457_v5 = vld [vmem:[%s4207_s5 + $0x145] sm:$0xff] }
 0x150   : > { %3986 = vrot.lane.b32.xlu0 %v3985_v34, %s4123_s29  ;;  %v5311_v34 = vsel %vm1739_vm2, %v234_v22, %v3308_v2  ;;  %v5317_v14 = vsel %vm1739_vm2, %v235_v62, %v3309_v23  ;;  %v5321_v55 = vsel %vm1781_vm3, %v5230_v48, %v3348_v28  ;;  %v5325_v18 = vsel %vm1781_vm3, %v5233_v26, %v3349_v56  ;;  %v6434_v2 = vld [vmem:[#allocation23_spill] sm:$0xff]  ;;  %v6435_v62 = vld [vmem:[#allocation40_spill] sm:$0xff]  ;;  %v498_v48 = vld [vmem:[%s4207_s5 + $0x146] sm:$0xff] }
 0x151   : > { %v5300_v15 = vpop.permute.xlu1 %3711  ;;  %v5328_v37 = vpack.i.bf16 %v416_v45, %v415_v25  ;;  %v3354_v9 = vunpack.i.h.bf16 %v6434_v2  ;;  %v3353_v23 = vunpack.i.l.bf16 %v6434_v2  ;;  %v4005_v28 = vpack.i.bf16 %v497_v33, %v496_v41  ;;  %v458_v22 = vld [vmem:[%s4207_s5 + $0x14d] sm:$0xff] }
 0x152   : > { %6431 = vst [vmem:[#allocation13_spill] sm:$0xff] %v5300_v15  ;;  %v5314_v7 = vpop.permute.xlu0 %3706  ;;  %v3369_v56 = vunpack.i.h.bf16 %v6436_v17  ;;  %v3368_v26 = vunpack.i.l.bf16 %v6436_v17  ;;  %v3363_v45 = vunpack.i.l.bf16 %v6437_v49  ;;  %v6439_v25 = vld [vmem:[#allocation26_spill] sm:$0xff]  ;;  %v3373_v2 = vunpack.i.l.bf16 %v6440_v61  ;;  %v6442_v49 = vld [vmem:[#allocation28_spill] sm:$0xff] }
 0x153   : > { %6433 = vst [vmem:[#allocation14_spill] sm:$0xff] %v5314_v7  ;;  %4001 = vrot.lane.b32.xlu1 %v4000_v19, %s4123_s29  ;;  %v5347_v19 = vsel %vm1781_vm3, %v5220_v57, %v3358_v21  ;;  %v3379_v41 = vunpack.i.h.bf16 %v6439_v25  ;;  %v3378_v33 = vunpack.i.l.bf16 %v6439_v25  ;;  %v3374_v17 = vunpack.i.h.bf16 %v6440_v61  ;;  %v419_v7 = vld [vmem:[%s4207_s5 + $0x15c] sm:$0xff] }
 0x154   : > { %3996 = vrot.lane.b32.xlu0 %v6435_v62, %s4121_s23  ;;  %v3383_v15 = vunpack.i.l.bf16 %v6442_v49  ;;  %v4020_v57 = vpack.i.bf16 %v499_v46, %v498_v48  ;;  %v5361_v21 = vsel %vm1781_vm3, %v5223_v29, %v3359_v53  ;;  %v5365_v25 = vsel %vm1781_vm3, %v5245_v44, %v3353_v23 }
 0x155   : > { %v5341_v0 = vpop.permute.xlu1 %3721  ;;  %v4015_v61 = vpack.i.bf16 %v458_v22, %v457_v5  ;;  %v5375_v48 = vsel %vm1781_vm3, %v1748_v11, %v3368_v26  ;;  %v5378_v29 = vsel %vm1781_vm3, %v1749_v12, %v3369_v56  ;;  %v5382_v44 = vsel %vm1781_vm3, %v5236_v6, %v3363_v45  ;;  %v6443_v6 = vld [vmem:[#allocation30_spill] sm:$0xff]  ;;  %v459_v56 = vld [vmem:[%s4207_s5 + $0x155] sm:$0xff]  ;;  %v501_v22 = vld [vmem:[%s4207_s5 + $0x15e] sm:$0xff] }
 0x156   : > { %6438 = vst [vmem:[#allocation36_spill] sm:$0xff] %v5341_v0  ;;  %v5352_v62 = vpop.permute.xlu0 %3716  ;;  %v3384_v0 = vunpack.i.h.bf16 %v6442_v49  ;;  %v418_v49 = vld [vmem:[%s4207_s5 + $0x154] sm:$0xff]  ;;  %v5394_v11 = vsel %vm1781_vm3, %v1753_v36, %v3379_v41  ;;  %v5398_v12 = vsel %vm1781_vm3, %v5270_v31, %v3373_v2  ;;  %v3408_v23 = vunpack.i.l.bf16 %v6443_v6  ;;  %v460_v31 = vld [vmem:[%s4207_s5 + $0x15d] sm:$0xff] }
 0x157   : > { %6441 = vst [vmem:[#allocation15_spill] sm:$0xff] %v5352_v62  ;;  %4011 = vrot.lane.b32.xlu1 %v5328_v37, %s4121_s23  ;;  %v5369_v62 = vsel %vm1781_vm3, %v5248_v1, %v3354_v9  ;;  %v5386_v1 = vsel %vm1781_vm3, %v5242_v30, %v3364_v24  ;;  %v5391_v9 = vsel %vm1781_vm3, %v1752_v8, %v3378_v33  ;;  %v3409_v26 = vunpack.i.h.bf16 %v6443_v6  ;;  %v6444_v24 = vld [vmem:[#allocation39_spill] sm:$0xff] }
 0x158   : > { %4006 = vrot.lane.b32.xlu0 %v4005_v28, %s4122_s28  ;;  %v5405_v30 = vsel %vm1781_vm3, %v5288_v38, %v3374_v17  ;;  %v5408_v8 = vsel %vm1781_vm3, %v1754_v42, %v3383_v15  ;;  %v5411_v46 = vsel %vm1781_vm3, %v1755_v4, %v3384_v0  ;;  %v4030_v36 = vpack.i.bf16 %v419_v7, %v418_v49  ;;  %v500_v38 = vld [vmem:[%s4207_s5 + $0x156] sm:$0xff] }
 0x159   : > { %v5388_v53 = vpop.permute.xlu1 %3731  ;;  %v3449_v45 = vunpack.i.h.bf16 %v6444_v24  ;;  %v3448_v5 = vunpack.i.l.bf16 %v6444_v24  ;;  %v6445_v42 = vld [vmem:[#allocation31_spill] sm:$0xff]  ;;  %v3549_v0 = vunpack.i.h.bf16 %v4995_v39  ;;  %v3548_v7 = vunpack.i.l.bf16 %v4995_v39 }
 0x15a   : > { %v5401_v28 = vpop.permute.xlu0 %3726  ;;  %v5428_v33 = vsel %vm1781_vm3, %v5311_v34, %v3408_v23  ;;  %v4035_v17 = vpack.i.bf16 %v460_v31, %v459_v56  ;;  %v4040_v49 = vpack.i.bf16 %v501_v22, %v500_v38  ;;  %v6446_v56 = vld [vmem:[#allocation38_spill] sm:$0xff] }
 0x15b   : > { %4021 = vrot.lane.b32.xlu1 %v4020_v57, %s4122_s28  ;;  %v3649_v57 = vunpack.i.h.bf16 %v5169_v59  ;;  %v1824_v39 = vsel %vm1823_vm4, %v5321_v55, %v3448_v5  ;;  %v1825_v34 = vsel %vm1823_vm4, %v5325_v18, %v3449_v45  ;;  %v3454_v31 = vunpack.i.h.bf16 %v6446_v56 }
 0x15c   : > { %4016 = vrot.lane.b32.xlu0 %v4015_v61, %s4123_s29  ;;  %v3648_v61 = vunpack.i.l.bf16 %v5169_v59  ;;  %v3453_v15 = vunpack.i.l.bf16 %v6446_v56  ;;  %v1866_v59 = vsel %vm1865_vm5, %v1824_v39, %v3548_v7  ;;  %v3554_v55 = vunpack.i.h.bf16 %v5014_v63 }
 0x15d   : > { %v3742_v41 = vpop.permute.xlu1 %3741  ;;  %v3553_v5 = vunpack.i.l.bf16 %v5014_v63  ;;  %v3653_v7 = vunpack.i.l.bf16 %v5165_v27 }
 0x15e   : > { %v5430_v2 = vpop.permute.xlu0 %3736  ;;  %v3744_v23 = vunpack.i.h.bf16 %v3742_v41  ;;  %v3743_v24 = vunpack.i.l.bf16 %v3742_v41  ;;  %v1908_v41 = vsel %vm1907_vm6, %v1866_v59, %v3648_v61  ;;  %v1826_v61 = vsel %vm1823_vm4, %v5365_v25, %v3453_v15 }
 0x15f   : > { %4031 = vrot.lane.b32.xlu1 %v4030_v36, %s4121_s23  ;;  %v1867_v36 = vsel %vm1865_vm5, %v1825_v34, %v3549_v0  ;;  %v3654_v0 = vunpack.i.h.bf16 %v5165_v27  ;;  %v420_v34 = vld [vmem:[%s4207_s5 + $0x164] sm:$0xf]  ;;  %v1868_v27 = vsel %vm1865_vm5, %v1826_v61, %v3553_v5 }
 0x160   : > { %4026 = vrot.lane.b32.xlu0 %v5328_v37, %s4118_s10  ;;  %v1909_v37 = vsel %vm1907_vm6, %v1867_v36, %v3649_v57  ;;  %v1950_v39 = vsel %vm1949_vm7, %v1908_v41, %v3743_v24  ;;  %v1827_v57 = vsel %vm1823_vm4, %v5369_v62, %v3454_v31 }
 0x161   : > { %v3752_v38 = vpop.permute.xlu1 %3751  ;;  %v1951_v63 = vsel %vm1949_vm7, %v1909_v37, %v3744_v23  ;;  %v1869_v25 = vsel %vm1865_vm5, %v1827_v57, %v3554_v55  ;;  %v6447_v37 = vld [vmem:[#allocation42_spill] sm:$0xff]  ;;  %v3559_v57 = vunpack.i.h.bf16 %v5010_v35 }
 0x162   : > { %v3754_v18 = vunpack.i.h.bf16 %v3752_v38  ;;  %v3753_v45 = vunpack.i.l.bf16 %v3752_v38  ;;  %v3747_v22 = vpop.permute.xlu0 %3746  ;;  %v417_v38 = vld [vmem:[%s4207_s5 + $0x154] sm:$0xf] }
 0x163   : > { %v3749_v4 = vunpack.i.h.bf16 %v3747_v22  ;;  %v3748_v56 = vunpack.i.l.bf16 %v3747_v22  ;;  %4041 = vrot.lane.b32.xlu1 %v4040_v49, %s4122_s28  ;;  %v1911_v22 = vsel %vm1907_vm6, %v1869_v25, %v3654_v0  ;;  %v5482_v0 = vsel %vm1781_vm3, %v5317_v14, %v3409_v26 }
 0x164   : > { %4036 = vrot.lane.b32.xlu0 %v4035_v17, %s4123_s29 }
 0x165   : > { %v1992_v59 = vsel %vm1991_vm8, %v1950_v39, %v3748_v56  ;;  %v1993_v49 = vsel %vm1991_vm8, %v1951_v63, %v3749_v4  ;;  %v3762_v36 = vpop.permute.xlu1 %3761  ;;  %v1910_v4 = vsel %vm1907_vm6, %v1868_v27, %v3653_v7  ;;  %v3458_v56 = vunpack.i.l.bf16 %v6447_v37  ;;  %v6448_v7 = vld [vmem:[#allocation41_spill] sm:$0xff] }
 0x166   : > { %v3757_v24 = vpop.permute.xlu0 %3756  ;;  %v2034_v23 = vsel %vm2033_vm9, %v1992_v59, %v3753_v45  ;;  %v2035_v17 = vsel %vm2033_vm9, %v1993_v49, %v3754_v18  ;;  %v3764_v41 = vunpack.i.h.bf16 %v3762_v36  ;;  %v3763_v5 = vunpack.i.l.bf16 %v3762_v36  ;;  %v502_v45 = vld [vmem:[%s4207_s5 + $0x166] sm:$0xf] }
 0x167   : > { %v3759_v15 = vunpack.i.h.bf16 %v3757_v24  ;;  %v3758_v62 = vunpack.i.l.bf16 %v3757_v24  ;;  %1368 = vrot.lane.b32.xlu1 %v420_v34, %s4121_s23  ;;  %v2075_v31 = vpack.c.bf16 %v2035_v17, %v2034_v23  ;;  %v3459_v18 = vunpack.i.h.bf16 %v6447_v37  ;;  %v461_v34 = vld [vmem:[%s4207_s5 + $0x165] sm:$0xf]  ;;  %s2938_s23 = scalar_lea.sflag [#allocation3], %s196_s27 }
 0x168   : > { %1242 = vrot.lane.b32.xlu0 %v417_v38, %s4118_s10  ;;  %v3464_v61 = vunpack.i.h.bf16 %v6448_v7  ;;  %v3558_v59 = vunpack.i.l.bf16 %v5010_v35  ;;  %v6449_v36 = vmov 0.0   ;;  %v3659_v38 = vunpack.i.h.bf16 %v5177_v13  ;;  %v2385_v35 = vld [vmem:[%s6267_s2 + $0x8] sm:$0xff]  ;;  %s3042_s10 = sshll.u32 %s196_s27, 1 }
 0x169   : > { %v1952_v55 = vsel %vm1949_vm7, %v1910_v4, %v3758_v62  ;;  %v1953_v39 = vsel %vm1949_vm7, %v1911_v22, %v3759_v15  ;;  %3104 = vmatmul.mubr.msk.bf16.vlgmr.msra.gmra.mrb[0].mxu0 %vm2116_vm10, %v2075_v31  ;;  %v3772_v63 = vpop.permute.xlu1 %3771  ;;  %v3658_v27 = vunpack.i.l.bf16 %v5177_v13  ;;  %v1828_v25 = vsel %vm1823_vm4, %v5347_v19, %v3458_v56  ;;  %v2384_v4 = vld [vmem:[%s6267_s2] sm:$0xff]  ;;  %s198_s12 = scalar_lea.vmem [#allocation2], %s3042_s10 }
 0x16a   : > { %v3767_v49 = vpop.permute.xlu0 %3766  ;;  %3107 = vmatprep.mubr.msk.bf16.mxu0 %vm4120_vm1, %v6449_v36  ;;  %v3774_v14 = vunpack.i.h.bf16 %v3772_v63  ;;  %v3773_v26 = vunpack.i.l.bf16 %v3772_v63  ;;  %v1994_v23 = vsel %vm1991_vm8, %v1952_v55, %v3763_v5  ;;  %v1995_v17 = vsel %vm1991_vm8, %v1953_v39, %v3764_v41  ;;  %s2954_s13 = sshll.u32 %s198_s12, 4  ;;  %s6225_s13 = int_to_ptr.vmem [resolvable:$true] %s2954_s13 }
 0x16b   : > { %v3769_v24 = vunpack.i.h.bf16 %v3767_v49  ;;  %v3768_v6 = vunpack.i.l.bf16 %v3767_v49  ;;  %1696 = vrot.lane.b32.xlu1 %v502_v45, %s4122_s28  ;;  %v1829_v13 = vsel %vm1823_vm4, %v5361_v21, %v3459_v18  ;;  %v3463_v22 = vunpack.i.l.bf16 %v6448_v7  ;;  %v2386_v7 = vld [vmem:[%s6267_s2 + $0x10] sm:$0xff]  ;;  %s4050_s19 = scalar_lea.vmem %s6225_s13, 32  ;;  %s4125_s28 = smov [#allocation2]  }
 0x16c   : > { %1532 = vrot.lane.b32.xlu0 %v461_v34, %s4123_s29  ;;  %v1870_v41 = vsel %vm1865_vm5, %v1828_v25, %v3558_v59  ;;  %v1871_v5 = vsel %vm1865_vm5, %v1829_v13, %v3559_v57  ;;  %v6450_v57 = vld [vmem:[#allocation43_spill] sm:$0xff]  ;;  %v3563_v49 = vunpack.i.l.bf16 %v5023_v52  ;;  %v6452_v13 = vunpack.i.h.bf16 %v6445_v42  ;;  %p4051_p11 = scmp.ne.s32.totalorder %s6225_s13, %s4050_s19  ;;  %s4054_s29 = sshll.u32 %s4125_s28, 4  ;;  %s4055_s29 = int_to_ptr.vmem [resolvable:$false] %s4054_s29 }
 0x16d   : > { %v2036_v15 = vsel %vm2033_vm9, %v1994_v23, %v3768_v6  ;;  %v2037_v62 = vsel %vm2033_vm9, %v1995_v17, %v3769_v24  ;;  %v3782_v31 = vpop.permute.xlu1 %3781  ;;  %v1912_v37 = vsel %vm1907_vm6, %v1870_v41, %v3658_v27  ;;  %v1913_v21 = vsel %vm1907_vm6, %v1871_v5, %v3659_v38  ;;  %v2387_v6 = vld [vmem:[%s6267_s2 + $0x18] sm:$0xff]  ;;  %s4056_s30 = scalar_lea.vmem %s4055_s29, 64  ;;  %p4057_p0 = scmp.lt.s32.totalorder %s6225_s13, %s4055_s29 }
 0x16e   : > { %v3777_v45 = vpop.permute.xlu0 %3776  ;;  %v2076_v19 = vpack.c.bf16 %v2037_v62, %v2036_v15  ;;  %v1954_v55 = vsel %vm1949_vm7, %v1912_v37, %v3773_v26  ;;  %v1955_v39 = vsel %vm1949_vm7, %v1913_v21, %v3774_v14  ;;  %v3784_v63 = vunpack.i.h.bf16 %v3782_v31  ;;  %p4052_p12 = pnand %p4051_p11, %p4189_p5  ;;  %p4058_p1 = scmp.lt.s32.totalorder %s4056_s30, %s4050_s19 }
 0x16f   : > { %v3779_v18 = vunpack.i.h.bf16 %v3777_v45  ;;  %v3778_v56 = vunpack.i.l.bf16 %v3777_v45  ;;  %2432 = vperm.xlu1 %4046, %v2385_v35   ;;  %v3783_v34 = vunpack.i.l.bf16 %v3782_v31  ;;  %v3473_v59 = vunpack.i.l.bf16 %v6450_v57  ;;  %v2389_v45 = vld [vmem:[%s6267_s2 + $0x28] sm:$0xff] }
 0x170   : > { %2427 = vperm.xlu0 %4045, %v2384_v4   ;;  %v6451_v14 = vunpack.i.l.bf16 %v6445_v42  ;;  %v3474_v23 = vunpack.i.h.bf16 %v6450_v57  ;;  %v3564_v17 = vunpack.i.h.bf16 %v5023_v52  ;;  %v3663_v35 = vunpack.i.l.bf16 %v5175_v47  ;;  %v6453_v42 = vld [vmem:[#allocation44_spill] sm:$0xff]  ;;  %p4053_p13 = pneg %p4052_p12  ;;  %p4059_p2 = por %p4058_p1, %p4057_p0 }
 0x171   : > { %v1996_v38 = vsel %vm1991_vm8, %v1954_v55, %v3778_v56  ;;  %v1997_v27 = vsel %vm1991_vm8, %v1955_v39, %v3779_v18  ;;  %3108 = vmatmul.mubr.msk.bf16.gmra.mrb[4].mxu0 %vm2116_vm10, %v2076_v19  ;;  %v3792_v24 = vpop.permute.xlu1 %3791  ;;  %v5540_v15 = vsel %vm1781_vm3, %v5308_v32, %v6452_v13  ;;  %v1831_v62 = vsel %vm1823_vm4, %v5386_v1, %v3464_v61  ;;  %v2388_v32 = vld [vmem:[%s6267_s2 + $0x20] sm:$0xff] }
 0x172   : > { %v5529_v26 = vsel %vm1781_vm3, %v5305_v16, %v6451_v14  ;;  %v3787_v25 = vpop.permute.xlu0 %3786  ;;  %3111 = vmatprep.mubr.msk.bf16.mxu0 %vm4120_vm1, %v6449_v36  ;;  %v1830_v16 = vsel %vm1823_vm4, %v5382_v44, %v3463_v22  ;;  %v3664_v52 = vunpack.i.h.bf16 %v5175_v47  ;;  %v2038_v41 = vsel %vm2033_vm9, %v1996_v38, %v3783_v34  ;;  %v2391_v14 = vld [vmem:[%s6267_s2 + $0x38] sm:$0xff]  ;;  %p4060_p3 = pnand %p4059_p2, %p4053_p13 }
 0x173   : > { %2437 = vperm.xlu1 %4046, %v2386_v7   ;;  %v3789_v31 = vunpack.i.h.bf16 %v3787_v25  ;;  %v3788_v4 = vunpack.i.l.bf16 %v3787_v25  ;;  %v2039_v5 = vsel %vm2033_vm9, %v1997_v27, %v3784_v63  ;;  %v5554_v44 = vsel %vm1823_vm4, %v5398_v12, %v3473_v59  ;;  %v2390_v59 = vld [vmem:[%s6267_s2 + $0x30] sm:$0xff] }
 0x174   : > { %2442 = vperm.xlu0 %4045, %v2387_v6   ;;  %v3469_v1 = vunpack.i.h.bf16 %v6453_v42  ;;  %v3468_v47 = vunpack.i.l.bf16 %v6453_v42  ;;  %v1872_v61 = vsel %vm1865_vm5, %v1830_v16, %v3563_v49  ;;  %v5564_v19 = vsel %vm1823_vm4, %v5405_v30, %v3474_v23  ;;  %v6454_v23 = vld [vmem:[#allocation46_spill] sm:$0xff] }
 0x175   : > { %v3802_v22 = vpop.permute.xlu1 %3801  ;;  %v3568_v37 = vunpack.i.l.bf16 %v5019_v50  ;;  %v1873_v12 = vsel %vm1865_vm5, %v1831_v62, %v3564_v17  ;;  %v1914_v21 = vsel %vm1907_vm6, %v1872_v61, %v3663_v35  ;;  %v3794_v55 = vunpack.i.h.bf16 %v3792_v24 }
 0x176   : > { %v3797_v18 = vpop.permute.xlu0 %3796  ;;  %v1915_v56 = vsel %vm1907_vm6, %v1873_v12, %v3664_v52  ;;  %v3793_v39 = vunpack.i.l.bf16 %v3792_v24  ;;  %v2077_v63 = vpack.c.bf16 %v2039_v5, %v2038_v41  ;;  %v1956_v34 = vsel %vm1949_vm7, %v1914_v21, %v3788_v4  ;;  %v6455_v5 = vld [vmem:[#allocation47_spill] sm:$0xff] }
 0x177   : > { %2447 = vperm.xlu1 %4046, %v2388_v32   ;;  %v1957_v7 = vsel %vm1949_vm7, %v1915_v56, %v3789_v31  ;;  %v3799_v57 = vunpack.i.h.bf16 %v3797_v18  ;;  %v3798_v30 = vunpack.i.l.bf16 %v3797_v18  ;;  %v1832_v49 = vsel %vm1823_vm4, %v5375_v48, %v3468_v47 }
 0x178   : > { %2452 = vperm.xlu0 %4045, %v2389_v45   ;;  %v1833_v38 = vsel %vm1823_vm4, %v5378_v29, %v3469_v1  ;;  %v3569_v27 = vunpack.i.h.bf16 %v5019_v50  ;;  %v3668_v24 = vunpack.i.l.bf16 %v5188_v20  ;;  %v3484_v17 = vunpack.i.h.bf16 %v6454_v23 }
 0x179   : > { %3112 = vmatmul.mubr.msk.bf16.gmra.mrb[8].mxu0 %vm2116_vm10, %v2077_v63  ;;  %v3812_v6 = vpop.permute.xlu1 %3811  ;;  %v3483_v35 = vunpack.i.l.bf16 %v6454_v23  ;;  %v3669_v48 = vunpack.i.h.bf16 %v5188_v20  ;;  %v3803_v25 = vunpack.i.l.bf16 %v3802_v22  ;;  %v1874_v50 = vsel %vm1865_vm5, %v1832_v49, %v3568_v37  ;;  %v2392_v20 = vld [vmem:[%s6267_s2 + $0x40] sm:$0xff] }
 0x17a   : > { %v3807_v13 = vpop.permute.xlu0 %3806  ;;  %3115 = vmatprep.mubr.msk.bf16.mxu0 %vm4120_vm1, %v6449_v36  ;;  %v3804_v29 = vunpack.i.h.bf16 %v3802_v22  ;;  %v1998_v16 = vsel %vm1991_vm8, %v1956_v34, %v3793_v39  ;;  %v1999_v62 = vsel %vm1991_vm8, %v1957_v7, %v3794_v55  ;;  %v3479_v32 = vunpack.i.h.bf16 %v6455_v5  ;;  %v2393_v22 = vld [vmem:[%s6267_s2 + $0x48] sm:$0xff] }
 0x17b   : > { %2457 = vperm.xlu1 %4046, %v2390_v59   ;;  %v2040_v52 = vsel %vm2033_vm9, %v1998_v16, %v3798_v30  ;;  %v2041_v31 = vsel %vm2033_vm9, %v1999_v62, %v3799_v57  ;;  %v3809_v4 = vunpack.i.h.bf16 %v3807_v13  ;;  %v3808_v41 = vunpack.i.l.bf16 %v3807_v13  ;;  %v2394_v30 = vld [vmem:[%s6267_s2 + $0x50] sm:$0xff] }
 0x17c   : > { %2462 = vperm.xlu0 %4045, %v2391_v14   ;;  %v3478_v42 = vunpack.i.l.bf16 %v6455_v5  ;;  %v1875_v1 = vsel %vm1865_vm5, %v1833_v38, %v3569_v27  ;;  %v1916_v47 = vsel %vm1907_vm6, %v1874_v50, %v3668_v24  ;;  %v3504_v45 = vunpack.i.h.bf16 %v4850_v3  ;;  %v2395_v24 = vld [vmem:[%s6267_s2 + $0x58] sm:$0xff] }
 0x17d   : > { %v5602_v61 = vpop.permute.xlu1 %3821  ;;  %v3503_v37 = vunpack.i.l.bf16 %v4850_v3  ;;  %v1917_v12 = vsel %vm1907_vm6, %v1875_v1, %v3669_v48  ;;  %v1958_v21 = vsel %vm1949_vm7, %v1916_v47, %v3803_v25  ;;  %v2078_v55 = vpack.c.bf16 %v2041_v31, %v2040_v52 }
 0x17e   : > { %v3817_v18 = vpop.permute.xlu0 %3816  ;;  %v1959_v56 = vsel %vm1949_vm7, %v1917_v12, %v3804_v29  ;;  %v3814_v39 = vunpack.i.h.bf16 %v3812_v6  ;;  %v3813_v63 = vunpack.i.l.bf16 %v3812_v6  ;;  %v5614_v34 = vsel %vm1823_vm4, %v5408_v8, %v3483_v35  ;;  %v2399_v12 = vld [vmem:[%s6267_s2 + $0x78] sm:$0xff] }
 0x17f   : > { %2467 = vperm.xlu1 %4046, %v2392_v20   ;;  %v3573_v7 = vunpack.i.l.bf16 %v5031_v54  ;;  %v2000_v57 = vsel %vm1991_vm8, %v1958_v21, %v3808_v41  ;;  %v2001_v3 = vsel %vm1991_vm8, %v1959_v56, %v3809_v4  ;;  %v5624_v59 = vsel %vm1823_vm4, %v5411_v46, %v3484_v17 }
 0x180   : > { %2472 = vperm.xlu0 %4045, %v2393_v22   ;;  %v1836_v49 = vsel %vm1823_vm4, %v5391_v9, %v3478_v42  ;;  %v3574_v8 = vunpack.i.h.bf16 %v5031_v54  ;;  %v3673_v38 = vunpack.i.l.bf16 %v5184_v40  ;;  %v1837_v6 = vsel %vm1823_vm4, %v5394_v11, %v3479_v32 }
 0x181   : > { %3116 = vmatmul.mubr.msk.bf16.gmra.mrb[12].mxu0 %vm2116_vm10, %v2078_v55  ;;  %v5631_v27 = vpop.permute.xlu1 %3831  ;;  %v1846_v46 = vsel %vm1823_vm4, %v5529_v26, %v3503_v37  ;;  %v1847_v9 = vsel %vm1823_vm4, %v5540_v15, %v3504_v45  ;;  %v3674_v54 = vunpack.i.h.bf16 %v5184_v40  ;;  %v3819_v23 = vunpack.i.h.bf16 %v3817_v18  ;;  %v2396_v15 = vld [vmem:[%s6267_s2 + $0x60] sm:$0xff] }
 0x182   : > { %v3827_v14 = vpop.permute.xlu0 %3826  ;;  %3119 = vmatprep.mubr.msk.bf16.mxu0 %vm4120_vm1, %v6449_v36  ;;  %v3818_v17 = vunpack.i.l.bf16 %v3817_v18  ;;  %v2042_v35 = vsel %vm2033_vm9, %v2000_v57, %v3813_v63  ;;  %v2043_v48 = vsel %vm2033_vm9, %v2001_v3, %v3814_v39  ;;  %v3508_v11 = vunpack.i.l.bf16 %v4882_v43  ;;  %v6456_v3 = vld [vmem:[#allocation7_spill] sm:$0xff] }
 0x183   : > { %2477 = vperm.xlu1 %4046, %v2394_v30   ;;  %v3579_v26 = vunpack.i.h.bf16 %v5029_v58  ;;  %v3578_v25 = vunpack.i.l.bf16 %v5029_v58  ;;  %v1876_v40 = vsel %vm1865_vm5, %v5554_v44, %v3573_v7  ;;  %v1877_v13 = vsel %vm1865_vm5, %v5564_v19, %v3574_v8  ;;  %v2397_v58 = vld [vmem:[%s6267_s2 + $0x68] sm:$0xff] }
 0x184   : > { %2482 = vperm.xlu0 %4045, %v2395_v24   ;;  %v3604_v50 = vunpack.i.h.bf16 %v5077_v10  ;;  %v3603_v29 = vunpack.i.l.bf16 %v5077_v10  ;;  %v1918_v16 = vsel %vm1907_vm6, %v1876_v40, %v3673_v38  ;;  %v1919_v44 = vsel %vm1907_vm6, %v1877_v13, %v3674_v54 }
 0x185   : > { %v5660_v62 = vpop.permute.xlu1 %3841  ;;  %v3824_v52 = vunpack.i.h.bf16 %v5602_v61  ;;  %v3823_v31 = vunpack.i.l.bf16 %v5602_v61  ;;  %v2079_v19 = vpack.c.bf16 %v2043_v48, %v2042_v35  ;;  %v1960_v41 = vsel %vm1949_vm7, %v1918_v16, %v3818_v17  ;;  %v2398_v61 = vld [vmem:[%s6267_s2 + $0x70] sm:$0xff]  ;;  %v2401_v17 = vld [vmem:[%s6267_s2 + $0x88] sm:$0xff] }
 0x186   : > { %v3837_v4 = vpop.permute.xlu0 %3836  ;;  %v1961_v10 = vsel %vm1949_vm7, %v1919_v44, %v3819_v23  ;;  %v3829_v20 = vunpack.i.h.bf16 %v3827_v14  ;;  %v3828_v5 = vunpack.i.l.bf16 %v3827_v14  ;;  %v3509_v32 = vunpack.i.h.bf16 %v4882_v43 }
 0x187   : > { %2487 = vperm.xlu1 %4046, %v2396_v15   ;;  %v5673_v42 = vsel %vm1823_vm4, %v5428_v33, %v3508_v11  ;;  %v1878_v1 = vsel %vm1865_vm5, %v1836_v49, %v3578_v25  ;;  %v1879_v47 = vsel %vm1865_vm5, %v1837_v6, %v3579_v26  ;;  %v3584_v22 = vunpack.i.h.bf16 %v5040_v51  ;;  %v6457_v49 = vld [vmem:[#allocation37_spill] sm:$0xff] }
 0x188   : > { %2492 = vperm.xlu0 %4045, %v2397_v58   ;;  %v3583_v45 = vunpack.i.l.bf16 %v5040_v51  ;;  %v3704_v37 = vunpack.i.h.bf16 %v5267_v60  ;;  %v3703_v43 = vunpack.i.l.bf16 %v5267_v60  ;;  %v1888_v21 = vsel %vm1865_vm5, %v1846_v46, %v3603_v29  ;;  %v2400_v6 = vld [vmem:[%s6267_s2 + $0x80] sm:$0xff] }
 0x189   : > { %3120 = vmatmul.mubr.msk.bf16.gmra.mrb[16].mxu0 %vm2116_vm10, %v2079_v19  ;;  %v5685_v33 = vpop.permute.xlu1 %3851  ;;  %v1889_v18 = vsel %vm1865_vm5, %v1847_v9, %v3604_v50  ;;  %v2002_v56 = vsel %vm1991_vm8, %v1960_v41, %v3823_v31  ;;  %v2003_v55 = vsel %vm1991_vm8, %v1961_v10, %v3824_v52  ;;  %v3839_v7 = vunpack.i.h.bf16 %v3837_v4  ;;  %v2403_v41 = vld [vmem:[%s6267_s2 + $0x98] sm:$0xff] }
 0x18a   : > { %v3847_v39 = vpop.permute.xlu0 %3846  ;;  %3123 = vmatprep.mubr.msk.bf16.mxu0 %vm4120_vm1, %v6449_v36  ;;  %v2044_v60 = vsel %vm2033_vm9, %v2002_v56, %v3828_v5  ;;  %v2045_v63 = vsel %vm2033_vm9, %v2003_v55, %v3829_v20  ;;  %v3838_v57 = vunpack.i.l.bf16 %v3837_v4  ;;  %v3683_v30 = vunpack.i.l.bf16 %v6456_v3  ;;  %v2405_v55 = vld [vmem:[%s6267_s2 + $0xa8] sm:$0xff] }
 0x18b   : > { %2497 = vperm.xlu1 %4046, %v2398_v61   ;;  %v3679_v8 = vunpack.i.h.bf16 %v6457_v49  ;;  %v3849_v38 = vunpack.i.h.bf16 %v3847_v39  ;;  %v3848_v24 = vunpack.i.l.bf16 %v3847_v39  ;;  %v3678_v46 = vunpack.i.l.bf16 %v6457_v49  ;;  %v6459_v39 = vld [vmem:[#allocation14_spill] sm:$0xff] }
 0x18c   : > { %2502 = vperm.xlu0 %4045, %v2399_v12   ;;  %v1930_v9 = vsel %vm1907_vm6, %v1888_v21, %v3703_v43  ;;  %v1931_v54 = vsel %vm1907_vm6, %v1889_v18, %v3704_v37  ;;  %v3834_v14 = vunpack.i.h.bf16 %v5631_v27  ;;  %v3833_v35 = vunpack.i.l.bf16 %v5631_v27 }
 0x18d   : > { %v5707_v23 = vpop.permute.xlu1 %3861  ;;  %v2080_v48 = vpack.c.bf16 %v2045_v63, %v2044_v60  ;;  %v3844_v11 = vunpack.i.h.bf16 %v5660_v62  ;;  %v3843_v26 = vunpack.i.l.bf16 %v5660_v62  ;;  %v1972_v40 = vsel %vm1949_vm7, %v1930_v9, %v3838_v57  ;;  %v2402_v62 = vld [vmem:[%s6267_s2 + $0x90] sm:$0xff] }
 0x18e   : > { %v3857_v25 = vpop.permute.xlu0 %3856  ;;  %v1973_v15 = vsel %vm1949_vm7, %v1931_v54, %v3839_v7  ;;  %v3854_v29 = vunpack.i.h.bf16 %v5685_v33  ;;  %v3853_v16 = vunpack.i.l.bf16 %v5685_v33  ;;  %v2014_v58 = vsel %vm1991_vm8, %v1972_v40, %v3848_v24  ;;  %v2406_v54 = vld [vmem:[%s6267_s2 + $0xb0] sm:$0xff] }
 0x18f   : > { %v3859_v13 = vunpack.i.h.bf16 %v3857_v25  ;;  %v3858_v50 = vunpack.i.l.bf16 %v3857_v25  ;;  %2507 = vperm.xlu1 %4046, %v2400_v6   ;;  %v2015_v27 = vsel %vm1991_vm8, %v1973_v15, %v3849_v38  ;;  %v1920_v44 = vsel %vm1907_vm6, %v1878_v1, %v3678_v46 }
 0x190   : > { %2512 = vperm.xlu0 %4045, %v2401_v17   ;;  %v1921_v52 = vsel %vm1907_vm6, %v1879_v47, %v3679_v8  ;;  %v1849_v10 = vsel %vm1823_vm4, %v5482_v0, %v3509_v32  ;;  %v1962_v20 = vsel %vm1949_vm7, %v1920_v44, %v3833_v35  ;;  %v1880_v61 = vsel %vm1865_vm5, %v5614_v34, %v3583_v45  ;;  %v6458_v32 = vld [vmem:[#allocation9_spill] sm:$0xff] }
 0x191   : > { %v2056_v31 = vsel %vm2033_vm9, %v2014_v58, %v3858_v50  ;;  %v2057_v4 = vsel %vm2033_vm9, %v2015_v27, %v3859_v13  ;;  %3124 = vmatmul.mubr.msk.bf16.gmra.mrb[20].mxu0 %vm2116_vm10, %v2080_v48  ;;  %v3872_v19 = vpop.permute.xlu1 %3871  ;;  %v1963_v5 = vsel %vm1949_vm7, %v1921_v52, %v3834_v14  ;;  %v3684_v37 = vunpack.i.h.bf16 %v6456_v3  ;;  %v2404_v34 = vld [vmem:[%s6267_s2 + $0xa0] sm:$0xff] }
 0x192   : > { %v2086_v1 = vpack.c.bf16 %v2057_v4, %v2056_v31  ;;  %v3867_v47 = vpop.permute.xlu0 %3866  ;;  %3127 = vmatprep.mubr.msk.bf16.mxu0 %vm4120_vm1, %v6449_v36  ;;  %v2004_v43 = vsel %vm1991_vm8, %v1962_v20, %v3843_v26  ;;  %v2005_v33 = vsel %vm1991_vm8, %v1963_v5, %v3844_v11  ;;  %v1881_v0 = vsel %vm1865_vm5, %v5624_v59, %v3584_v22  ;;  %v2407_v11 = vld [vmem:[%s6267_s2 + $0xb8] sm:$0xff]  ;;  %v2408_v52 = vld [vmem:[%s6267_s2 + $0xc0] sm:$0xff]  ;;  %v2409_v5 = vld [vmem:[%s6267_s2 + $0xc8] sm:$0xff] }
 0x193   : > { %2517 = vperm.xlu1 %4046, %v2402_v62   ;;  %v3609_v12 = vunpack.i.h.bf16 %v6458_v32  ;;  %v2046_v21 = vsel %vm2033_vm9, %v2004_v43, %v3853_v16  ;;  %v2047_v18 = vsel %vm2033_vm9, %v2005_v33, %v3854_v29  ;;  %v3608_v45 = vunpack.i.l.bf16 %v6458_v32  ;;  %v6460_v31 = vld [vmem:[#allocation11_spill] sm:$0xff] }
 0x194   : > { %3148 = vmatmul.mubr.msk.bf16.vlgmr.msra.gmra.mrb[0].mxu1 %vm2116_vm10, %v2086_v1  ;;  %2522 = vperm.xlu0 %4045, %v2403_v41   ;;  %v1922_v51 = vsel %vm1907_vm6, %v1880_v61, %v3683_v30  ;;  %v3864_v56 = vunpack.i.h.bf16 %v5707_v23  ;;  %v3863_v59 = vunpack.i.l.bf16 %v5707_v23  ;;  %v3709_v60 = vunpack.i.h.bf16 %v6459_v39  ;;  %v2410_v32 = vld [vmem:[%s6267_s2 + $0xd0] sm:$0xff] }
 0x195   : > { %v3882_v22 = vpop.permute.xlu1 %3881  ;;  %3151 = vmatprep.mubr.msk.bf16.mxu1 %vm4120_vm1, %v6449_v36  ;;  %v3708_v63 = vunpack.i.l.bf16 %v6459_v39  ;;  %v3874_v7 = vunpack.i.h.bf16 %v3872_v19  ;;  %v3873_v57 = vunpack.i.l.bf16 %v3872_v19  ;;  %v1923_v30 = vsel %vm1907_vm6, %v1881_v0, %v3684_v37 }
 0x196   : > { %v3877_v3 = vpop.permute.xlu0 %3876  ;;  %v2081_v49 = vpack.c.bf16 %v2047_v18, %v2046_v21  ;;  %v3869_v8 = vunpack.i.h.bf16 %v3867_v47  ;;  %v3868_v38 = vunpack.i.l.bf16 %v3867_v47  ;;  %v3884_v24 = vunpack.i.h.bf16 %v3882_v22  ;;  %v6462_v18 = vld [vmem:[#allocation35_spill] sm:$0xff] }
 0x197   : > { %2527 = vperm.xlu1 %4046, %v2404_v34   ;;  %v3883_v6 = vunpack.i.l.bf16 %v3882_v22  ;;  %v3879_v46 = vunpack.i.h.bf16 %v3877_v3  ;;  %v3878_v9 = vunpack.i.l.bf16 %v3877_v3  ;;  %v1890_v14 = vsel %vm1865_vm5, %v5673_v42, %v3608_v45  ;;  %v6463_v45 = vld [vmem:[#allocation13_spill] sm:$0xff]  ;;  %v2411_v22 = vld [vmem:[%s6267_s2 + $0xd8] sm:$0xff] }
 0x198   : > { %2532 = vperm.xlu0 %4045, %v2405_v55   ;;  %v1891_v23 = vsel %vm1865_vm5, %v1849_v10, %v3609_v12  ;;  %v1964_v17 = vsel %vm1949_vm7, %v1922_v51, %v3863_v59  ;;  %v1965_v35 = vsel %vm1949_vm7, %v1923_v30, %v3864_v56  ;;  %v1932_v26 = vsel %vm1907_vm6, %v1890_v14, %v3708_v63  ;;  %v6461_v12 = vld [vmem:[#allocation21_spill] sm:$0xff] }
 0x199   : > { %3128 = vmatmul.mubr.msk.bf16.gmra.mrb[24].mxu0 %vm2116_vm10, %v2081_v49  ;;  %v3892_v48 = vpop.permute.xlu1 %3891  ;;  %v1933_v25 = vsel %vm1907_vm6, %v1891_v23, %v3709_v60  ;;  %v2006_v40 = vsel %vm1991_vm8, %v1964_v17, %v3873_v57  ;;  %v2007_v42 = vsel %vm1991_vm8, %v1965_v35, %v3874_v7  ;;  %v1974_v13 = vsel %vm1949_vm7, %v1932_v26, %v3868_v38  ;;  %v2413_v14 = vld [vmem:[%s6267_s2 + $0xe8] sm:$0xff] }
 0x19a   : > { %v3887_v15 = vpop.permute.xlu0 %3886  ;;  %3131 = vmatprep.mubr.msk.bf16.mxu0 %vm4120_vm1, %v6449_v36  ;;  %v1975_v50 = vsel %vm1949_vm7, %v1933_v25, %v3869_v8  ;;  %v2048_v58 = vsel %vm2033_vm9, %v2006_v40, %v3883_v6  ;;  %v2049_v27 = vsel %vm2033_vm9, %v2007_v42, %v3884_v24  ;;  %v2016_v62 = vsel %vm1991_vm8, %v1974_v13, %v3878_v9  ;;  %v6464_v23 = vld [vmem:[#allocation34_spill] sm:$0xff]  ;;  %v6465_v35 = vld [vmem:[#allocation49_spill] sm:$0xff] }
 0x19b   : > { %v3889_v29 = vunpack.i.h.bf16 %v3887_v15  ;;  %v3888_v16 = vunpack.i.l.bf16 %v3887_v15  ;;  %2537 = vperm.xlu1 %4046, %v2406_v54   ;;  %v2017_v44 = vsel %vm1991_vm8, %v1975_v50, %v3879_v46  ;;  %v3689_v4 = vunpack.i.h.bf16 %v6460_v31  ;;  %v2412_v46 = vld [vmem:[%s6267_s2 + $0xe0] sm:$0xff]  ;;  %v2414_v50 = vld [vmem:[%s6267_s2 + $0xf0] sm:$0xff] }
 0x19c   : > { %2542 = vperm.xlu0 %4045, %v2407_v11   ;;  %v3688_v19 = vunpack.i.l.bf16 %v6460_v31  ;;  %v3894_v1 = vunpack.i.h.bf16 %v3892_v48  ;;  %v3893_v47 = vunpack.i.l.bf16 %v3892_v48  ;;  %v2082_v43 = vpack.c.bf16 %v2049_v27, %v2048_v58 }
 0x19d   : > { %v2058_v41 = vsel %vm2033_vm9, %v2016_v62, %v3888_v16  ;;  %v2059_v10 = vsel %vm2033_vm9, %v2017_v44, %v3889_v29  ;;  %v3902_v20 = vpop.permute.xlu1 %3901  ;;  %v1925_v34 = vsel %vm1907_vm6, %v6462_v18, %v3689_v4  ;;  %v3714_v51 = vunpack.i.h.bf16 %v6463_v45  ;;  %v6466_v29 = vld [vmem:[#allocation10_spill] sm:$0xff] }
 0x19e   : > { %v2087_v61 = vpack.c.bf16 %v2059_v10, %v2058_v41  ;;  %v3897_v37 = vpop.permute.xlu0 %3896  ;;  %v3904_v33 = vunpack.i.h.bf16 %v3902_v20  ;;  %v3903_v0 = vunpack.i.l.bf16 %v3902_v20  ;;  %v1924_v21 = vsel %vm1907_vm6, %v6461_v12, %v3688_v19  ;;  %v2417_v12 = vld [vmem:[%s6267_s2 + $0x108] sm:$0xff] }
 0x19f   : > { %2547 = vperm.xlu1 %4046, %v2408_v52   ;;  %v3713_v56 = vunpack.i.l.bf16 %v6463_v45  ;;  %v1966_v55 = vsel %vm1949_vm7, %v1924_v21, %v3893_v47  ;;  %v1967_v39 = vsel %vm1949_vm7, %v1925_v34, %v3894_v1  ;;  %v3899_v30 = vunpack.i.h.bf16 %v3897_v37  ;;  %v2415_v52 = vld [vmem:[%s6267_s2 + $0xf8] sm:$0xff] }
 0x1a0   : > { %3152 = vmatmul.mubr.msk.bf16.gmra.mrb[4].mxu1 %vm2116_vm10, %v2087_v61  ;;  %2552 = vperm.xlu0 %4045, %v2409_v5   ;;  %v2008_v57 = vsel %vm1991_vm8, %v1966_v55, %v3903_v0  ;;  %v2009_v3 = vsel %vm1991_vm8, %v1967_v39, %v3904_v33  ;;  %v3898_v49 = vunpack.i.l.bf16 %v3897_v37  ;;  %v1935_v48 = vsel %vm1907_vm6, %v6465_v35, %v3714_v51  ;;  %v2416_v5 = vld [vmem:[%s6267_s2 + $0x100] sm:$0xff]  ;;  %v6468_v61 = vld [vmem:[#allocation6_spill] sm:$0xff] }
 0x1a1   : > { %3132 = vmatmul.mubr.msk.bf16.gmra.mrb[28].mxu0 %vm2116_vm10, %v2082_v43  ;;  %v3912_v59 = vpop.permute.xlu1 %3911  ;;  %3155 = vmatprep.mubr.msk.bf16.mxu1 %vm4120_vm1, %v6449_v36  ;;  %v1934_v17 = vsel %vm1907_vm6, %v6464_v23, %v3713_v56  ;;  %v1977_v25 = vsel %vm1949_vm7, %v1935_v48, %v3899_v30  ;;  %v3694_v16 = vunpack.i.h.bf16 %v6466_v29  ;;  %v3693_v58 = vunpack.i.l.bf16 %v6466_v29  ;;  %v6467_v1 = vld [vmem:[#allocation32_spill] sm:$0xff]  ;;  %v6469_v43 = vld [vmem:[#allocation15_spill] sm:$0xff] }
 0x1a2   : > { %v3914_v60 = vunpack.i.h.bf16 %v3912_v59  ;;  %v3913_v63 = vunpack.i.l.bf16 %v3912_v59  ;;  %v3907_v7 = vpop.permute.xlu0 %3906  ;;  %3135 = vmatprep.mubr.msk.bf16.mxu0 %vm4120_vm1, %v6449_v36  ;;  %v1976_v26 = vsel %vm1949_vm7, %v1934_v17, %v3898_v49  ;;  %v3719_v33 = vunpack.i.h.bf16 %v6469_v43  ;;  %v2419_v49 = vld [vmem:[%s6267_s2 + $0x118] sm:$0xff]  ;;  %v2420_v48 = vld [vmem:[%s6267_s2 + $0x120] sm:$0xff] }
 0x1a3   : > { %2557 = vperm.xlu1 %4046, %v2410_v32   ;;  %v3909_v24 = vunpack.i.h.bf16 %v3907_v7  ;;  %v3908_v6 = vunpack.i.l.bf16 %v3907_v7  ;;  %v1926_v47 = vsel %vm1907_vm6, %v6467_v1, %v3693_v58  ;;  %v1927_v37 = vsel %vm1907_vm6, %v6468_v61, %v3694_v16  ;;  %v2423_v1 = vld [vmem:[%s6267_s2 + $0x138] sm:$0xff] }
 0x1a4   : > { %v2050_v8 = vsel %vm2033_vm9, %v2008_v57, %v3913_v63  ;;  %v2051_v38 = vsel %vm2033_vm9, %v2009_v3, %v3914_v60  ;;  %2562 = vperm.xlu0 %4045, %v2411_v22   ;;  %v3718_v0 = vunpack.i.l.bf16 %v6469_v43  ;;  %v2418_v57 = vld [vmem:[%s6267_s2 + $0x110] sm:$0xff] }
 0x1a5   : > { %v2083_v9 = vpack.c.bf16 %v2051_v38, %v2050_v8  ;;  %v3922_v54 = vpop.permute.xlu1 %3921  ;;  %v2018_v15 = vsel %vm1991_vm8, %v1976_v26, %v3908_v6  ;;  %v2019_v13 = vsel %vm1991_vm8, %v1977_v25, %v3909_v24  ;;  %v6470_v8 = vld [vmem:[#allocation5_spill] sm:$0xff]  ;;  %v6471_v24 = vld [vmem:[#allocation48_spill] sm:$0xff] }
 0x1a6   : > { %v3917_v11 = vpop.permute.xlu0 %3916  ;;  %v3924_v31 = vunpack.i.h.bf16 %v3922_v54  ;;  %v3923_v4 = vunpack.i.l.bf16 %v3922_v54  ;;  %v1936_v38 = vsel %vm1907_vm6, %v6470_v8, %v3718_v0  ;;  %v1937_v6 = vsel %vm1907_vm6, %v6471_v24, %v3719_v33 }
 0x1a7   : > { %v3919_v40 = vunpack.i.h.bf16 %v3917_v11  ;;  %v3918_v42 = vunpack.i.l.bf16 %v3917_v11  ;;  %2567 = vperm.xlu1 %4046, %v2412_v46   ;;  %v6472_v11 = vld [vmem:[#allocation12_spill] sm:$0xff] }
 0x1a8   : > { %2572 = vperm.xlu0 %4045, %v2413_v14   ;;  %v1968_v21 = vsel %vm1949_vm7, %v1926_v47, %v3923_v4  ;;  %v1969_v18 = vsel %vm1949_vm7, %v1927_v37, %v3924_v31  ;;  %v3699_v26 = vunpack.i.h.bf16 %v6472_v11  ;;  %v3698_v25 = vunpack.i.l.bf16 %v6472_v11  ;;  %v6474_v4 = vld [vmem:[#allocation45_spill] sm:$0xff]  ;;  %v6478_v11 = vld [vmem:[#allocation50_spill] sm:$0xff] }
 0x1a9   : > { %v2060_v27 = vsel %vm2033_vm9, %v2018_v15, %v3918_v42  ;;  %v2061_v62 = vsel %vm2033_vm9, %v2019_v13, %v3919_v40  ;;  %3136 = vmatmul.mubr.msk.bf16.gmra.mrb[32].mxu0 %vm2116_vm10, %v2083_v9  ;;  %v3932_v44 = vpop.permute.xlu1 %3931  ;;  %v2421_v13 = vld [vmem:[%s6267_s2 + $0x128] sm:$0xff] }
 0x1aa   : > { %v2088_v19 = vpack.c.bf16 %v2061_v62, %v2060_v27  ;;  %v3927_v41 = vpop.permute.xlu0 %3926  ;;  %3139 = vmatprep.mubr.msk.bf16.mxu0 %vm4120_vm1, %v6449_v36  ;;  %v3934_v10 = vunpack.i.h.bf16 %v3932_v44  ;;  %v3933_v20 = vunpack.i.l.bf16 %v3932_v44  ;;  %v2422_v44 = vld [vmem:[%s6267_s2 + $0x130] sm:$0xff] }
 0x1ab   : > { %2577 = vperm.xlu1 %4046, %v2414_v50   ;;  %v3929_v22 = vunpack.i.h.bf16 %v3927_v41  ;;  %v3928_v55 = vunpack.i.l.bf16 %v3927_v41  ;;  %v6475_v41 = vld [vmem:[#allocation36_spill] sm:$0xff] }
 0x1ac   : > { %3156 = vmatmul.mubr.msk.bf16.gmra.mrb[8].mxu1 %vm2116_vm10, %v2088_v19  ;;  %2582 = vperm.xlu0 %4045, %v2415_v52   ;;  %v2010_v56 = vsel %vm1991_vm8, %v1968_v21, %v3933_v20  ;;  %v2011_v59 = vsel %vm1991_vm8, %v1969_v18, %v3934_v10  ;;  %v6473_v52 = vld [vmem:[#allocation29_spill] sm:$0xff]  ;;  %v1929_v19 = vsel %vm1907_vm6, %v6474_v4, %v3699_v26  ;;  %v3724_v10 = vunpack.i.h.bf16 %v6475_v41 }
 0x1ad   : > { %v3942_v32 = vpop.permute.xlu1 %3941  ;;  %3159 = vmatprep.mubr.msk.bf16.mxu1 %vm4120_vm1, %v6449_v36  ;;  %v1978_v9 = vsel %vm1949_vm7, %v1936_v38, %v3928_v55  ;;  %v1979_v54 = vsel %vm1949_vm7, %v1937_v6, %v3929_v22  ;;  %v1928_v31 = vsel %vm1907_vm6, %v6473_v52, %v3698_v25  ;;  %v3723_v20 = vunpack.i.l.bf16 %v6475_v41  ;;  %v6476_v55 = vld [vmem:[#allocation52_spill] sm:$0xff]  ;;  %v6479_v25 = vld [vmem:[#allocation51_spill] sm:$0xff] }
 0x1ae   : > { %v3944_v34 = vunpack.i.h.bf16 %v3942_v32  ;;  %v3943_v45 = vunpack.i.l.bf16 %v3942_v32  ;;  %v3937_v51 = vpop.permute.xlu0 %3936  ;;  %v6480_v41 = vld [vmem:[#allocation55_spill] sm:$0xff] }
 0x1af   : > { %2587 = vperm.xlu1 %4046, %v2416_v5   ;;  %v3939_v63 = vunpack.i.h.bf16 %v3937_v51  ;;  %v3938_v7 = vunpack.i.l.bf16 %v3937_v51 }
 0x1b0   : > { %v2052_v39 = vsel %vm2033_vm9, %v2010_v56, %v3943_v45  ;;  %v2053_v60 = vsel %vm2033_vm9, %v2011_v59, %v3944_v34  ;;  %2592 = vperm.xlu0 %4045, %v2417_v12   ;;  %v2424_v56 = vld [vmem:[%s6267_s2 + $0x140] sm:$0xf] }
 0x1b1   : > { %v2084_v3 = vpack.c.bf16 %v2053_v60, %v2052_v39  ;;  %v3952_v30 = vpop.permute.xlu1 %3951  ;;  %v2020_v17 = vsel %vm1991_vm8, %v1978_v9, %v3938_v7  ;;  %v2021_v35 = vsel %vm1991_vm8, %v1979_v54, %v3939_v63  ;;  %v1938_v39 = vsel %vm1907_vm6, %v6476_v55, %v3723_v20  ;;  %v6477_v60 = vld [vmem:[#allocation53_spill] sm:$0xff]  ;;  %v6481_v20 = vld [vmem:[#allocation56_spill] sm:$0xff] }
 0x1b2   : > { %v3947_v46 = vpop.permute.xlu0 %3946  ;;  %v3954_v50 = vunpack.i.h.bf16 %v3952_v30  ;;  %v3953_v29 = vunpack.i.l.bf16 %v3952_v30  ;;  %v1939_v63 = vsel %vm1907_vm6, %v6477_v60, %v3724_v10  ;;  %v3729_v7 = vunpack.i.h.bf16 %v5401_v28 }
 0x1b3   : > { %v3949_v14 = vunpack.i.h.bf16 %v3947_v46  ;;  %v3948_v23 = vunpack.i.l.bf16 %v3947_v46  ;;  %3140 = vmatmul.mubr.msk.bf16.gmra.mrb[36].mxu0 %vm2116_vm10, %v2084_v3  ;;  %2597 = vperm.xlu1 %4046, %v2418_v57   ;;  %v3728_v57 = vunpack.i.l.bf16 %v5401_v28 }
 0x1b4   : > { %3143 = vmatprep.mubr.msk.bf16.mxu0 %vm4120_vm1, %v6449_v36  ;;  %2602 = vperm.xlu0 %4045, %v2419_v49   ;;  %v1970_v47 = vsel %vm1949_vm7, %v1928_v31, %v3953_v29  ;;  %v1971_v61 = vsel %vm1949_vm7, %v1929_v19, %v3954_v50  ;;  %v3733_v50 = vunpack.i.l.bf16 %v5388_v53 }
 0x1b5   : > { %v2062_v40 = vsel %vm2033_vm9, %v2020_v17, %v3948_v23  ;;  %v2063_v42 = vsel %vm2033_vm9, %v2021_v35, %v3949_v14  ;;  %v3962_v15 = vpop.permute.xlu1 %3961  ;;  %v1940_v26 = vsel %vm1907_vm6, %v6478_v11, %v3728_v57  ;;  %v6483_v57 = vld [vmem:[#allocation54_spill] sm:$0xff]  ;;  %v6484_v11 = vld [vmem:[#allocation33_spill] sm:$0xff] }
 0x1b6   : > { %v2089_v16 = vpack.c.bf16 %v2063_v42, %v2062_v40  ;;  %v3957_v58 = vpop.permute.xlu0 %3956  ;;  %v3964_v27 = vunpack.i.h.bf16 %v3962_v15  ;;  %v3963_v62 = vunpack.i.l.bf16 %v3962_v15  ;;  %v1941_v40 = vsel %vm1907_vm6, %v6479_v25, %v3729_v7  ;;  %v6485_v25 = vld [vmem:[#allocation58_spill] sm:$0xff] }
 0x1b7   : > { %2607 = vperm.xlu1 %4046, %v2420_v48   ;;  %v3959_v12 = vunpack.i.h.bf16 %v3957_v58  ;;  %v3958_v21 = vunpack.i.l.bf16 %v3957_v58  ;;  %v1942_v10 = vsel %vm1907_vm6, %v6480_v41, %v3733_v50  ;;  %v6486_v41 = vld [vmem:[#allocation57_spill] sm:$0xff] }
 0x1b8   : > { %3160 = vmatmul.mubr.msk.bf16.gmra.mrb[12].mxu1 %vm2116_vm10, %v2089_v16  ;;  %2612 = vperm.xlu0 %4045, %v2421_v13   ;;  %v2012_v0 = vsel %vm1991_vm8, %v1970_v47, %v3963_v62  ;;  %v2013_v32 = vsel %vm1991_vm8, %v1971_v61, %v3964_v27  ;;  %v3734_v13 = vunpack.i.h.bf16 %v5388_v53 }
 0x1b9   : > { %v3972_v5 = vpop.permute.xlu1 %3971  ;;  %3163 = vmatprep.mubr.msk.bf16.mxu1 %vm4120_vm1, %v6449_v36  ;;  %v1980_v30 = vsel %vm1949_vm7, %v1938_v39, %v3958_v21  ;;  %v1981_v49 = vsel %vm1949_vm7, %v1939_v63, %v3959_v12  ;;  %v6482_v63 = vld [vmem:[#allocation8_spill] sm:$0xff] }
 0x1ba   : > { %v3974_v37 = vunpack.i.h.bf16 %v3972_v5  ;;  %v3973_v43 = vunpack.i.l.bf16 %v3972_v5  ;;  %v3967_v33 = vpop.permute.xlu0 %3966  ;;  %v1943_v5 = vsel %vm1907_vm6, %v6481_v20, %v3734_v13 }
 0x1bb   : > { %2617 = vperm.xlu1 %4046, %v2422_v44   ;;  %v3969_v45 = vunpack.i.h.bf16 %v3967_v33  ;;  %v3968_v51 = vunpack.i.l.bf16 %v3967_v33 }
 0x1bc   : > { %v2054_v18 = vsel %vm2033_vm9, %v2012_v0, %v3973_v43  ;;  %v2055_v34 = vsel %vm2033_vm9, %v2013_v32, %v3974_v37  ;;  %2622 = vperm.xlu0 %4045, %v2423_v1   ;;  %v3739_v0 = vunpack.i.h.bf16 %v5430_v2  ;;  %v3738_v32 = vunpack.i.l.bf16 %v5430_v2 }
 0x1bd   : > { %v2085_v59 = vpack.c.bf16 %v2055_v34, %v2054_v18  ;;  %v3982_v22 = vpop.permute.xlu1 %3981  ;;  %v2022_v24 = vsel %vm1991_vm8, %v1980_v30, %v3968_v51  ;;  %v2023_v6 = vsel %vm1991_vm8, %v1981_v49, %v3969_v45 }
 0x1be   : > { %v3977_v3 = vpop.permute.xlu0 %3976  ;;  %v3984_v46 = vunpack.i.h.bf16 %v3982_v22  ;;  %v3983_v9 = vunpack.i.l.bf16 %v3982_v22  ;;  %v1944_v7 = vsel %vm1907_vm6, %v6482_v63, %v3738_v32 }
 0x1bf   : > { %v3979_v8 = vunpack.i.h.bf16 %v3977_v3  ;;  %v3978_v38 = vunpack.i.l.bf16 %v3977_v3  ;;  %3144 = vmatmul.mubr.msk.bf16.gmra.mrb[40].mxu0 %vm2116_vm10, %v2085_v59  ;;  %2627 = vperm.xlu1 %4046, %v2424_v56   ;;  %v1945_v3 = vsel %vm1907_vm6, %v6483_v57, %v3739_v0 }
 0x1c0   : > { %v1982_v29 = vsel %vm1949_vm7, %v1940_v26, %v3983_v9  ;;  %v1983_v16 = vsel %vm1949_vm7, %v1941_v40, %v3984_v46 }
 0x1c1   : > { %v2064_v54 = vsel %vm2033_vm9, %v2022_v24, %v3978_v38  ;;  %v2065_v28 = vsel %vm2033_vm9, %v2023_v6, %v3979_v8  ;;  %v3992_v14 = vpop.permute.xlu1 %3991 }
 0x1c2   : > { %v2090_v23 = vpack.c.bf16 %v2065_v28, %v2064_v54  ;;  %v3994_v17 = vunpack.i.h.bf16 %v3992_v14  ;;  %v3993_v35 = vunpack.i.l.bf16 %v3992_v14  ;;  %v3987_v48 = vpop.permute.xlu0 %3986 }
 0x1c3   : > { %v3989_v42 = vunpack.i.h.bf16 %v3987_v48  ;;  %v3988_v15 = vunpack.i.l.bf16 %v3987_v48 }
 0x1c4   : > { %3164 = vmatmul.mubr.msk.bf16.gmra.mrb[16].mxu1 %vm2116_vm10, %v2090_v23 }
 0x1c5   : > { %v2024_v58 = vsel %vm1991_vm8, %v1982_v29, %v3988_v15  ;;  %v2025_v27 = vsel %vm1991_vm8, %v1983_v16, %v3989_v42  ;;  %v4002_v62 = vpop.permute.xlu1 %4001  ;;  %3167 = vmatprep.mubr.msk.bf16.mxu1 %vm4120_vm1, %v6449_v36 }
 0x1c6   : > { %v3997_v44 = vpop.permute.xlu0 %3996  ;;  %v2066_v52 = vsel %vm2033_vm9, %v2024_v58, %v3993_v35  ;;  %v2067_v31 = vsel %vm2033_vm9, %v2025_v27, %v3994_v17  ;;  %v4004_v1 = vunpack.i.h.bf16 %v4002_v62  ;;  %v4003_v47 = vunpack.i.l.bf16 %v4002_v62 }
 0x1c7   : > { %v3999_v53 = vunpack.i.h.bf16 %v3997_v44  ;;  %v3998_v4 = vunpack.i.l.bf16 %v3997_v44  ;;  %v2091_v19 = vpack.c.bf16 %v2067_v31, %v2066_v52 }
 0x1c9   : > { %v1984_v61 = vsel %vm1949_vm7, %v1942_v10, %v3998_v4  ;;  %v1985_v37 = vsel %vm1949_vm7, %v1943_v5, %v3999_v53  ;;  %v4012_v43 = vpop.permute.xlu1 %4011 }
 0x1ca   : > { %v4007_v33 = vpop.permute.xlu0 %4006  ;;  %v4014_v18 = vunpack.i.h.bf16 %v4012_v43  ;;  %v4013_v34 = vunpack.i.l.bf16 %v4012_v43  ;;  %v2026_v45 = vsel %vm1991_vm8, %v1984_v61, %v4003_v47  ;;  %v2027_v51 = vsel %vm1991_vm8, %v1985_v37, %v4004_v1 }
 0x1cb   : > { %v4009_v12 = vunpack.i.h.bf16 %v4007_v33  ;;  %v4008_v21 = vunpack.i.l.bf16 %v4007_v33 }
 0x1cc   : > { %3168 = vmatmul.mubr.msk.bf16.gmra.mrb[20].mxu1 %vm2116_vm10, %v2091_v19  ;;  %v1986_v8 = vsel %vm1949_vm7, %v1944_v7, %v4013_v34  ;;  %v1987_v38 = vsel %vm1949_vm7, %v1945_v3, %v4014_v18 }
 0x1cd   : > { %v2068_v56 = vsel %vm2033_vm9, %v2026_v45, %v4008_v21  ;;  %v2069_v59 = vsel %vm2033_vm9, %v2027_v51, %v4009_v12  ;;  %v4022_v22 = vpop.permute.xlu1 %4021  ;;  %3171 = vmatprep.mubr.msk.bf16.mxu1 %vm4120_vm1, %v6449_v36 }
 0x1ce   : > { %v2092_v55 = vpack.c.bf16 %v2069_v59, %v2068_v56  ;;  %v4017_v2 = vpop.permute.xlu0 %4016  ;;  %v4024_v39 = vunpack.i.h.bf16 %v4022_v22  ;;  %v4023_v60 = vunpack.i.l.bf16 %v4022_v22 }
 0x1cf   : > { %v4019_v30 = vunpack.i.h.bf16 %v4017_v2  ;;  %v4018_v49 = vunpack.i.l.bf16 %v4017_v2 }
 0x1d1   : > { %v2028_v24 = vsel %vm1991_vm8, %v1986_v8, %v4018_v49  ;;  %v2029_v6 = vsel %vm1991_vm8, %v1987_v38, %v4019_v30  ;;  %v4032_v46 = vpop.permute.xlu1 %4031 }
 0x1d2   : > { %v2070_v9 = vsel %vm2033_vm9, %v2028_v24, %v4023_v60  ;;  %v2071_v54 = vsel %vm2033_vm9, %v2029_v6, %v4024_v39  ;;  %v4027_v28 = vpop.permute.xlu0 %4026  ;;  %v4034_v35 = vunpack.i.h.bf16 %v4032_v46  ;;  %v4033_v48 = vunpack.i.l.bf16 %v4032_v46 }
 0x1d3   : > { %v2093_v14 = vpack.c.bf16 %v2071_v54, %v2070_v9  ;;  %v4029_v23 = vunpack.i.h.bf16 %v4027_v28  ;;  %v4028_v17 = vunpack.i.l.bf16 %v4027_v28 }
 0x1d4   : > { %3172 = vmatmul.mubr.msk.bf16.gmra.mrb[24].mxu1 %vm2116_vm10, %v2092_v55 }
 0x1d5   : > { %v1946_v26 = vsel %vm1907_vm6, %v6484_v11, %v4028_v17  ;;  %v1947_v40 = vsel %vm1907_vm6, %v6485_v25, %v4029_v23  ;;  %v4042_v42 = vpop.permute.xlu1 %4041  ;;  %3175 = vmatprep.mubr.msk.bf16.mxu1 %vm4120_vm1, %v6449_v36 }
 0x1d6   : > { %v4037_v15 = vpop.permute.xlu0 %4036  ;;  %v4044_v13 = vunpack.i.h.bf16 %v4042_v42  ;;  %v4043_v50 = vunpack.i.l.bf16 %v4042_v42  ;;  %v1988_v58 = vsel %vm1949_vm7, %v1946_v26, %v4033_v48  ;;  %v1989_v27 = vsel %vm1949_vm7, %v1947_v40, %v4034_v35 }
 0x1d7   : > { %v4039_v29 = vunpack.i.h.bf16 %v4037_v15  ;;  %v4038_v16 = vunpack.i.l.bf16 %v4037_v15 }
 0x1d9   : > { %v2030_v62 = vsel %vm1991_vm8, %v1988_v58, %v4038_v16  ;;  %v2031_v44 = vsel %vm1991_vm8, %v1989_v27, %v4039_v29  ;;  %v1369_v19 = vpop.permute.xlu1 %1368 }
 0x1da   : > { %v2072_v52 = vsel %vm2033_vm9, %v2030_v62, %v4043_v50  ;;  %v2073_v31 = vsel %vm2033_vm9, %v2031_v44, %v4044_v13  ;;  %v1243_v4 = vpop.permute.xlu0 %1242 }
 0x1db   : > { %v2094_v53 = vpack.c.bf16 %v2073_v31, %v2072_v52  ;;  %v1948_v10 = vsel %vm1907_vm6, %v6486_v41, %v1243_v4 }
 0x1dc   : > { %3176 = vmatmul.mubr.msk.bf16.gmra.mrb[28].mxu1 %vm2116_vm10, %v2093_v14  ;;  %v1990_v5 = vsel %vm1949_vm7, %v1948_v10, %v1369_v19 }
 0x1dd   : > { %3179 = vmatprep.mubr.msk.bf16.mxu1 %vm4120_vm1, %v6449_v36  ;;  %v1697_v47 = vpop.permute.xlu1 %1696 }
 0x1de   : > { %v1533_v20 = vpop.permute.xlu0 %1532 }
 0x1df   : > { %v2032_v1 = vsel %vm1991_vm8, %v1990_v5, %v1533_v20 }
 0x1e0   : > { %v2074_v61 = vsel %vm2033_vm9, %v2032_v1, %v1697_v47 }
 0x1e1   : > { %v2095_v37 = vpack.c.bf16 %v2074_v61, %v2074_v61 }
 0x1e4   : > { %3180 = vmatmul.mubr.msk.bf16.gmra.mrb[32].mxu1 %vm2116_vm10, %v2094_v53 }
 0x1e5   : > { %3183 = vmatprep.mubr.msk.bf16.mxu1 %vm4120_vm1, %v6449_v36 }
 0x1ec   : > { %3184 = vmatmul.mubr.msk.bf16.gmra.mrb[36].mxu1 %vm2116_vm10, %v2095_v37 }
 0x1ee   : > { %v2433_v36 = vpop.permute.xlu1 %2432 }
 0x1ef   : > { %v2428_v43 = vpop.permute.xlu0 %2427 }
 0x1f2   : > { %v2438_v2 = vpop.permute.xlu1 %2437 }
 0x1f3   : > { %v2443_v57 = vpop.permute.xlu0 %2442 }
 0x1f6   : > { %v2448_v23 = vpop.permute.xlu1 %2447 }
 0x1f7   : > { %v2453_v26 = vpop.permute.xlu0 %2452 }
 0x1fa   : > { %v2458_v44 = vpop.permute.xlu1 %2457 }
 0x1fb   : > { %v2463_v31 = vpop.permute.xlu0 %2462 }
 0x1fe   : > { %v2468_v37 = vpop.permute.xlu1 %2467 }
 0x23c   : > { %v2218_v33 = vpop.f32.mrb[0].mxu0 }
 0x23d   : > { %v2630_v0 = vmul.f32 %v2428_v43, %v2218_v33  ;;  %2891 = vst.msk [vmem:[%s6005_s9] sm:$0xff] %vm1781_vm3, %v2218_v33  ;;  %v3105_v32 = vpop.f32.mrb[1].mxu0 }
 0x23e   : > { %v2221_v12 = vpop.f32.mrb[2].mxu0  ;;  %v2473_v32 = vpop.permute.xlu0 %2472 }
 0x23f   : > { %v2759_v21 = vmul.f32 %v2630_v0, %v2218_v33  ;;  %v2631_v18 = vmul.f32 %v2433_v36, %v2221_v12  ;;  %2892 = vst.msk [vmem:[%s6005_s9 + $0x8] sm:$0xff] %vm1781_vm3, %v2221_v12  ;;  %v3106_v34 = vpop.f32.mrb[3].mxu0  ;;  %v2671_v45 = vsel %vm1781_vm3, %v2630_v0, 0.0 }
 0x241   : > { %v2672_v51 = vsel %vm1781_vm3, %v2631_v18, 0.0  ;;  %v2760_v56 = vmul.f32 %v2631_v18, %v2221_v12  ;;  %v2800_v22 = vsel %vm1781_vm3, %v2759_v21, 0.0 }
 0x242   : > { %v2673_v59 = vadd.f32 %v2672_v51, %v2671_v45 }
 0x243   : > { %v2801_v55 = vsel %vm1781_vm3, %v2760_v56, 0.0 }
 0x244   : > { %v2802_v39 = vadd.f32 %v2801_v55, %v2800_v22  ;;  %v2226_v60 = vpop.f32.mrb[4].mxu0 }
 0x245   : > { %v2632_v63 = vmul.f32 %v2438_v2, %v2226_v60  ;;  %2893 = vst.msk [vmem:[%s6005_s9 + $0x10] sm:$0xff] %vm1781_vm3, %v2226_v60  ;;  %v3109_v7 = vpop.f32.mrb[5].mxu0 }
 0x246   : > { %v2229_v3 = vpop.f32.mrb[6].mxu0 }
 0x247   : > { %v2674_v30 = vsel %vm1781_vm3, %v2632_v63, 0.0  ;;  %v2761_v49 = vmul.f32 %v2632_v63, %v2226_v60  ;;  %v2633_v8 = vmul.f32 %v2443_v57, %v2229_v3  ;;  %2894 = vst.msk [vmem:[%s6005_s9 + $0x18] sm:$0xff] %vm1781_vm3, %v2229_v3  ;;  %v3110_v38 = vpop.f32.mrb[7].mxu0  ;;  %v2483_v60 = vpop.permute.xlu0 %2482 }
 0x248   : > { %v2675_v24 = vadd.f32 %v2674_v30, %v2673_v59  ;;  %v2478_v59 = vpop.permute.xlu1 %2477 }
 0x249   : > { %v2803_v6 = vsel %vm1781_vm3, %v2761_v49, 0.0  ;;  %v2676_v46 = vsel %vm1781_vm3, %v2633_v8, 0.0  ;;  %v2762_v9 = vmul.f32 %v2633_v8, %v2229_v3 }
 0x24a   : > { %v2804_v54 = vadd.f32 %v2803_v6, %v2802_v39  ;;  %v2677_v28 = vadd.f32 %v2676_v46, %v2675_v24 }
 0x24b   : > { %v2805_v14 = vsel %vm1781_vm3, %v2762_v9, 0.0 }
 0x24c   : > { %v2806_v17 = vadd.f32 %v2805_v14, %v2804_v54  ;;  %v2234_v35 = vpop.f32.mrb[8].mxu0  ;;  %v2488_v6 = vpop.permute.xlu1 %2487 }
 0x24d   : > { %v2634_v48 = vmul.f32 %v2448_v23, %v2234_v35  ;;  %2895 = vst.msk [vmem:[%s6005_s9 + $0x20] sm:$0xff] %vm1781_vm3, %v2234_v35  ;;  %v3113_v11 = vpop.f32.mrb[9].mxu0  ;;  %v2493_v54 = vpop.permute.xlu0 %2492 }
 0x24e   : > { %v2237_v25 = vpop.f32.mrb[10].mxu0 }
 0x24f   : > { %v2678_v40 = vsel %vm1781_vm3, %v2634_v48, 0.0  ;;  %v2763_v42 = vmul.f32 %v2634_v48, %v2234_v35  ;;  %v2635_v15 = vmul.f32 %v2453_v26, %v2237_v25  ;;  %2896 = vst.msk [vmem:[%s6005_s9 + $0x28] sm:$0xff] %vm1781_vm3, %v2237_v25  ;;  %v3114_v13 = vpop.f32.mrb[11].mxu0 }
 0x250   : > { %v2679_v50 = vadd.f32 %v2678_v40, %v2677_v28 }
 0x251   : > { %v2807_v29 = vsel %vm1781_vm3, %v2763_v42, 0.0  ;;  %v2680_v16 = vsel %vm1781_vm3, %v2635_v15, 0.0  ;;  %v2764_v58 = vmul.f32 %v2635_v15, %v2237_v25 }
 0x252   : > { %v2808_v27 = vadd.f32 %v2807_v29, %v2806_v17  ;;  %v2681_v62 = vadd.f32 %v2680_v16, %v2679_v50 }
 0x253   : > { %v2809_v52 = vsel %vm1781_vm3, %v2764_v58, 0.0  ;;  %v2498_v58 = vpop.permute.xlu1 %2497 }
 0x254   : > { %v2810_v53 = vadd.f32 %v2809_v52, %v2808_v27  ;;  %v2242_v4 = vpop.f32.mrb[12].mxu0 }
 0x255   : > { %v2636_v19 = vmul.f32 %v2458_v44, %v2242_v4  ;;  %2897 = vst.msk [vmem:[%s6005_s9 + $0x30] sm:$0xff] %vm1781_vm3, %v2242_v4  ;;  %v3117_v41 = vpop.f32.mrb[13].mxu0  ;;  %v2503_v44 = vpop.permute.xlu0 %2502 }
 0x256   : > { %v2245_v10 = vpop.f32.mrb[14].mxu0 }
 0x257   : > { %v2682_v20 = vsel %vm1781_vm3, %v2636_v19, 0.0  ;;  %v2765_v5 = vmul.f32 %v2636_v19, %v2242_v4  ;;  %v2637_v1 = vmul.f32 %v2463_v31, %v2245_v10  ;;  %2898 = vst.msk [vmem:[%s6005_s9 + $0x38] sm:$0xff] %vm1781_vm3, %v2245_v10  ;;  %v3118_v47 = vpop.f32.mrb[15].mxu0 }
 0x258   : > { %v2683_v61 = vadd.f32 %v2682_v20, %v2681_v62 }
 0x259   : > { %v2811_v43 = vsel %vm1781_vm3, %v2765_v5, 0.0  ;;  %v2684_v33 = vsel %vm1781_vm3, %v2637_v1, 0.0  ;;  %v2766_v0 = vmul.f32 %v2637_v1, %v2245_v10 }
 0x25a   : > { %v2812_v36 = vadd.f32 %v2811_v43, %v2810_v53  ;;  %v2685_v12 = vadd.f32 %v2684_v33, %v2683_v61  ;;  %v2508_v61 = vpop.permute.xlu1 %2507  ;;  %v2513_v33 = vpop.permute.xlu0 %2512 }
 0x25b   : > { %v2813_v21 = vsel %vm1781_vm3, %v2766_v0, 0.0 }
 0x25c   : > { %v2814_v18 = vadd.f32 %v2813_v21, %v2812_v36  ;;  %v2250_v34 = vpop.f32.mrb[16].mxu0 }
 0x25d   : > { %v2638_v45 = vmul.f32 %v2468_v37, %v2250_v34  ;;  %2899 = vst.msk [vmem:[%s6005_s9 + $0x40] sm:$0xff] %vm1781_vm3, %v2250_v34  ;;  %v3121_v51 = vpop.f32.mrb[17].mxu0 }
 0x25e   : > { %v2253_v56 = vpop.f32.mrb[18].mxu0 }
 0x25f   : > { %v2686_v22 = vsel %vm1781_vm3, %v2638_v45, 0.0  ;;  %v2767_v55 = vmul.f32 %v2638_v45, %v2250_v34  ;;  %v2639_v2 = vmul.f32 %v2473_v32, %v2253_v56  ;;  %2900 = vst.msk [vmem:[%s6005_s9 + $0x48] sm:$0xff] %vm1781_vm3, %v2253_v56  ;;  %v3122_v39 = vpop.f32.mrb[19].mxu0 }
 0x260   : > { %v2687_v63 = vadd.f32 %v2686_v22, %v2685_v12  ;;  %v2518_v39 = vpop.permute.xlu1 %2517 }
 0x261   : > { %v2815_v7 = vsel %vm1781_vm3, %v2767_v55, 0.0  ;;  %v2688_v57 = vsel %vm1781_vm3, %v2639_v2, 0.0  ;;  %v2768_v3 = vmul.f32 %v2639_v2, %v2253_v56 }
 0x262   : > { %v2816_v30 = vadd.f32 %v2815_v7, %v2814_v18  ;;  %v2689_v49 = vadd.f32 %v2688_v57, %v2687_v63 }
 0x263   : > { %v2817_v8 = vsel %vm1781_vm3, %v2768_v3, 0.0 }
 0x264   : > { %v2818_v38 = vadd.f32 %v2817_v8, %v2816_v30  ;;  %v2258_v24 = vpop.f32.mrb[20].mxu0  ;;  %v2523_v8 = vpop.permute.xlu0 %2522 }
 0x265   : > { %v2640_v46 = vmul.f32 %v2478_v59, %v2258_v24  ;;  %2901 = vst.msk [vmem:[%s6005_s9 + $0x50] sm:$0xff] %vm1781_vm3, %v2258_v24  ;;  %v3125_v9 = vpop.f32.mrb[21].mxu0 }
 0x266   : > { %v2261_v28 = vpop.f32.mrb[22].mxu0  ;;  %v2528_v9 = vpop.permute.xlu1 %2527 }
 0x267   : > { %v2690_v14 = vsel %vm1781_vm3, %v2640_v46, 0.0  ;;  %v2769_v23 = vmul.f32 %v2640_v46, %v2258_v24  ;;  %v2641_v17 = vmul.f32 %v2483_v60, %v2261_v28  ;;  %2902 = vst.msk [vmem:[%s6005_s9 + $0x58] sm:$0xff] %vm1781_vm3, %v2261_v28  ;;  %v3126_v35 = vpop.f32.mrb[23].mxu0  ;;  %v6052_v48 = vpop.f32.mrb[0].mxu1 }
 0x268   : > { %v2691_v11 = vadd.f32 %v2690_v14, %v2689_v49  ;;  %2913 = vst.msk [vmem:[%s6005_s9 + $0xb0] sm:$0xff] %vm1781_vm3, %v6052_v48  ;;  %v3149_v26 = vpop.f32.mrb[1].mxu1 }
 0x269   : > { %v2819_v25 = vsel %vm1781_vm3, %v2769_v23, 0.0  ;;  %v2692_v40 = vsel %vm1781_vm3, %v2641_v17, 0.0  ;;  %v2770_v42 = vmul.f32 %v2641_v17, %v2261_v28  ;;  %v6059_v15 = vpop.f32.mrb[2].mxu1 }
 0x26a   : > { %v2820_v13 = vadd.f32 %v2819_v25, %v2818_v38  ;;  %v2693_v50 = vadd.f32 %v2692_v40, %v2691_v11  ;;  %2914 = vst.msk [vmem:[%s6005_s9 + $0xb8] sm:$0xff] %vm1781_vm3, %v6059_v15  ;;  %v3150_v29 = vpop.f32.mrb[3].mxu1 }
 0x26b   : > { %v2821_v16 = vsel %vm1781_vm3, %v2770_v42, 0.0 }
 0x26c   : > { %v2822_v27 = vadd.f32 %v2821_v16, %v2820_v13  ;;  %v2266_v62 = vpop.f32.mrb[24].mxu0 }
 0x26d   : > { %v2642_v52 = vmul.f32 %v2488_v6, %v2266_v62  ;;  %2903 = vst.msk [vmem:[%s6005_s9 + $0x60] sm:$0xff] %vm1781_vm3, %v2266_v62  ;;  %v3129_v31 = vpop.f32.mrb[25].mxu0 }
 0x26e   : > { %v2269_v53 = vpop.f32.mrb[26].mxu0 }
 0x26f   : > { %v2694_v4 = vsel %vm1781_vm3, %v2642_v52, 0.0  ;;  %v2771_v19 = vmul.f32 %v2642_v52, %v2266_v62  ;;  %v2643_v41 = vmul.f32 %v2493_v54, %v2269_v53  ;;  %2904 = vst.msk [vmem:[%s6005_s9 + $0x68] sm:$0xff] %vm1781_vm3, %v2269_v53  ;;  %v3130_v10 = vpop.f32.mrb[27].mxu0 }
 0x270   : > { %v2695_v20 = vadd.f32 %v2694_v4, %v2693_v50  ;;  %v2533_v50 = vpop.permute.xlu0 %2532 }
 0x271   : > { %v2823_v5 = vsel %vm1781_vm3, %v2771_v19, 0.0  ;;  %v2696_v1 = vsel %vm1781_vm3, %v2643_v41, 0.0  ;;  %v2772_v47 = vmul.f32 %v2643_v41, %v2269_v53 }
 0x272   : > { %v2824_v37 = vadd.f32 %v2823_v5, %v2822_v27  ;;  %v2697_v43 = vadd.f32 %v2696_v1, %v2695_v20 }
 0x273   : > { %v2825_v0 = vsel %vm1781_vm3, %v2772_v47, 0.0  ;;  %v6073_v32 = vpop.f32.mrb[4].mxu1 }
 0x274   : > { %v2826_v36 = vadd.f32 %v2825_v0, %v2824_v37  ;;  %2915 = vst.msk [vmem:[%s6005_s9 + $0xc0] sm:$0xff] %vm1781_vm3, %v6073_v32  ;;  %v2274_v12 = vpop.f32.mrb[28].mxu0  ;;  %v3153_v21 = vpop.f32.mrb[5].mxu1 }
 0x275   : > { %v2644_v18 = vmul.f32 %v2498_v58, %v2274_v12  ;;  %2905 = vst.msk [vmem:[%s6005_s9 + $0x70] sm:$0xff] %vm1781_vm3, %v2274_v12  ;;  %v3133_v34 = vpop.f32.mrb[29].mxu0  ;;  %v6080_v45 = vpop.f32.mrb[6].mxu1 }
 0x276   : > { %2916 = vst.msk [vmem:[%s6005_s9 + $0xc8] sm:$0xff] %vm1781_vm3, %v6080_v45  ;;  %v2277_v51 = vpop.f32.mrb[30].mxu0  ;;  %v3154_v56 = vpop.f32.mrb[7].mxu1 }
 0x277   : > { %v2698_v59 = vsel %vm1781_vm3, %v2644_v18, 0.0  ;;  %v2773_v22 = vmul.f32 %v2644_v18, %v2274_v12  ;;  %v2645_v55 = vmul.f32 %v2503_v44, %v2277_v51  ;;  %2906 = vst.msk [vmem:[%s6005_s9 + $0x78] sm:$0xff] %vm1781_vm3, %v2277_v51  ;;  %v3134_v2 = vpop.f32.mrb[31].mxu0  ;;  %v2538_v44 = vpop.permute.xlu1 %2537 }
 0x278   : > { %v2699_v60 = vadd.f32 %v2698_v59, %v2697_v43  ;;  %v2543_v4 = vpop.permute.xlu0 %2542 }
 0x279   : > { %v2827_v63 = vsel %vm1781_vm3, %v2773_v22, 0.0  ;;  %v2700_v7 = vsel %vm1781_vm3, %v2645_v55, 0.0  ;;  %v2774_v57 = vmul.f32 %v2645_v55, %v2277_v51  ;;  %v2652_v22 = vmul.f32 %v2538_v44, %v6052_v48 }
 0x27a   : > { %v2828_v3 = vadd.f32 %v2827_v63, %v2826_v36  ;;  %v2701_v30 = vadd.f32 %v2700_v7, %v2699_v60  ;;  %v2653_v7 = vmul.f32 %v2543_v4, %v6059_v15 }
 0x27b   : > { %v2829_v49 = vsel %vm1781_vm3, %v2774_v57, 0.0  ;;  %v2548_v47 = vpop.permute.xlu1 %2547 }
 0x27c   : > { %v2830_v38 = vadd.f32 %v2829_v49, %v2828_v3  ;;  %v2282_v24 = vpop.f32.mrb[32].mxu0  ;;  %v2553_v34 = vpop.permute.xlu0 %2552 }
 0x27d   : > { %v2646_v6 = vmul.f32 %v2508_v61, %v2282_v24  ;;  %2907 = vst.msk [vmem:[%s6005_s9 + $0x80] sm:$0xff] %vm1781_vm3, %v2282_v24  ;;  %v3137_v46 = vpop.f32.mrb[33].mxu0 }
 0x27e   : > { %v2285_v54 = vpop.f32.mrb[34].mxu0 }
 0x27f   : > { %v2702_v28 = vsel %vm1781_vm3, %v2646_v6, 0.0  ;;  %v2775_v14 = vmul.f32 %v2646_v6, %v2282_v24  ;;  %v2647_v23 = vmul.f32 %v2513_v33, %v2285_v54  ;;  %2908 = vst.msk [vmem:[%s6005_s9 + $0x88] sm:$0xff] %vm1781_vm3, %v2285_v54  ;;  %v3138_v17 = vpop.f32.mrb[35].mxu0  ;;  %v6096_v35 = vpop.f32.mrb[8].mxu1  ;;  %v2654_v6 = vmul.f32 %v2548_v47, %v6073_v32 }
 0x280   : > { %v2703_v11 = vadd.f32 %v2702_v28, %v2701_v30  ;;  %2917 = vst.msk [vmem:[%s6005_s9 + $0xd0] sm:$0xff] %vm1781_vm3, %v6096_v35  ;;  %v3157_v26 = vpop.f32.mrb[9].mxu1  ;;  %v2558_v59 = vpop.permute.xlu1 %2557 }
 0x281   : > { %v2831_v25 = vsel %vm1781_vm3, %v2775_v14, 0.0  ;;  %v2704_v40 = vsel %vm1781_vm3, %v2647_v23, 0.0  ;;  %v2776_v42 = vmul.f32 %v2647_v23, %v2285_v54  ;;  %v6103_v13 = vpop.f32.mrb[10].mxu1  ;;  %v2563_v60 = vpop.permute.xlu0 %2562  ;;  %v2655_v26 = vmul.f32 %v2553_v34, %v6080_v45 }
 0x282   : > { %v2832_v29 = vadd.f32 %v2831_v25, %v2830_v38  ;;  %v2705_v16 = vadd.f32 %v2704_v40, %v2703_v11  ;;  %2918 = vst.msk [vmem:[%s6005_s9 + $0xd8] sm:$0xff] %vm1781_vm3, %v6103_v13  ;;  %v3158_v58 = vpop.f32.mrb[11].mxu1  ;;  %v2782_v11 = vmul.f32 %v2653_v7, %v6059_v15  ;;  %v2656_v15 = vmul.f32 %v2558_v59, %v6096_v35 }
 0x283   : > { %v2833_v27 = vsel %vm1781_vm3, %v2776_v42, 0.0  ;;  %v2718_v4 = vsel %vm1781_vm3, %v2654_v6, 0.0 }
 0x284   : > { %v2834_v62 = vadd.f32 %v2833_v27, %v2832_v29  ;;  %v2568_v24 = vpop.permute.xlu1 %2567  ;;  %v2716_v27 = vsel %vm1781_vm3, %v2653_v7, 0.0 }
 0x285   : > { %v2573_v42 = vpop.permute.xlu0 %2572 }
 0x286   : > { %v2290_v52 = vpop.f32.mrb[36].mxu0 }
 0x287   : > { %v2648_v31 = vmul.f32 %v2518_v39, %v2290_v52  ;;  %2909 = vst.msk [vmem:[%s6005_s9 + $0x90] sm:$0xff] %vm1781_vm3, %v2290_v52  ;;  %v3141_v53 = vpop.f32.mrb[37].mxu0 }
 0x288   : > { %v2293_v19 = vpop.f32.mrb[38].mxu0  ;;  %v2845_v53 = vsel %vm1781_vm3, %v2782_v11, 0.0 }
 0x289   : > { %v2706_v41 = vsel %vm1781_vm3, %v2648_v31, 0.0  ;;  %v2777_v10 = vmul.f32 %v2648_v31, %v2290_v52  ;;  %v2649_v20 = vmul.f32 %v2523_v8, %v2293_v19  ;;  %2910 = vst.msk [vmem:[%s6005_s9 + $0x98] sm:$0xff] %vm1781_vm3, %v2293_v19  ;;  %v3142_v5 = vpop.f32.mrb[39].mxu0  ;;  %v2781_v8 = vmul.f32 %v2652_v22, %v6052_v48  ;;  %v2578_v31 = vpop.permute.xlu1 %2577 }
 0x28a   : > { %v2707_v1 = vadd.f32 %v2706_v41, %v2705_v16  ;;  %v2714_v48 = vsel %vm1781_vm3, %v2652_v22, 0.0  ;;  %v2657_v41 = vmul.f32 %v2563_v60, %v6103_v13 }
 0x28b   : > { %v2835_v61 = vsel %vm1781_vm3, %v2777_v10, 0.0  ;;  %v2708_v37 = vsel %vm1781_vm3, %v2649_v20, 0.0  ;;  %v2778_v43 = vmul.f32 %v2649_v20, %v2293_v19  ;;  %v6116_v33 = vpop.f32.mrb[12].mxu1  ;;  %v2843_v58 = vsel %vm1781_vm3, %v2781_v8, 0.0 }
 0x28c   : > { %v2836_v0 = vadd.f32 %v2835_v61, %v2834_v62  ;;  %v2709_v36 = vadd.f32 %v2708_v37, %v2707_v1  ;;  %2919 = vst.msk [vmem:[%s6005_s9 + $0xe0] sm:$0xff] %vm1781_vm3, %v6116_v33  ;;  %v3161_v12 = vpop.f32.mrb[13].mxu1  ;;  %v2783_v62 = vmul.f32 %v2654_v6, %v6073_v32  ;;  %v2784_v19 = vmul.f32 %v2655_v26, %v6080_v45  ;;  %v2583_v37 = vpop.permute.xlu0 %2582 }
 0x28d   : > { %v2837_v21 = vsel %vm1781_vm3, %v2778_v43, 0.0  ;;  %v6122_v18 = vpop.f32.mrb[14].mxu1  ;;  %v2720_v32 = vsel %vm1781_vm3, %v2655_v26, 0.0  ;;  %v2785_v1 = vmul.f32 %v2656_v15, %v6096_v35  ;;  %v2658_v47 = vmul.f32 %v2568_v24, %v6116_v33  ;;  %v2588_v22 = vpop.permute.xlu1 %2587 }
 0x28e   : > { %v2838_v51 = vadd.f32 %v2837_v21, %v2836_v0  ;;  %2920 = vst.msk [vmem:[%s6005_s9 + $0xe8] sm:$0xff] %vm1781_vm3, %v6122_v18  ;;  %v3162_v56 = vpop.f32.mrb[15].mxu1  ;;  %v2847_v5 = vsel %vm1781_vm3, %v2783_v62, 0.0  ;;  %v2722_v12 = vsel %vm1781_vm3, %v2656_v15, 0.0  ;;  %v2786_v21 = vmul.f32 %v2657_v41, %v6103_v13 }
 0x28f   : > { %v2659_v34 = vmul.f32 %v2573_v42, %v6122_v18 }
 0x290   : > { %v2853_v7 = vsel %vm1781_vm3, %v2786_v21, 0.0 }
 0x292   : > { %v2298_v55 = vpop.f32.mrb[40].mxu0 }
 0x293   : > { %v2650_v2 = vmul.f32 %v2528_v9, %v2298_v55  ;;  %2911 = vst.msk [vmem:[%s6005_s9 + $0xa0] sm:$0xff] %vm1781_vm3, %v2298_v55  ;;  %v3145_v39 = vpop.f32.mrb[41].mxu0 }
 0x294   : > { %v2301_v63 = vpop.f32.mrb[42].mxu0  ;;  %v2787_v39 = vmul.f32 %v2658_v47, %v6116_v33  ;;  %v2728_v33 = vsel %vm1781_vm3, %v2659_v34, 0.0 }
 0x295   : > { %v2710_v57 = vsel %vm1781_vm3, %v2650_v2, 0.0  ;;  %v2779_v3 = vmul.f32 %v2650_v2, %v2298_v55  ;;  %v2651_v30 = vmul.f32 %v2533_v50, %v2301_v63  ;;  %2912 = vst.msk [vmem:[%s6005_s9 + $0xa8] sm:$0xff] %vm1781_vm3, %v2301_v63  ;;  %v3146_v49 = vpop.f32.mrb[43].mxu0  ;;  %v2851_v55 = vsel %vm1781_vm3, %v2785_v1, 0.0 }
 0x296   : > { %v2711_v38 = vadd.f32 %v2710_v57, %v2709_v36  ;;  %v2849_v36 = vsel %vm1781_vm3, %v2784_v19, 0.0  ;;  %v2724_v2 = vsel %vm1781_vm3, %v2657_v41, 0.0  ;;  %v2726_v57 = vsel %vm1781_vm3, %v2658_v47, 0.0  ;;  %v2593_v49 = vpop.permute.xlu0 %2592 }
 0x297   : > { %v2839_v46 = vsel %vm1781_vm3, %v2779_v3, 0.0  ;;  %v2712_v9 = vsel %vm1781_vm3, %v2651_v30, 0.0  ;;  %v2780_v54 = vmul.f32 %v2651_v30, %v2301_v63  ;;  %v6138_v28 = vpop.f32.mrb[16].mxu1  ;;  %v2788_v3 = vmul.f32 %v2659_v34, %v6122_v18  ;;  %v2598_v18 = vpop.permute.xlu1 %2597 }
 0x298   : > { %v2840_v14 = vadd.f32 %v2839_v46, %v2838_v51  ;;  %v2713_v23 = vadd.f32 %v2712_v9, %v2711_v38  ;;  %2921 = vst.msk [vmem:[%s6005_s9 + $0xf0] sm:$0xff] %vm1781_vm3, %v6138_v28  ;;  %v3165_v17 = vpop.f32.mrb[17].mxu1  ;;  %v2660_v60 = vmul.f32 %v2578_v31, %v6138_v28  ;;  %v2855_v24 = vsel %vm1781_vm3, %v2787_v39, 0.0 }
 0x299   : > { %v2841_v25 = vsel %vm1781_vm3, %v2780_v54, 0.0  ;;  %v6147_v40 = vpop.f32.mrb[18].mxu1  ;;  %v2857_v17 = vsel %vm1781_vm3, %v2788_v3, 0.0 }
 0x29a   : > { %v2715_v50 = vadd.f32 %v2714_v48, %v2713_v23  ;;  %v2842_v29 = vadd.f32 %v2841_v25, %v2840_v14  ;;  %2922 = vst.msk [vmem:[%s6005_s9 + $0xf8] sm:$0xff] %vm1781_vm3, %v6147_v40  ;;  %v3166_v16 = vpop.f32.mrb[19].mxu1  ;;  %v2661_v30 = vmul.f32 %v2583_v37, %v6147_v40  ;;  %v2789_v6 = vmul.f32 %v2660_v60, %v6138_v28  ;;  %v2603_v62 = vpop.permute.xlu0 %2602 }
 0x29b   : > { %v2730_v48 = vsel %vm1781_vm3, %v2660_v60, 0.0  ;;  %v2608_v41 = vpop.permute.xlu1 %2607 }
 0x29c   : > { %v2717_v44 = vadd.f32 %v2716_v27, %v2715_v50  ;;  %v2844_v52 = vadd.f32 %v2843_v58, %v2842_v29  ;;  %v2790_v11 = vmul.f32 %v2661_v30, %v6147_v40  ;;  %v2859_v29 = vsel %vm1781_vm3, %v2789_v6, 0.0 }
 0x29d   : > { %v2732_v16 = vsel %vm1781_vm3, %v2661_v30, 0.0 }
 0x29e   : > { %v2719_v10 = vadd.f32 %v2718_v4, %v2717_v44  ;;  %v2846_v20 = vadd.f32 %v2845_v53, %v2844_v52  ;;  %v2861_v52 = vsel %vm1781_vm3, %v2790_v11, 0.0 }
 0x29f   : > { %v2346_v61 = vpop.f32.mrb[20].mxu1 }
 0x2a0   : > { %v2721_v43 = vadd.f32 %v2720_v32, %v2719_v10  ;;  %v2848_v0 = vadd.f32 %v2847_v5, %v2846_v20  ;;  %2923 = vst.msk [vmem:[%s6005_s9 + $0x100] sm:$0xff] %vm1781_vm3, %v2346_v61  ;;  %v3169_v45 = vpop.f32.mrb[21].mxu1  ;;  %v2662_v46 = vmul.f32 %v2588_v22, %v2346_v61 }
 0x2a1   : > { %v2349_v51 = vpop.f32.mrb[22].mxu1 }
 0x2a2   : > { %v2850_v56 = vadd.f32 %v2849_v36, %v2848_v0  ;;  %v2723_v35 = vadd.f32 %v2722_v12, %v2721_v43  ;;  %2924 = vst.msk [vmem:[%s6005_s9 + $0x108] sm:$0xff] %vm1781_vm3, %v2349_v51  ;;  %v3170_v59 = vpop.f32.mrb[23].mxu1  ;;  %v2663_v26 = vmul.f32 %v2593_v49, %v2349_v51  ;;  %v2791_v58 = vmul.f32 %v2662_v46, %v2346_v61  ;;  %v2613_v12 = vpop.permute.xlu0 %2612 }
 0x2a3   : > { %v2734_v40 = vsel %vm1781_vm3, %v2662_v46, 0.0 }
 0x2a4   : > { %v2725_v63 = vadd.f32 %v2724_v2, %v2723_v35  ;;  %v2852_v13 = vadd.f32 %v2851_v55, %v2850_v56  ;;  %v2792_v31 = vmul.f32 %v2663_v26, %v2349_v51  ;;  %v2863_v10 = vsel %vm1781_vm3, %v2791_v58, 0.0 }
 0x2a5   : > { %v2736_v20 = vsel %vm1781_vm3, %v2663_v26, 0.0 }
 0x2a6   : > { %v2727_v8 = vadd.f32 %v2726_v57, %v2725_v63  ;;  %v2854_v38 = vadd.f32 %v2853_v7, %v2852_v13  ;;  %v2865_v43 = vsel %vm1781_vm3, %v2792_v31, 0.0  ;;  %v2618_v57 = vpop.permute.xlu1 %2617  ;;  %v2623_v6 = vpop.permute.xlu0 %2622 }
 0x2a7   : > { %v2354_v9 = vpop.f32.mrb[24].mxu1 }
 0x2a8   : > { %v2729_v54 = vadd.f32 %v2728_v33, %v2727_v8  ;;  %v2856_v14 = vadd.f32 %v2855_v24, %v2854_v38  ;;  %2925 = vst.msk [vmem:[%s6005_s9 + $0x110] sm:$0xff] %vm1781_vm3, %v2354_v9  ;;  %v3173_v23 = vpop.f32.mrb[25].mxu1  ;;  %v2664_v27 = vmul.f32 %v2598_v18, %v2354_v9 }
 0x2a9   : > { %v2357_v25 = vpop.f32.mrb[26].mxu1 }
 0x2aa   : > { %v2731_v42 = vadd.f32 %v2730_v48, %v2729_v54  ;;  %v2858_v50 = vadd.f32 %v2857_v17, %v2856_v14  ;;  %2926 = vst.msk [vmem:[%s6005_s9 + $0x118] sm:$0xff] %vm1781_vm3, %v2357_v25  ;;  %v3174_v28 = vpop.f32.mrb[27].mxu1  ;;  %v2665_v53 = vmul.f32 %v2603_v62, %v2357_v25  ;;  %v2793_v5 = vmul.f32 %v2664_v27, %v2354_v9 }
 0x2ab   : > { %v2738_v0 = vsel %vm1781_vm3, %v2664_v27, 0.0 }
 0x2ac   : > { %v2860_v15 = vadd.f32 %v2859_v29, %v2858_v50  ;;  %v2733_v44 = vadd.f32 %v2732_v16, %v2731_v42  ;;  %v2794_v45 = vmul.f32 %v2665_v53, %v2357_v25  ;;  %v2867_v56 = vsel %vm1781_vm3, %v2793_v5, 0.0  ;;  %v2628_v29 = vpop.permute.xlu1 %2627 }
 0x2ad   : > { %v2740_v35 = vsel %vm1781_vm3, %v2665_v53, 0.0 }
 0x2ae   : > { %v2862_v4 = vadd.f32 %v2861_v52, %v2860_v15  ;;  %v2735_v19 = vadd.f32 %v2734_v40, %v2733_v44  ;;  %v2869_v39 = vsel %vm1781_vm3, %v2794_v45, 0.0 }
 0x2af   : > { %v2362_v32 = vpop.f32.mrb[28].mxu1 }
 0x2b0   : > { %v2864_v1 = vadd.f32 %v2863_v10, %v2862_v4  ;;  %v2737_v47 = vadd.f32 %v2736_v20, %v2735_v19  ;;  %v2666_v61 = vmul.f32 %v2608_v41, %v2362_v32  ;;  %2927 = vst.msk [vmem:[%s6005_s9 + $0x120] sm:$0xff] %vm1781_vm3, %v2362_v32  ;;  %v3177_v37 = vpop.f32.mrb[29].mxu1 }
 0x2b1   : > { %v2365_v36 = vpop.f32.mrb[30].mxu1 }
 0x2b2   : > { %v2866_v21 = vadd.f32 %v2865_v43, %v2864_v1  ;;  %v2739_v34 = vadd.f32 %v2738_v0, %v2737_v47  ;;  %2928 = vst.msk [vmem:[%s6005_s9 + $0x128] sm:$0xff] %vm1781_vm3, %v2365_v36  ;;  %v3178_v51 = vpop.f32.mrb[31].mxu1  ;;  %v2795_v59 = vmul.f32 %v2666_v61, %v2362_v32  ;;  %v2667_v22 = vmul.f32 %v2613_v12, %v2365_v36 }
 0x2b3   : > { %v2742_v60 = vsel %vm1781_vm3, %v2666_v61, 0.0 }
 0x2b4   : > { %v2868_v55 = vadd.f32 %v2867_v56, %v2866_v21  ;;  %v2741_v2 = vadd.f32 %v2740_v35, %v2739_v34  ;;  %v2796_v63 = vmul.f32 %v2667_v22, %v2365_v36  ;;  %v2871_v3 = vsel %vm1781_vm3, %v2795_v59, 0.0 }
 0x2b5   : > { %v2744_v30 = vsel %vm1781_vm3, %v2667_v22, 0.0 }
 0x2b6   : > { %v2870_v13 = vadd.f32 %v2869_v39, %v2868_v55  ;;  %v2743_v7 = vadd.f32 %v2742_v60, %v2741_v2  ;;  %v2873_v46 = vsel %vm1781_vm3, %v2796_v63, 0.0 }
 0x2b7   : > { %v2370_v49 = vpop.f32.mrb[32].mxu1 }
 0x2b8   : > { %v2872_v8 = vadd.f32 %v2871_v3, %v2870_v13  ;;  %v2745_v38 = vadd.f32 %v2744_v30, %v2743_v7  ;;  %v2668_v24 = vmul.f32 %v2618_v57, %v2370_v49  ;;  %2929 = vst.msk [vmem:[%s6005_s9 + $0x130] sm:$0xff] %vm1781_vm3, %v2370_v49  ;;  %v3181_v33 = vpop.f32.mrb[33].mxu1 }
 0x2b9   : > { %v2373_v9 = vpop.f32.mrb[34].mxu1 }
 0x2ba   : > { %v2874_v54 = vadd.f32 %v2873_v46, %v2872_v8  ;;  %v2746_v14 = vsel %vm1781_vm3, %v2668_v24, 0.0  ;;  %v2797_v23 = vmul.f32 %v2668_v24, %v2370_v49  ;;  %v2669_v18 = vmul.f32 %v2623_v6, %v2373_v9  ;;  %2930 = vst.msk [vmem:[%s6005_s9 + $0x138] sm:$0xff] %vm1781_vm3, %v2373_v9  ;;  %v3182_v17 = vpop.f32.mrb[35].mxu1 }
 0x2bb   : > { %v2747_v48 = vadd.f32 %v2746_v14, %v2745_v38 }
 0x2bc   : > { %v2875_v11 = vsel %vm1781_vm3, %v2797_v23, 0.0  ;;  %v2748_v26 = vsel %vm1781_vm3, %v2669_v18, 0.0  ;;  %v2798_v25 = vmul.f32 %v2669_v18, %v2373_v9 }
 0x2bd   : > { %v2876_v42 = vadd.f32 %v2875_v11, %v2874_v54  ;;  %v2749_v50 = vadd.f32 %v2748_v26, %v2747_v48 }
 0x2be   : > { %v2877_v28 = vsel %vm1781_vm3, %v2798_v25, 0.0 }
 0x2bf   : > { %v2878_v16 = vadd.f32 %v2877_v28, %v2876_v42  ;;  %v2378_v58 = vpop.f32.mrb[36].mxu1 }
 0x2c0   : > { %v2670_v27 = vmul.f32 %v2628_v29, %v2378_v58  ;;  %2931 = vst.msk [vmem:[%s6005_s9 + $0x140] sm:$0xf] %vm2750_vm11, %v2378_v58  ;;  %v3185_v62 = vpop.f32.mrb[37].mxu1 }
 0x2c1   : > { %v2381_v15 = vpop.f32.mrb[38].mxu1 }
 0x2c2   : > { %v2751_v44 = vsel %vm2750_vm11, %v2670_v27, 0.0  ;;  %v2799_v52 = vmul.f32 %v2670_v27, %v2378_v58  ;;  %v3186_v40 = vpop.f32.mrb[39].mxu1 }
 0x2c3   : > { %v2752_v31 = vadd.f32 %v2751_v44, %v2749_v50 }
 0x2c4   : > { %v2879_v53 = vsel %vm2750_vm11, %v2799_v52, 0.0 }
 0x2c5   : > { %v2753_v4 = vrot.slane %v2752_v31, 4  ;;  %v2880_v19 = vadd.f32 %v2879_v53, %v2878_v16 }
 0x2c7   : > { %v2754_v41 = vadd.f32 %v2753_v4, %v2752_v31  ;;  %v2881_v10 = vrot.slane %v2880_v19, 4 }
 0x2c9   : > { %v2755_v20 = vrot.slane %v2754_v41, 2  ;;  %v2882_v5 = vadd.f32 %v2881_v10, %v2880_v19 }
 0x2cb   : > { %v2756_v32 = vadd.f32 %v2755_v20, %v2754_v41  ;;  %v2883_v1 = vrot.slane %v2882_v5, 2 }
 0x2cd   : > { %v2884_v47 = vadd.f32 %v2883_v1, %v2882_v5  ;;  %v2757_v61 = vrot.slane %v2756_v32, 1 }
 0x2cf   : > { %v2885_v37 = vrot.slane %v2884_v47, 1  ;;  %v2758_v43 = vadd.f32 %v2757_v61, %v2756_v32 }
 0x2d1   : > { %v2886_v0 = vadd.f32 %v2885_v37, %v2884_v47 }
 0x2d3   : > { %v2888_v45 = vsel %vm2887_vm12, %v2758_v43, %v2886_v0 }
 0x2d4   : > { %2890 = vst.msk [vmem:[%s198_s12] sm:$0x3] %vm2889_vm13, %v2888_v45 }
 0x2d5   : > { %4063 = shalt.err (!%p4060_p3)
}
 0x2d6   : > { %s4064_s5 = scalar_lea.hbm %s6223_s22, 32  ;;  %s4068_s8 = scalar_lea.hbm %s6269_s4, 64 }
 0x2d7   : > { %p4065_p4 = scmp.ne.s32.totalorder %s6223_s22, %s4064_s5  ;;  %p4069_p9 = scmp.lt.u32.totalorder %s6223_s22, %s6269_s4 }
 0x2d8   : > { %p4070_p10 = scmp.lt.u32.totalorder %s4068_s8, %s4064_s5  ;;  %p4072_p12 = scmp.lt.u32.totalorder %s4064_s5, %s6223_s22 }
 0x2d9   : > { %p4066_p7 = pnand %p4065_p4, %p4189_p5 }
 0x2da   : > { %p4071_p11 = por %p4070_p10, %p4069_p9 }
 0x2db   : > { %p4067_p8 = pneg %p4066_p7 }
 0x2dc   : > { %p4073_p13 = por %p4072_p12, %p4071_p11 }
 0x2de   : > { %p4074_p0 = pnand %p4073_p13, %p4067_p8 }
 0x2e0   : > { %4077 = shalt.err (!%p4074_p0)
}
 0x2e1   : > { %3195 = dma.vmem_to_hbm [thread:$0]  (%p4189_p5), %s6225_s13, 32, %s6223_s22, %s2938_s23  }
 0x2e2 PF: > { %p3201_p1 = scmp.ge.s32.totalorder %s4112_s18, 2  ;;  %s2974_s10 = sand.u32 1, %s4100_s15  }
 0x2e3   : > { %s2975_s11 = scalar_lea.sflag [#allocation3], %s2974_s10 }
 0x2e4   : > { %p3198_p2 = pnand %p3201_p1, %p4193_p6 }
 0x2e6   : > { %4095 = dma.done.wait (!%p3198_p2), %s2975_s11, 32  }
 0x2e7   : > { %4097 = vsyncadd (!%p3198_p2), %s2975_s11, 4294967264  ;;  %p15_p3 = scmp.ge.s32.totalorder %s4176_s21, 4   ;;  %s6487_s15 = smov %s4104_s16 }
 0x2e8   : > { %s6488_s16 = smov %s4108_s17  ;;  %s6489_s17 = smov %s4187_s24 }
 0x2e9   : > { %s6490_s18 = smov %s4176_s21  ;;  %17 = sbr.rel (!%p15_p3) target bundleno = 3 (0x3), region = 79 }
 0x2f0   :  { %2980 = vsyncpa [#allocation3], 1 }
 0x2f1   :  { %2982 = vsyncpa [#allocation3 + $0x1], 1 }

</bundles_post_ra>
